<compile_context>
chip_gen: v6e
topology: v6e:2x2x1
jax: 0.10.0
libtpu: 0.0.40
codegen_flags: <defaults>
</compile_context>

<pallas_src>
import functools

import jax
import jax.numpy as jnp
from jax.experimental import pallas as pl
from jax.experimental.pallas import tpu as pltpu


# ---------------------------------------------------------------------------
# Tiling helpers
# ---------------------------------------------------------------------------
_TM, _TN, _TK = 512, 256, 1024      # GEMM tile caps (VMEM-safe on v5e/v6e/v7x)


def _round_up(x, m):
    return ((x + m - 1) // m) * m


def _tile_pad(dim, tile_cap, align=1):
    """Return (tile, padded_dim): full-dim block when small, else fixed tile."""
    if dim <= tile_cap:
        p = _round_up(dim, align)
        return p, p
    return tile_cap, _round_up(dim, tile_cap)


# ---------------------------------------------------------------------------
# Pallas kernel 1: tiled GEMM, bf16 in / f32 accumulate, fused epilogue.
#   Optionally emits per-row-tile column sums and sums-of-squares
#   (the BatchNorm batch statistics) and/or a fused tanh.
# ---------------------------------------------------------------------------
def _gemm_kernel(a_ref, b_ref, *rest, activation, with_stats):
    if with_stats:
        y_ref, cs_ref, cq_ref, acc_ref = rest
    else:
        y_ref, acc_ref = rest
    k = pl.program_id(2)

    @pl.when(k == 0)
    def _():
        acc_ref[...] = jnp.zeros_like(acc_ref)

    acc_ref[...] += jnp.dot(a_ref[...], b_ref[...],
                            preferred_element_type=jnp.float32)

    @pl.when(k == pl.num_programs(2) - 1)
    def _():
        y = acc_ref[...]
        if activation == "tanh":
            y = jnp.tanh(y)
        y_ref[...] = y.astype(y_ref.dtype)
        if with_stats:
            cs_ref[...] = jnp.sum(y, axis=0, keepdims=True)[None]
            cq_ref[...] = jnp.sum(y * y, axis=0, keepdims=True)[None]


def pallas_gemm(a, b, *, activation=None, with_stats=True,
                out_dtype=jnp.bfloat16):
    """(M,K) @ (K,N).  with_stats -> (Y_padded, colsum (N,), colssq (N,))."""
    M, K = a.shape
    K2, N = b.shape
    assert K == K2
    tm, Mp = _tile_pad(M, _TM, align=8)
    tk, Kp = _tile_pad(K, _TK, align=8)
    tn, Np = _tile_pad(N, _TN, align=128)   # lane-dense stores even for small N

    a = a.astype(jnp.bfloat16)
    b = b.astype(jnp.bfloat16)
    if (Mp, Kp) != (M, K):
        a = jnp.pad(a, ((0, Mp - M), (0, Kp - K)))
    if (Kp, Np) != (K, N):
        b = jnp.pad(b, ((0, Kp - K), (0, Np - N)))
    mt, nt, kt = Mp // tm, Np // tn, Kp // tk

    y_shape = jax.ShapeDtypeStruct((Mp, Np), out_dtype)
    y_spec = pl.BlockSpec((tm, tn), lambda i, j, k: (i, j))
    if with_stats:
        s_shape = jax.ShapeDtypeStruct((mt, 1, Np), jnp.float32)
        s_spec = pl.BlockSpec((1, 1, tn), lambda i, j, k: (i, 0, j))
        out_shape = (y_shape, s_shape, s_shape)
        out_specs = (y_spec, s_spec, s_spec)
    else:
        out_shape = y_shape
        out_specs = y_spec

    itemsize = jnp.dtype(out_dtype).itemsize
    outs = pl.pallas_call(
        functools.partial(_gemm_kernel, activation=activation,
                          with_stats=with_stats),
        out_shape=out_shape,
        grid=(mt, nt, kt),
        in_specs=[
            pl.BlockSpec((tm, tk), lambda i, j, k: (i, k)),
            pl.BlockSpec((tk, tn), lambda i, j, k: (k, j)),
        ],
        out_specs=out_specs,
        scratch_shapes=[pltpu.VMEM((tm, tn), jnp.float32)],
        compiler_params=pltpu.CompilerParams(
            dimension_semantics=("parallel", "parallel", "arbitrary")),
        cost_estimate=pl.CostEstimate(
            flops=2 * Mp * Kp * Np,
            transcendentals=Mp * Np if activation == "tanh" else 0,
            bytes_accessed=Mp * Kp * 2 + Kp * Np * 2 + Mp * Np * itemsize),
    )(a, b)

    if with_stats:
        y, cs, cq = outs
        colsum = jnp.sum(cs.reshape(mt, Np), axis=0)[:N]
        colssq = jnp.sum(cq.reshape(mt, Np), axis=0)[:N]
        return y, colsum, colssq
    return outs


# ---------------------------------------------------------------------------
# Pallas kernel 2: per-column scale/shift + ReLU (BatchNorm apply), bf16 out.
# ---------------------------------------------------------------------------
def _bn_relu_kernel(x_ref, s_ref, t_ref, o_ref):
    y = x_ref[...].astype(jnp.float32) * s_ref[...] + t_ref[...]
    o_ref[...] = jnp.maximum(y, 0.0).astype(o_ref.dtype)


def _bn_tile(mp, ncols):
    if mp <= 512:
        return mp
    for t in (512, 256, 128, 64, 32, 16, 8):    # mp is a multiple of 512 here
        if t * ncols * 4 <= 2 * 1024 * 1024:
            return t
    return 8


def bn_relu_apply(y, scale_cols, shift_cols, out_dtype=jnp.bfloat16):
    mp, ncols = y.shape
    tmb = _bn_tile(mp, ncols)
    return pl.pallas_call(
        _bn_relu_kernel,
        out_shape=jax.ShapeDtypeStruct((mp, ncols), out_dtype),
        grid=(mp // tmb,),
        in_specs=[
            pl.BlockSpec((tmb, ncols), lambda i: (i, 0)),
            pl.BlockSpec((1, ncols), lambda i: (0, 0)),
            pl.BlockSpec((1, ncols), lambda i: (0, 0)),
        ],
        out_specs=pl.BlockSpec((tmb, ncols), lambda i: (i, 0)),
        compiler_params=pltpu.CompilerParams(dimension_semantics=("parallel",)),
    )(y, scale_cols.reshape(1, ncols).astype(jnp.float32),
      shift_cols.reshape(1, ncols).astype(jnp.float32))


# ---------------------------------------------------------------------------
# ConvTranspose2d(k=4, s=2, p=1) phase decomposition (plain-JAX layout glue)
# ---------------------------------------------------------------------------
def phase_weight_s2(w):
    """Weight (Cin, Cout, 4, 4) -> GEMM matrix (9*Cin, 4*Cout).

    Rows: 3x3 taps (dy, dx) around each input pixel; column groups: the four
    output sub-pixel phases (py, px).  out[2m+py, 2n+px] = patch(m,n) @ B."""
    cin, cout = w.shape[0], w.shape[1]
    zero = jnp.zeros((cin, cout), w.dtype)
    tap_rows = []
    for dy in (-1, 0, 1):
        for dx in (-1, 0, 1):
            phase_cols = []
            for py in (0, 1):
                for px in (0, 1):
                    ky = py - 2 * dy + 1
                    kx = px - 2 * dx + 1
                    if 0 <= ky < 4 and 0 <= kx < 4:
                        phase_cols.append(w[:, :, ky, kx])
                    else:
                        phase_cols.append(zero)
            tap_rows.append(jnp.concatenate(phase_cols, axis=1))
    return jnp.concatenate(tap_rows, axis=0)


def build_patches_s2(x):
    """3x3-tap im2col of NHWC x -> (N*H*W, 9*Cin)."""
    n, h, w, cin = x.shape
    xp = jnp.pad(x, ((0, 0), (1, 1), (1, 1), (0, 0)))
    taps = [xp[:, 1 + dy:1 + dy + h, 1 + dx:1 + dx + w, :]
            for dy in (-1, 0, 1) for dx in (-1, 0, 1)]
    return jnp.concatenate(taps, axis=-1).reshape(n * h * w, 9 * cin)


def build_patches_s2_t(x):
    """Transposed 3x3-tap im2col: NHWC x -> (9*Cin, N*H*W)."""
    n, h, w, cin = x.shape
    xp = jnp.pad(x, ((0, 0), (1, 1), (1, 1), (0, 0)))
    taps = [xp[:, 1 + dy:1 + dy + h, 1 + dx:1 + dx + w, :]
            for dy in (-1, 0, 1) for dx in (-1, 0, 1)]
    t = jnp.stack(taps, axis=0)                 # (9, N, H, W, Cin)
    t = jnp.transpose(t, (0, 4, 1, 2, 3))       # (9, Cin, N, H, W)
    return t.reshape(9 * cin, n * h * w)


def deinterleave_s2(y, n, h, w, c):
    """Phase-grouped GEMM output (>=N*H*W, >=4*C) -> NHWC (N, 2H, 2W, C)."""
    y = y[:n * h * w, :4 * c].reshape(n, h, w, 2, 2, c)
    y = jnp.transpose(y, (0, 1, 3, 2, 4, 5))    # (N, H, py, W, px, C)
    return y.reshape(n, 2 * h, 2 * w, c)


def bn_scale_shift(colsum, colssq, count, groups, c, gamma, beta, eps=1e-5):
    """Training-mode BatchNorm2d (batch stats, biased variance) scale/shift."""
    # TODO(synk): eval-mode BN (running_mean/running_var) is not implemented;
    # this matches PyTorch's training-mode forward.
    s = colsum.reshape(groups, c).sum(axis=0)
    q = colssq.reshape(groups, c).sum(axis=0)
    mean = s / count
    var = jnp.maximum(q / count - mean * mean, 0.0)
    scale = gamma * jax.lax.rsqrt(var + eps)
    shift = beta - mean * scale
    return scale, shift


def _tile_to_cols(v, groups, ncols):
    cols = jnp.tile(v, groups)
    if cols.shape[0] != ncols:
        cols = jnp.pad(cols, (0, ncols - cols.shape[0]))
    return cols


# ---------------------------------------------------------------------------
# Parameters + forward
# ---------------------------------------------------------------------------
def init_params(key, nz, ngf, nc):
    ks = jax.random.split(key, 5)

    def winit(k, cin, cout):
        # ConvTranspose2d weight shape: (in_channels, out_channels, 4, 4)
        return 0.05 * jax.random.normal(k, (cin, cout, 4, 4), jnp.float32)

    chans = [ngf * 8, ngf * 4, ngf * 2, ngf]
    params = {
        "w1": winit(ks[0], nz, ngf * 8),
        "w2": winit(ks[1], ngf * 8, ngf * 4),
        "w3": winit(ks[2], ngf * 4, ngf * 2),
        "w4": winit(ks[3], ngf * 2, ngf),
        "w5": winit(ks[4], ngf, nc),
    }
    for i, c in enumerate(chans, start=1):
        params[f"g{i}"] = jnp.ones((c,), jnp.float32)    # PyTorch BN default init
        params[f"b{i}"] = jnp.zeros((c,), jnp.float32)
    return params


def netG64_forward(z_nchw, params):
    """z_nchw: (N, nz, 1, 1) -> (N, nc, 64, 64), matching _netG64.forward."""
    nb, nz = z_nchw.shape[0], z_nchw.shape[1]
    z2d = z_nchw.reshape(nb, nz).astype(jnp.float32)

    # -- layer 1: ConvTranspose(nz, ngf*8, 4, 1, 0) on a 1x1 input == one GEMM
    w1 = params["w1"]
    c1 = w1.shape[1]
    w1_mat = jnp.transpose(w1, (0, 2, 3, 1)).reshape(nz, 16 * c1)  # cols=(ky,kx,co)
    y, cs, cq = pallas_gemm(z2d, w1_mat)
    scale, shift = bn_scale_shift(cs, cq, nb * 16, 16, c1,
                                  params["g1"], params["b1"])
    y = bn_relu_apply(y, _tile_to_cols(scale, 16, y.shape[1]),
                      _tile_to_cols(shift, 16, y.shape[1]))
    x = y[:nb, :16 * c1].reshape(nb, 4, 4, c1)                     # NHWC 4x4

    # -- layers 2..4: phase-decomposed ConvTranspose(4, 2, 1) + BN + ReLU
    for wk, gk, bk in (("w2", "g2", "b2"), ("w3", "g3", "b3"), ("w4", "g4", "b4")):
        w = params[wk]
        cout = w.shape[1]
        n, h, wd, _ = x.shape
        patches = build_patches_s2(x)                              # (N*H*W, 9*Cin)
        y, cs, cq = pallas_gemm(patches, phase_weight_s2(w))
        scale, shift = bn_scale_shift(cs, cq, n * h * wd * 4, 4, cout,
                                      params[gk], params[bk])
        y = bn_relu_apply(y, _tile_to_cols(scale, 4, y.shape[1]),
                          _tile_to_cols(shift, 4, y.shape[1]))
        x = deinterleave_s2(y, n, h, wd, cout)                     # (N, 2H, 2W, Cout)

    # -- final layer: ConvTranspose(ngf, nc, 4, 2, 1) + tanh, computed
    #    transposed so stores are lane-dense (lane dim = N*H*W) and the
    #    result comes out directly in NCHW order (no trailing transpose pass).
    w5 = params["w5"]
    nc = w5.shape[1]
    n, h, wd, _ = x.shape
    a_t = phase_weight_s2(w5).T                                    # (4*nc, 9*Cin)
    b_t = build_patches_s2_t(x)                                    # (9*Cin, N*H*W)
    y_t = pallas_gemm(a_t, b_t, activation="tanh", with_stats=False,
                      out_dtype=jnp.float32)
    y_t = y_t[:4 * nc, :n * h * wd]                                # (4*nc, N*H*W)
    out = y_t.reshape(2, 2, nc, n, h, wd)                          # (py,px,c,n,h,w)
    out = jnp.transpose(out, (3, 2, 4, 0, 5, 1))                   # (n,c,h,py,w,px)
    return out.reshape(n, nc, 2 * h, 2 * wd)                       # NCHW


# ---------------------------------------------------------------------------
# Pure-JAX float32 reference (PyTorch semantics) for a sanity check
# ---------------------------------------------------------------------------
def _convt_ref(x, w, stride, pad):
    k = w.shape[2]
    w_flip = w[:, :, ::-1, ::-1]                   # flip spatial taps
    w_oihw = jnp.transpose(w_flip, (1, 0, 2, 3))   # (Cout, Cin, k, k)
    return jax.lax.conv_general_dilated(
        x, w_oihw, window_strides=(1, 1),
        padding=[(k - 1 - pad, k - 1 - pad)] * 2,
        lhs_dilation=(stride, stride),
        dimension_numbers=("NCHW", "OIHW", "NCHW"),
        precision=jax.lax.Precision.HIGHEST)


def _bn_relu_ref(x, gamma, beta, eps=1e-5):
    mean = x.mean(axis=(0, 2, 3), keepdims=True)
    var = ((x - mean) ** 2).mean(axis=(0, 2, 3), keepdims=True)
    y = (x - mean) * jax.lax.rsqrt(var + eps)
    y = y * gamma.reshape(1, -1, 1, 1) + beta.reshape(1, -1, 1, 1)
    return jnp.maximum(y, 0.0)


def netG64_reference(z, params):
    x = _convt_ref(z, params["w1"], 1, 0)
    x = _bn_relu_ref(x, params["g1"], params["b1"])
    for i in (2, 3, 4):
        x = _convt_ref(x, params[f"w{i}"], 2, 1)
        x = _bn_relu_ref(x, params[f"g{i}"], params[f"b{i}"])
    x = _convt_ref(x, params["w5"], 2, 1)
    return jnp.tanh(x)


# ---------------------------------------------------------------------------
if __name__ == "__main__":
    # small-but-faithful sizes: nz=16, ngf=8, nc=3, batch=2
    nz, ngf, nc, batch = 16, 8, 3, 2

    key = jax.random.PRNGKey(0)
    kz, kp = jax.random.split(key)
    params = init_params(kp, nz, ngf, nc)
    z = jax.random.normal(kz, (batch, nz, 1, 1), jnp.float32)

    fwd = jax.jit(netG64_forward)
    out = jax.block_until_ready(fwd(z, params))

    assert out.shape == (batch, nc, 64, 64), out.shape
    assert bool(jnp.all(jnp.isfinite(out)))
    assert float(jnp.max(jnp.abs(out))) <= 1.0 + 1e-6      # tanh range

    ref = jax.block_until_ready(jax.jit(netG64_reference)(z, params))
    max_diff = float(jnp.max(jnp.abs(out - ref)))
    assert max_diff < 0.25, f"max abs diff vs f32 reference = {max_diff}"

    print("KERNEL_OK")
</pallas_src>

<mosaic_0001>
module attributes {stable_mosaic.version = 11 : i64} {
  func.func @_gemm_kernel(%arg0: i32, %arg1: i32, %arg2: i32, %arg3: memref<8x16xbf16, #tpu.memory_space<vmem>>, %arg4: memref<16x256xbf16, #tpu.memory_space<vmem>>, %arg5: memref<8x256xbf16, #tpu.memory_space<vmem>>, %arg6: memref<1x1x256xf32, #tpu.memory_space<vmem>>, %arg7: memref<1x1x256xf32, #tpu.memory_space<vmem>>, %arg8: memref<8x256xf32, #tpu.memory_space<vmem>>) attributes {dimension_semantics = [#tpu.dimension_semantics<parallel>, #tpu.dimension_semantics<parallel>, #tpu.dimension_semantics<arbitrary>], iteration_bounds = array<i64: 1, 4, 1>, scalar_prefetch = 0 : i64, scratch_operands = 1 : i64, tpu.core_type = #tpu.core_type<tc>, window_params = [{transform_indices = @transform_0, window_bounds = array<i64: 8, 16>}, {transform_indices = @transform_1, window_bounds = array<i64: 16, 256>}, {transform_indices = @transform_2, window_bounds = array<i64: 8, 256>}, {transform_indices = @transform_3, window_bounds = array<i64: 1, 1, 256>}, {transform_indices = @transform_4, window_bounds = array<i64: 1, 1, 256>}]} {
    %c0_i32 = arith.constant 0 : i32
    %0 = arith.cmpi eq, %arg2, %c0_i32 : i32
    %1 = arith.extui %0 : i1 to i32
    %c0_i32_0 = arith.constant 0 : i32
    %2 = arith.cmpi ne, %1, %c0_i32_0 : i32
    scf.if %2 {
      %cst_10 = arith.constant 0.000000e+00 : f32
      %12 = vector.broadcast %cst_10 : f32 to vector<8x256xf32>
      %c0_11 = arith.constant 0 : index
      %c0_12 = arith.constant 0 : index
      %13 = vector.load %arg8[%c0_11, %c0_12] : memref<8x256xf32, #tpu.memory_space<vmem>>, vector<8x256xf32>
      tpu.vector_store %arg8[%c0_11, %c0_12], %12 {strides = array<i32>} : memref<8x256xf32, #tpu.memory_space<vmem>>, vector<8x256xf32>,
    } else {
    }
    %c0 = arith.constant 0 : index
    %c0_1 = arith.constant 0 : index
    %3 = vector.load %arg8[%c0, %c0_1] : memref<8x256xf32, #tpu.memory_space<vmem>>, vector<8x256xf32>
    %c0_2 = arith.constant 0 : index
    %c0_3 = arith.constant 0 : index
    %4 = vector.load %arg3[%c0_2, %c0_3] : memref<8x16xbf16, #tpu.memory_space<vmem>>, vector<8x16xbf16>
    %c0_4 = arith.constant 0 : index
    %c0_5 = arith.constant 0 : index
    %5 = vector.load %arg4[%c0_4, %c0_5] : memref<16x256xbf16, #tpu.memory_space<vmem>>, vector<16x256xbf16>
    %cst = arith.constant dense<0.000000e+00> : vector<8x256xf32>
    %6 = tpu.matmul %4, %5, %cst {dimension_numbers = #tpu.dot_dimension_numbers<[1], [0], [0], [1], [0, 0, 1, 1], [], []>} : vector<8x16xbf16>, vector<16x256xbf16>, vector<8x256xf32> -> vector<8x256xf32>
    %7 = arith.addf %3, %6 : vector<8x256xf32>
    %c0_6 = arith.constant 0 : index
    %c0_7 = arith.constant 0 : index
    %8 = vector.load %arg8[%c0_6, %c0_7] : memref<8x256xf32, #tpu.memory_space<vmem>>, vector<8x256xf32>
    tpu.vector_store %arg8[%c0_6, %c0_7], %7 {strides = array<i32>} : memref<8x256xf32, #tpu.memory_space<vmem>>, vector<8x256xf32>,
    %c0_i32_8 = arith.constant 0 : i32
    %9 = arith.cmpi eq, %arg2, %c0_i32_8 : i32
    %10 = arith.extui %9 : i1 to i32
    %c0_i32_9 = arith.constant 0 : i32
    %11 = arith.cmpi ne, %10, %c0_i32_9 : i32
    scf.if %11 {
      %c0_10 = arith.constant 0 : index
      %c0_11 = arith.constant 0 : index
      %12 = vector.load %arg8[%c0_10, %c0_11] : memref<8x256xf32, #tpu.memory_space<vmem>>, vector<8x256xf32>
      %13 = arith.truncf %12 : vector<8x256xf32> to vector<8x256xbf16>
      %c0_12 = arith.constant 0 : index
      %c0_13 = arith.constant 0 : index
      %14 = vector.load %arg5[%c0_12, %c0_13] : memref<8x256xbf16, #tpu.memory_space<vmem>>, vector<8x256xbf16>
      tpu.vector_store %arg5[%c0_12, %c0_13], %13 {strides = array<i32>} : memref<8x256xbf16, #tpu.memory_space<vmem>>, vector<8x256xbf16>,
      %cst_14 = arith.constant dense<0.000000e+00> : vector<256xf32>
      %15 = vector.multi_reduction <add>, %12, %cst_14 [0] : vector<8x256xf32> to vector<256xf32>
      %16 = vector.shape_cast %15 : vector<256xf32> to vector<1x256xf32>
      %17 = vector.shape_cast %16 : vector<1x256xf32> to vector<1x1x256xf32>
      %c0_15 = arith.constant 0 : index
      %c0_16 = arith.constant 0 : index
      %c0_17 = arith.constant 0 : index
      %18 = vector.load %arg6[%c0_15, %c0_16, %c0_17] : memref<1x1x256xf32, #tpu.memory_space<vmem>>, vector<1x1x256xf32>
      tpu.vector_store %arg6[%c0_15, %c0_16, %c0_17], %17 {strides = array<i32>} : memref<1x1x256xf32, #tpu.memory_space<vmem>>, vector<1x1x256xf32>,
      %19 = arith.mulf %12, %12 : vector<8x256xf32>
      %cst_18 = arith.constant dense<0.000000e+00> : vector<256xf32>
      %20 = vector.multi_reduction <add>, %19, %cst_18 [0] : vector<8x256xf32> to vector<256xf32>
      %21 = vector.shape_cast %20 : vector<256xf32> to vector<1x256xf32>
      %22 = vector.shape_cast %21 : vector<1x256xf32> to vector<1x1x256xf32>
      %c0_19 = arith.constant 0 : index
      %c0_20 = arith.constant 0 : index
      %c0_21 = arith.constant 0 : index
      %23 = vector.load %arg7[%c0_19, %c0_20, %c0_21] : memref<1x1x256xf32, #tpu.memory_space<vmem>>, vector<1x1x256xf32>
      tpu.vector_store %arg7[%c0_19, %c0_20, %c0_21], %22 {strides = array<i32>} : memref<1x1x256xf32, #tpu.memory_space<vmem>>, vector<1x1x256xf32>,
    } else {
    }
    return
  }
  func.func @transform_0(%arg0: i32, %arg1: i32, %arg2: i32) -> (i32, i32) {
    %c0_i32 = arith.constant 0 : i32
    return %arg0, %arg2 : i32, i32
  }
  func.func @transform_1(%arg0: i32, %arg1: i32, %arg2: i32) -> (i32, i32) {
    %c0_i32 = arith.constant 0 : i32
    return %arg2, %arg1 : i32, i32
  }
  func.func @transform_2(%arg0: i32, %arg1: i32, %arg2: i32) -> (i32, i32) {
    %c0_i32 = arith.constant 0 : i32
    return %arg0, %arg1 : i32, i32
  }
  func.func @transform_3(%arg0: i32, %arg1: i32, %arg2: i32) -> (i32, i32, i32) {
    %c0_i32 = arith.constant 0 : i32
    %c0_i32_0 = arith.constant 0 : i32
    return %arg0, %c0_i32, %arg1 : i32, i32, i32
  }
  func.func @transform_4(%arg0: i32, %arg1: i32, %arg2: i32) -> (i32, i32, i32) {
    %c0_i32 = arith.constant 0 : i32
    %c0_i32_0 = arith.constant 0 : i32
    return %arg0, %c0_i32, %arg1 : i32, i32, i32
  }
}

module attributes {stable_mosaic.version = 11 : i64} {
  func.func @_bn_relu_kernel(%arg0: i32, %arg1: memref<8x1024xbf16, #tpu.memory_space<vmem>>, %arg2: memref<1x1024xf32, #tpu.memory_space<vmem>>, %arg3: memref<1x1024xf32, #tpu.memory_space<vmem>>, %arg4: memref<8x1024xbf16, #tpu.memory_space<vmem>>) attributes {dimension_semantics = [#tpu.dimension_semantics<parallel>], iteration_bounds = array<i64: 1>, scalar_prefetch = 0 : i64, scratch_operands = 0 : i64, tpu.core_type = #tpu.core_type<tc>, window_params = [{transform_indices = @transform_0, window_bounds = array<i64: 8, 1024>}, {pipeline_mode = #tpu.pipeline_mode<synchronous>, transform_indices = @transform_1, window_bounds = array<i64: 1, 1024>}, {pipeline_mode = #tpu.pipeline_mode<synchronous>, transform_indices = @transform_2, window_bounds = array<i64: 1, 1024>}, {transform_indices = @transform_3, window_bounds = array<i64: 8, 1024>}]} {
    %c0 = arith.constant 0 : index
    %c0_0 = arith.constant 0 : index
    %0 = vector.load %arg1[%c0, %c0_0] : memref<8x1024xbf16, #tpu.memory_space<vmem>>, vector<8x1024xbf16>
    %1 = arith.extf %0 : vector<8x1024xbf16> to vector<8x1024xf32>
    %c0_1 = arith.constant 0 : index
    %c0_2 = arith.constant 0 : index
    %2 = vector.load %arg2[%c0_1, %c0_2] : memref<1x1024xf32, #tpu.memory_space<vmem>>, vector<1x1024xf32>
    %3 = vector.broadcast %2 : vector<1x1024xf32> to vector<8x1024xf32>
    %4 = arith.mulf %1, %3 : vector<8x1024xf32>
    %c0_3 = arith.constant 0 : index
    %c0_4 = arith.constant 0 : index
    %5 = vector.load %arg3[%c0_3, %c0_4] : memref<1x1024xf32, #tpu.memory_space<vmem>>, vector<1x1024xf32>
    %6 = vector.broadcast %5 : vector<1x1024xf32> to vector<8x1024xf32>
    %7 = arith.addf %4, %6 : vector<8x1024xf32>
    %cst = arith.constant 0.000000e+00 : f32
    %8 = vector.broadcast %cst : f32 to vector<8x1024xf32>
    %9 = arith.maximumf %7, %8 : vector<8x1024xf32>
    %10 = arith.truncf %9 : vector<8x1024xf32> to vector<8x1024xbf16>
    %c0_5 = arith.constant 0 : index
    %c0_6 = arith.constant 0 : index
    %11 = vector.load %arg4[%c0_5, %c0_6] : memref<8x1024xbf16, #tpu.memory_space<vmem>>, vector<8x1024xbf16>
    tpu.vector_store %arg4[%c0_5, %c0_6], %10 {strides = array<i32>} : memref<8x1024xbf16, #tpu.memory_space<vmem>>, vector<8x1024xbf16>,
    return
  }
  func.func @transform_0(%arg0: i32) -> (i32, i32) {
    %c0_i32 = arith.constant 0 : i32
    %c0_i32_0 = arith.constant 0 : i32
    return %arg0, %c0_i32 : i32, i32
  }
  func.func @transform_1(%arg0: i32) -> (i32, i32) {
    %c0_i32 = arith.constant 0 : i32
    %c0_i32_0 = arith.constant 0 : i32
    %c0_i32_1 = arith.constant 0 : i32
    return %c0_i32, %c0_i32_0 : i32, i32
  }
  func.func @transform_2(%arg0: i32) -> (i32, i32) {
    %c0_i32 = arith.constant 0 : i32
    %c0_i32_0 = arith.constant 0 : i32
    %c0_i32_1 = arith.constant 0 : i32
    return %c0_i32, %c0_i32_0 : i32, i32
  }
  func.func @transform_3(%arg0: i32) -> (i32, i32) {
    %c0_i32 = arith.constant 0 : i32
    %c0_i32_0 = arith.constant 0 : i32
    return %arg0, %c0_i32 : i32, i32
  }
}

module attributes {stable_mosaic.version = 11 : i64} {
  func.func @_gemm_kernel(%arg0: i32, %arg1: i32, %arg2: i32, %arg3: memref<32x576xbf16, #tpu.memory_space<vmem>>, %arg4: memref<576x128xbf16, #tpu.memory_space<vmem>>, %arg5: memref<32x128xbf16, #tpu.memory_space<vmem>>, %arg6: memref<1x1x128xf32, #tpu.memory_space<vmem>>, %arg7: memref<1x1x128xf32, #tpu.memory_space<vmem>>, %arg8: memref<32x128xf32, #tpu.memory_space<vmem>>) attributes {dimension_semantics = [#tpu.dimension_semantics<parallel>, #tpu.dimension_semantics<parallel>, #tpu.dimension_semantics<arbitrary>], iteration_bounds = array<i64: 1, 1, 1>, scalar_prefetch = 0 : i64, scratch_operands = 1 : i64, tpu.core_type = #tpu.core_type<tc>, window_params = [{transform_indices = @transform_0, window_bounds = array<i64: 32, 576>}, {transform_indices = @transform_1, window_bounds = array<i64: 576, 128>}, {transform_indices = @transform_2, window_bounds = array<i64: 32, 128>}, {transform_indices = @transform_3, window_bounds = array<i64: 1, 1, 128>}, {transform_indices = @transform_4, window_bounds = array<i64: 1, 1, 128>}]} {
    %c0_i32 = arith.constant 0 : i32
    %0 = arith.cmpi eq, %arg2, %c0_i32 : i32
    %1 = arith.extui %0 : i1 to i32
    %c0_i32_0 = arith.constant 0 : i32
    %2 = arith.cmpi ne, %1, %c0_i32_0 : i32
    scf.if %2 {
      %cst_10 = arith.constant 0.000000e+00 : f32
      %12 = vector.broadcast %cst_10 : f32 to vector<32x128xf32>
      %c0_11 = arith.constant 0 : index
      %c0_12 = arith.constant 0 : index
      %13 = vector.load %arg8[%c0_11, %c0_12] : memref<32x128xf32, #tpu.memory_space<vmem>>, vector<32x128xf32>
      tpu.vector_store %arg8[%c0_11, %c0_12], %12 {strides = array<i32>} : memref<32x128xf32, #tpu.memory_space<vmem>>, vector<32x128xf32>,
    } else {
    }
    %c0 = arith.constant 0 : index
    %c0_1 = arith.constant 0 : index
    %3 = vector.load %arg8[%c0, %c0_1] : memref<32x128xf32, #tpu.memory_space<vmem>>, vector<32x128xf32>
    %c0_2 = arith.constant 0 : index
    %c0_3 = arith.constant 0 : index
    %4 = vector.load %arg3[%c0_2, %c0_3] : memref<32x576xbf16, #tpu.memory_space<vmem>>, vector<32x576xbf16>
    %c0_4 = arith.constant 0 : index
    %c0_5 = arith.constant 0 : index
    %5 = vector.load %arg4[%c0_4, %c0_5] : memref<576x128xbf16, #tpu.memory_space<vmem>>, vector<576x128xbf16>
    %cst = arith.constant dense<0.000000e+00> : vector<32x128xf32>
    %6 = tpu.matmul %4, %5, %cst {dimension_numbers = #tpu.dot_dimension_numbers<[1], [0], [0], [1], [0, 0, 1, 1], [], []>} : vector<32x576xbf16>, vector<576x128xbf16>, vector<32x128xf32> -> vector<32x128xf32>
    %7 = arith.addf %3, %6 : vector<32x128xf32>
    %c0_6 = arith.constant 0 : index
    %c0_7 = arith.constant 0 : index
    %8 = vector.load %arg8[%c0_6, %c0_7] : memref<32x128xf32, #tpu.memory_space<vmem>>, vector<32x128xf32>
    tpu.vector_store %arg8[%c0_6, %c0_7], %7 {strides = array<i32>} : memref<32x128xf32, #tpu.memory_space<vmem>>, vector<32x128xf32>,
    %c0_i32_8 = arith.constant 0 : i32
    %9 = arith.cmpi eq, %arg2, %c0_i32_8 : i32
    %10 = arith.extui %9 : i1 to i32
    %c0_i32_9 = arith.constant 0 : i32
    %11 = arith.cmpi ne, %10, %c0_i32_9 : i32
    scf.if %11 {
      %c0_10 = arith.constant 0 : index
      %c0_11 = arith.constant 0 : index
      %12 = vector.load %arg8[%c0_10, %c0_11] : memref<32x128xf32, #tpu.memory_space<vmem>>, vector<32x128xf32>
      %13 = arith.truncf %12 : vector<32x128xf32> to vector<32x128xbf16>
      %c0_12 = arith.constant 0 : index
      %c0_13 = arith.constant 0 : index
      %14 = vector.load %arg5[%c0_12, %c0_13] : memref<32x128xbf16, #tpu.memory_space<vmem>>, vector<32x128xbf16>
      tpu.vector_store %arg5[%c0_12, %c0_13], %13 {strides = array<i32>} : memref<32x128xbf16, #tpu.memory_space<vmem>>, vector<32x128xbf16>,
      %cst_14 = arith.constant dense<0.000000e+00> : vector<128xf32>
      %15 = vector.multi_reduction <add>, %12, %cst_14 [0] : vector<32x128xf32> to vector<128xf32>
      %16 = vector.shape_cast %15 : vector<128xf32> to vector<1x128xf32>
      %17 = vector.shape_cast %16 : vector<1x128xf32> to vector<1x1x128xf32>
      %c0_15 = arith.constant 0 : index
      %c0_16 = arith.constant 0 : index
      %c0_17 = arith.constant 0 : index
      %18 = vector.load %arg6[%c0_15, %c0_16, %c0_17] : memref<1x1x128xf32, #tpu.memory_space<vmem>>, vector<1x1x128xf32>
      tpu.vector_store %arg6[%c0_15, %c0_16, %c0_17], %17 {strides = array<i32>} : memref<1x1x128xf32, #tpu.memory_space<vmem>>, vector<1x1x128xf32>,
      %19 = arith.mulf %12, %12 : vector<32x128xf32>
      %cst_18 = arith.constant dense<0.000000e+00> : vector<128xf32>
      %20 = vector.multi_reduction <add>, %19, %cst_18 [0] : vector<32x128xf32> to vector<128xf32>
      %21 = vector.shape_cast %20 : vector<128xf32> to vector<1x128xf32>
      %22 = vector.shape_cast %21 : vector<1x128xf32> to vector<1x1x128xf32>
      %c0_19 = arith.constant 0 : index
      %c0_20 = arith.constant 0 : index
      %c0_21 = arith.constant 0 : index
      %23 = vector.load %arg7[%c0_19, %c0_20, %c0_21] : memref<1x1x128xf32, #tpu.memory_space<vmem>>, vector<1x1x128xf32>
      tpu.vector_store %arg7[%c0_19, %c0_20, %c0_21], %22 {strides = array<i32>} : memref<1x1x128xf32, #tpu.memory_space<vmem>>, vector<1x1x128xf32>,
    } else {
    }
    return
  }
  func.func @transform_0(%arg0: i32, %arg1: i32, %arg2: i32) -> (i32, i32) {
    %c0_i32 = arith.constant 0 : i32
    return %arg0, %arg2 : i32, i32
  }
  func.func @transform_1(%arg0: i32, %arg1: i32, %arg2: i32) -> (i32, i32) {
    %c0_i32 = arith.constant 0 : i32
    return %arg2, %arg1 : i32, i32
  }
  func.func @transform_2(%arg0: i32, %arg1: i32, %arg2: i32) -> (i32, i32) {
    %c0_i32 = arith.constant 0 : i32
    return %arg0, %arg1 : i32, i32
  }
  func.func @transform_3(%arg0: i32, %arg1: i32, %arg2: i32) -> (i32, i32, i32) {
    %c0_i32 = arith.constant 0 : i32
    %c0_i32_0 = arith.constant 0 : i32
    return %arg0, %c0_i32, %arg1 : i32, i32, i32
  }
  func.func @transform_4(%arg0: i32, %arg1: i32, %arg2: i32) -> (i32, i32, i32) {
    %c0_i32 = arith.constant 0 : i32
    %c0_i32_0 = arith.constant 0 : i32
    return %arg0, %c0_i32, %arg1 : i32, i32, i32
  }
}

module attributes {stable_mosaic.version = 11 : i64} {
  func.func @_bn_relu_kernel(%arg0: i32, %arg1: memref<32x128xbf16, #tpu.memory_space<vmem>>, %arg2: memref<1x128xf32, #tpu.memory_space<vmem>>, %arg3: memref<1x128xf32, #tpu.memory_space<vmem>>, %arg4: memref<32x128xbf16, #tpu.memory_space<vmem>>) attributes {dimension_semantics = [#tpu.dimension_semantics<parallel>], iteration_bounds = array<i64: 1>, scalar_prefetch = 0 : i64, scratch_operands = 0 : i64, tpu.core_type = #tpu.core_type<tc>, window_params = [{transform_indices = @transform_0, window_bounds = array<i64: 32, 128>}, {pipeline_mode = #tpu.pipeline_mode<synchronous>, transform_indices = @transform_1, window_bounds = array<i64: 1, 128>}, {pipeline_mode = #tpu.pipeline_mode<synchronous>, transform_indices = @transform_2, window_bounds = array<i64: 1, 128>}, {transform_indices = @transform_3, window_bounds = array<i64: 32, 128>}]} {
    %c0 = arith.constant 0 : index
    %c0_0 = arith.constant 0 : index
    %0 = vector.load %arg1[%c0, %c0_0] : memref<32x128xbf16, #tpu.memory_space<vmem>>, vector<32x128xbf16>
    %1 = arith.extf %0 : vector<32x128xbf16> to vector<32x128xf32>
    %c0_1 = arith.constant 0 : index
    %c0_2 = arith.constant 0 : index
    %2 = vector.load %arg2[%c0_1, %c0_2] : memref<1x128xf32, #tpu.memory_space<vmem>>, vector<1x128xf32>
    %3 = vector.broadcast %2 : vector<1x128xf32> to vector<32x128xf32>
    %4 = arith.mulf %1, %3 : vector<32x128xf32>
    %c0_3 = arith.constant 0 : index
    %c0_4 = arith.constant 0 : index
    %5 = vector.load %arg3[%c0_3, %c0_4] : memref<1x128xf32, #tpu.memory_space<vmem>>, vector<1x128xf32>
    %6 = vector.broadcast %5 : vector<1x128xf32> to vector<32x128xf32>
    %7 = arith.addf %4, %6 : vector<32x128xf32>
    %cst = arith.constant 0.000000e+00 : f32
    %8 = vector.broadcast %cst : f32 to vector<32x128xf32>
    %9 = arith.maximumf %7, %8 : vector<32x128xf32>
    %10 = arith.truncf %9 : vector<32x128xf32> to vector<32x128xbf16>
    %c0_5 = arith.constant 0 : index
    %c0_6 = arith.constant 0 : index
    %11 = vector.load %arg4[%c0_5, %c0_6] : memref<32x128xbf16, #tpu.memory_space<vmem>>, vector<32x128xbf16>
    tpu.vector_store %arg4[%c0_5, %c0_6], %10 {strides = array<i32>} : memref<32x128xbf16, #tpu.memory_space<vmem>>, vector<32x128xbf16>,
    return
  }
  func.func @transform_0(%arg0: i32) -> (i32, i32) {
    %c0_i32 = arith.constant 0 : i32
    %c0_i32_0 = arith.constant 0 : i32
    return %arg0, %c0_i32 : i32, i32
  }
  func.func @transform_1(%arg0: i32) -> (i32, i32) {
    %c0_i32 = arith.constant 0 : i32
    %c0_i32_0 = arith.constant 0 : i32
    %c0_i32_1 = arith.constant 0 : i32
    return %c0_i32, %c0_i32_0 : i32, i32
  }
  func.func @transform_2(%arg0: i32) -> (i32, i32) {
    %c0_i32 = arith.constant 0 : i32
    %c0_i32_0 = arith.constant 0 : i32
    %c0_i32_1 = arith.constant 0 : i32
    return %c0_i32, %c0_i32_0 : i32, i32
  }
  func.func @transform_3(%arg0: i32) -> (i32, i32) {
    %c0_i32 = arith.constant 0 : i32
    %c0_i32_0 = arith.constant 0 : i32
    return %arg0, %c0_i32 : i32, i32
  }
}

module attributes {stable_mosaic.version = 11 : i64} {
  func.func @_gemm_kernel(%arg0: i32, %arg1: i32, %arg2: i32, %arg3: memref<128x288xbf16, #tpu.memory_space<vmem>>, %arg4: memref<288x128xbf16, #tpu.memory_space<vmem>>, %arg5: memref<128x128xbf16, #tpu.memory_space<vmem>>, %arg6: memref<1x1x128xf32, #tpu.memory_space<vmem>>, %arg7: memref<1x1x128xf32, #tpu.memory_space<vmem>>, %arg8: memref<128x128xf32, #tpu.memory_space<vmem>>) attributes {dimension_semantics = [#tpu.dimension_semantics<parallel>, #tpu.dimension_semantics<parallel>, #tpu.dimension_semantics<arbitrary>], iteration_bounds = array<i64: 1, 1, 1>, scalar_prefetch = 0 : i64, scratch_operands = 1 : i64, tpu.core_type = #tpu.core_type<tc>, window_params = [{transform_indices = @transform_0, window_bounds = array<i64: 128, 288>}, {transform_indices = @transform_1, window_bounds = array<i64: 288, 128>}, {transform_indices = @transform_2, window_bounds = array<i64: 128, 128>}, {transform_indices = @transform_3, window_bounds = array<i64: 1, 1, 128>}, {transform_indices = @transform_4, window_bounds = array<i64: 1, 1, 128>}]} {
    %c0_i32 = arith.constant 0 : i32
    %0 = arith.cmpi eq, %arg2, %c0_i32 : i32
    %1 = arith.extui %0 : i1 to i32
    %c0_i32_0 = arith.constant 0 : i32
    %2 = arith.cmpi ne, %1, %c0_i32_0 : i32
    scf.if %2 {
      %cst_10 = arith.constant 0.000000e+00 : f32
      %12 = vector.broadcast %cst_10 : f32 to vector<128x128xf32>
      %c0_11 = arith.constant 0 : index
      %c0_12 = arith.constant 0 : index
      %13 = vector.load %arg8[%c0_11, %c0_12] : memref<128x128xf32, #tpu.memory_space<vmem>>, vector<128x128xf32>
      tpu.vector_store %arg8[%c0_11, %c0_12], %12 {strides = array<i32>} : memref<128x128xf32, #tpu.memory_space<vmem>>, vector<128x128xf32>,
    } else {
    }
    %c0 = arith.constant 0 : index
    %c0_1 = arith.constant 0 : index
    %3 = vector.load %arg8[%c0, %c0_1] : memref<128x128xf32, #tpu.memory_space<vmem>>, vector<128x128xf32>
    %c0_2 = arith.constant 0 : index
    %c0_3 = arith.constant 0 : index
    %4 = vector.load %arg3[%c0_2, %c0_3] : memref<128x288xbf16, #tpu.memory_space<vmem>>, vector<128x288xbf16>
    %c0_4 = arith.constant 0 : index
    %c0_5 = arith.constant 0 : index
    %5 = vector.load %arg4[%c0_4, %c0_5] : memref<288x128xbf16, #tpu.memory_space<vmem>>, vector<288x128xbf16>
    %cst = arith.constant dense<0.000000e+00> : vector<128x128xf32>
    %6 = tpu.matmul %4, %5, %cst {dimension_numbers = #tpu.dot_dimension_numbers<[1], [0], [0], [1], [0, 0, 1, 1], [], []>} : vector<128x288xbf16>, vector<288x128xbf16>, vector<128x128xf32> -> vector<128x128xf32>
    %7 = arith.addf %3, %6 : vector<128x128xf32>
    %c0_6 = arith.constant 0 : index
    %c0_7 = arith.constant 0 : index
    %8 = vector.load %arg8[%c0_6, %c0_7] : memref<128x128xf32, #tpu.memory_space<vmem>>, vector<128x128xf32>
    tpu.vector_store %arg8[%c0_6, %c0_7], %7 {strides = array<i32>} : memref<128x128xf32, #tpu.memory_space<vmem>>, vector<128x128xf32>,
    %c0_i32_8 = arith.constant 0 : i32
    %9 = arith.cmpi eq, %arg2, %c0_i32_8 : i32
    %10 = arith.extui %9 : i1 to i32
    %c0_i32_9 = arith.constant 0 : i32
    %11 = arith.cmpi ne, %10, %c0_i32_9 : i32
    scf.if %11 {
      %c0_10 = arith.constant 0 : index
      %c0_11 = arith.constant 0 : index
      %12 = vector.load %arg8[%c0_10, %c0_11] : memref<128x128xf32, #tpu.memory_space<vmem>>, vector<128x128xf32>
      %13 = arith.truncf %12 : vector<128x128xf32> to vector<128x128xbf16>
      %c0_12 = arith.constant 0 : index
      %c0_13 = arith.constant 0 : index
      %14 = vector.load %arg5[%c0_12, %c0_13] : memref<128x128xbf16, #tpu.memory_space<vmem>>, vector<128x128xbf16>
      tpu.vector_store %arg5[%c0_12, %c0_13], %13 {strides = array<i32>} : memref<128x128xbf16, #tpu.memory_space<vmem>>, vector<128x128xbf16>,
      %cst_14 = arith.constant dense<0.000000e+00> : vector<128xf32>
      %15 = vector.multi_reduction <add>, %12, %cst_14 [0] : vector<128x128xf32> to vector<128xf32>
      %16 = vector.shape_cast %15 : vector<128xf32> to vector<1x128xf32>
      %17 = vector.shape_cast %16 : vector<1x128xf32> to vector<1x1x128xf32>
      %c0_15 = arith.constant 0 : index
      %c0_16 = arith.constant 0 : index
      %c0_17 = arith.constant 0 : index
      %18 = vector.load %arg6[%c0_15, %c0_16, %c0_17] : memref<1x1x128xf32, #tpu.memory_space<vmem>>, vector<1x1x128xf32>
      tpu.vector_store %arg6[%c0_15, %c0_16, %c0_17], %17 {strides = array<i32>} : memref<1x1x128xf32, #tpu.memory_space<vmem>>, vector<1x1x128xf32>,
      %19 = arith.mulf %12, %12 : vector<128x128xf32>
      %cst_18 = arith.constant dense<0.000000e+00> : vector<128xf32>
      %20 = vector.multi_reduction <add>, %19, %cst_18 [0] : vector<128x128xf32> to vector<128xf32>
      %21 = vector.shape_cast %20 : vector<128xf32> to vector<1x128xf32>
      %22 = vector.shape_cast %21 : vector<1x128xf32> to vector<1x1x128xf32>
      %c0_19 = arith.constant 0 : index
      %c0_20 = arith.constant 0 : index
      %c0_21 = arith.constant 0 : index
      %23 = vector.load %arg7[%c0_19, %c0_20, %c0_21] : memref<1x1x128xf32, #tpu.memory_space<vmem>>, vector<1x1x128xf32>
      tpu.vector_store %arg7[%c0_19, %c0_20, %c0_21], %22 {strides = array<i32>} : memref<1x1x128xf32, #tpu.memory_space<vmem>>, vector<1x1x128xf32>,
    } else {
    }
    return
  }
  func.func @transform_0(%arg0: i32, %arg1: i32, %arg2: i32) -> (i32, i32) {
    %c0_i32 = arith.constant 0 : i32
    return %arg0, %arg2 : i32, i32
  }
  func.func @transform_1(%arg0: i32, %arg1: i32, %arg2: i32) -> (i32, i32) {
    %c0_i32 = arith.constant 0 : i32
    return %arg2, %arg1 : i32, i32
  }
  func.func @transform_2(%arg0: i32, %arg1: i32, %arg2: i32) -> (i32, i32) {
    %c0_i32 = arith.constant 0 : i32
    return %arg0, %arg1 : i32, i32
  }
  func.func @transform_3(%arg0: i32, %arg1: i32, %arg2: i32) -> (i32, i32, i32) {
    %c0_i32 = arith.constant 0 : i32
    %c0_i32_0 = arith.constant 0 : i32
    return %arg0, %c0_i32, %arg1 : i32, i32, i32
  }
  func.func @transform_4(%arg0: i32, %arg1: i32, %arg2: i32) -> (i32, i32, i32) {
    %c0_i32 = arith.constant 0 : i32
    %c0_i32_0 = arith.constant 0 : i32
    return %arg0, %c0_i32, %arg1 : i32, i32, i32
  }
}

module attributes {stable_mosaic.version = 11 : i64} {
  func.func @_bn_relu_kernel(%arg0: i32, %arg1: memref<128x128xbf16, #tpu.memory_space<vmem>>, %arg2: memref<1x128xf32, #tpu.memory_space<vmem>>, %arg3: memref<1x128xf32, #tpu.memory_space<vmem>>, %arg4: memref<128x128xbf16, #tpu.memory_space<vmem>>) attributes {dimension_semantics = [#tpu.dimension_semantics<parallel>], iteration_bounds = array<i64: 1>, scalar_prefetch = 0 : i64, scratch_operands = 0 : i64, tpu.core_type = #tpu.core_type<tc>, window_params = [{transform_indices = @transform_0, window_bounds = array<i64: 128, 128>}, {pipeline_mode = #tpu.pipeline_mode<synchronous>, transform_indices = @transform_1, window_bounds = array<i64: 1, 128>}, {pipeline_mode = #tpu.pipeline_mode<synchronous>, transform_indices = @transform_2, window_bounds = array<i64: 1, 128>}, {transform_indices = @transform_3, window_bounds = array<i64: 128, 128>}]} {
    %c0 = arith.constant 0 : index
    %c0_0 = arith.constant 0 : index
    %0 = vector.load %arg1[%c0, %c0_0] : memref<128x128xbf16, #tpu.memory_space<vmem>>, vector<128x128xbf16>
    %1 = arith.extf %0 : vector<128x128xbf16> to vector<128x128xf32>
    %c0_1 = arith.constant 0 : index
    %c0_2 = arith.constant 0 : index
    %2 = vector.load %arg2[%c0_1, %c0_2] : memref<1x128xf32, #tpu.memory_space<vmem>>, vector<1x128xf32>
    %3 = vector.broadcast %2 : vector<1x128xf32> to vector<128x128xf32>
    %4 = arith.mulf %1, %3 : vector<128x128xf32>
    %c0_3 = arith.constant 0 : index
    %c0_4 = arith.constant 0 : index
    %5 = vector.load %arg3[%c0_3, %c0_4] : memref<1x128xf32, #tpu.memory_space<vmem>>, vector<1x128xf32>
    %6 = vector.broadcast %5 : vector<1x128xf32> to vector<128x128xf32>
    %7 = arith.addf %4, %6 : vector<128x128xf32>
    %cst = arith.constant 0.000000e+00 : f32
    %8 = vector.broadcast %cst : f32 to vector<128x128xf32>
    %9 = arith.maximumf %7, %8 : vector<128x128xf32>
    %10 = arith.truncf %9 : vector<128x128xf32> to vector<128x128xbf16>
    %c0_5 = arith.constant 0 : index
    %c0_6 = arith.constant 0 : index
    %11 = vector.load %arg4[%c0_5, %c0_6] : memref<128x128xbf16, #tpu.memory_space<vmem>>, vector<128x128xbf16>
    tpu.vector_store %arg4[%c0_5, %c0_6], %10 {strides = array<i32>} : memref<128x128xbf16, #tpu.memory_space<vmem>>, vector<128x128xbf16>,
    return
  }
  func.func @transform_0(%arg0: i32) -> (i32, i32) {
    %c0_i32 = arith.constant 0 : i32
    %c0_i32_0 = arith.constant 0 : i32
    return %arg0, %c0_i32 : i32, i32
  }
  func.func @transform_1(%arg0: i32) -> (i32, i32) {
    %c0_i32 = arith.constant 0 : i32
    %c0_i32_0 = arith.constant 0 : i32
    %c0_i32_1 = arith.constant 0 : i32
    return %c0_i32, %c0_i32_0 : i32, i32
  }
  func.func @transform_2(%arg0: i32) -> (i32, i32) {
    %c0_i32 = arith.constant 0 : i32
    %c0_i32_0 = arith.constant 0 : i32
    %c0_i32_1 = arith.constant 0 : i32
    return %c0_i32, %c0_i32_0 : i32, i32
  }
  func.func @transform_3(%arg0: i32) -> (i32, i32) {
    %c0_i32 = arith.constant 0 : i32
    %c0_i32_0 = arith.constant 0 : i32
    return %arg0, %c0_i32 : i32, i32
  }
}

module attributes {stable_mosaic.version = 11 : i64} {
  func.func @_gemm_kernel(%arg0: i32, %arg1: i32, %arg2: i32, %arg3: memref<512x144xbf16, #tpu.memory_space<vmem>>, %arg4: memref<144x128xbf16, #tpu.memory_space<vmem>>, %arg5: memref<512x128xbf16, #tpu.memory_space<vmem>>, %arg6: memref<1x1x128xf32, #tpu.memory_space<vmem>>, %arg7: memref<1x1x128xf32, #tpu.memory_space<vmem>>, %arg8: memref<512x128xf32, #tpu.memory_space<vmem>>) attributes {dimension_semantics = [#tpu.dimension_semantics<parallel>, #tpu.dimension_semantics<parallel>, #tpu.dimension_semantics<arbitrary>], iteration_bounds = array<i64: 1, 1, 1>, scalar_prefetch = 0 : i64, scratch_operands = 1 : i64, tpu.core_type = #tpu.core_type<tc>, window_params = [{transform_indices = @transform_0, window_bounds = array<i64: 512, 144>}, {transform_indices = @transform_1, window_bounds = array<i64: 144, 128>}, {transform_indices = @transform_2, window_bounds = array<i64: 512, 128>}, {transform_indices = @transform_3, window_bounds = array<i64: 1, 1, 128>}, {transform_indices = @transform_4, window_bounds = array<i64: 1, 1, 128>}]} {
    %c0_i32 = arith.constant 0 : i32
    %0 = arith.cmpi eq, %arg2, %c0_i32 : i32
    %1 = arith.extui %0 : i1 to i32
    %c0_i32_0 = arith.constant 0 : i32
    %2 = arith.cmpi ne, %1, %c0_i32_0 : i32
    scf.if %2 {
      %cst_10 = arith.constant 0.000000e+00 : f32
      %12 = vector.broadcast %cst_10 : f32 to vector<512x128xf32>
      %c0_11 = arith.constant 0 : index
      %c0_12 = arith.constant 0 : index
      %13 = vector.load %arg8[%c0_11, %c0_12] : memref<512x128xf32, #tpu.memory_space<vmem>>, vector<512x128xf32>
      tpu.vector_store %arg8[%c0_11, %c0_12], %12 {strides = array<i32>} : memref<512x128xf32, #tpu.memory_space<vmem>>, vector<512x128xf32>,
    } else {
    }
    %c0 = arith.constant 0 : index
    %c0_1 = arith.constant 0 : index
    %3 = vector.load %arg8[%c0, %c0_1] : memref<512x128xf32, #tpu.memory_space<vmem>>, vector<512x128xf32>
    %c0_2 = arith.constant 0 : index
    %c0_3 = arith.constant 0 : index
    %4 = vector.load %arg3[%c0_2, %c0_3] : memref<512x144xbf16, #tpu.memory_space<vmem>>, vector<512x144xbf16>
    %c0_4 = arith.constant 0 : index
    %c0_5 = arith.constant 0 : index
    %5 = vector.load %arg4[%c0_4, %c0_5] : memref<144x128xbf16, #tpu.memory_space<vmem>>, vector<144x128xbf16>
    %cst = arith.constant dense<0.000000e+00> : vector<512x128xf32>
    %6 = tpu.matmul %4, %5, %cst {dimension_numbers = #tpu.dot_dimension_numbers<[1], [0], [0], [1], [0, 0, 1, 1], [], []>} : vector<512x144xbf16>, vector<144x128xbf16>, vector<512x128xf32> -> vector<512x128xf32>
    %7 = arith.addf %3, %6 : vector<512x128xf32>
    %c0_6 = arith.constant 0 : index
    %c0_7 = arith.constant 0 : index
    %8 = vector.load %arg8[%c0_6, %c0_7] : memref<512x128xf32, #tpu.memory_space<vmem>>, vector<512x128xf32>
    tpu.vector_store %arg8[%c0_6, %c0_7], %7 {strides = array<i32>} : memref<512x128xf32, #tpu.memory_space<vmem>>, vector<512x128xf32>,
    %c0_i32_8 = arith.constant 0 : i32
    %9 = arith.cmpi eq, %arg2, %c0_i32_8 : i32
    %10 = arith.extui %9 : i1 to i32
    %c0_i32_9 = arith.constant 0 : i32
    %11 = arith.cmpi ne, %10, %c0_i32_9 : i32
    scf.if %11 {
      %c0_10 = arith.constant 0 : index
      %c0_11 = arith.constant 0 : index
      %12 = vector.load %arg8[%c0_10, %c0_11] : memref<512x128xf32, #tpu.memory_space<vmem>>, vector<512x128xf32>
      %13 = arith.truncf %12 : vector<512x128xf32> to vector<512x128xbf16>
      %c0_12 = arith.constant 0 : index
      %c0_13 = arith.constant 0 : index
      %14 = vector.load %arg5[%c0_12, %c0_13] : memref<512x128xbf16, #tpu.memory_space<vmem>>, vector<512x128xbf16>
      tpu.vector_store %arg5[%c0_12, %c0_13], %13 {strides = array<i32>} : memref<512x128xbf16, #tpu.memory_space<vmem>>, vector<512x128xbf16>,
      %cst_14 = arith.constant dense<0.000000e+00> : vector<128xf32>
      %15 = vector.multi_reduction <add>, %12, %cst_14 [0] : vector<512x128xf32> to vector<128xf32>
      %16 = vector.shape_cast %15 : vector<128xf32> to vector<1x128xf32>
      %17 = vector.shape_cast %16 : vector<1x128xf32> to vector<1x1x128xf32>
      %c0_15 = arith.constant 0 : index
      %c0_16 = arith.constant 0 : index
      %c0_17 = arith.constant 0 : index
      %18 = vector.load %arg6[%c0_15, %c0_16, %c0_17] : memref<1x1x128xf32, #tpu.memory_space<vmem>>, vector<1x1x128xf32>
      tpu.vector_store %arg6[%c0_15, %c0_16, %c0_17], %17 {strides = array<i32>} : memref<1x1x128xf32, #tpu.memory_space<vmem>>, vector<1x1x128xf32>,
      %19 = arith.mulf %12, %12 : vector<512x128xf32>
      %cst_18 = arith.constant dense<0.000000e+00> : vector<128xf32>
      %20 = vector.multi_reduction <add>, %19, %cst_18 [0] : vector<512x128xf32> to vector<128xf32>
      %21 = vector.shape_cast %20 : vector<128xf32> to vector<1x128xf32>
      %22 = vector.shape_cast %21 : vector<1x128xf32> to vector<1x1x128xf32>
      %c0_19 = arith.constant 0 : index
      %c0_20 = arith.constant 0 : index
      %c0_21 = arith.constant 0 : index
      %23 = vector.load %arg7[%c0_19, %c0_20, %c0_21] : memref<1x1x128xf32, #tpu.memory_space<vmem>>, vector<1x1x128xf32>
      tpu.vector_store %arg7[%c0_19, %c0_20, %c0_21], %22 {strides = array<i32>} : memref<1x1x128xf32, #tpu.memory_space<vmem>>, vector<1x1x128xf32>,
    } else {
    }
    return
  }
  func.func @transform_0(%arg0: i32, %arg1: i32, %arg2: i32) -> (i32, i32) {
    %c0_i32 = arith.constant 0 : i32
    return %arg0, %arg2 : i32, i32
  }
  func.func @transform_1(%arg0: i32, %arg1: i32, %arg2: i32) -> (i32, i32) {
    %c0_i32 = arith.constant 0 : i32
    return %arg2, %arg1 : i32, i32
  }
  func.func @transform_2(%arg0: i32, %arg1: i32, %arg2: i32) -> (i32, i32) {
    %c0_i32 = arith.constant 0 : i32
    return %arg0, %arg1 : i32, i32
  }
  func.func @transform_3(%arg0: i32, %arg1: i32, %arg2: i32) -> (i32, i32, i32) {
    %c0_i32 = arith.constant 0 : i32
    %c0_i32_0 = arith.constant 0 : i32
    return %arg0, %c0_i32, %arg1 : i32, i32, i32
  }
  func.func @transform_4(%arg0: i32, %arg1: i32, %arg2: i32) -> (i32, i32, i32) {
    %c0_i32 = arith.constant 0 : i32
    %c0_i32_0 = arith.constant 0 : i32
    return %arg0, %c0_i32, %arg1 : i32, i32, i32
  }
}

module attributes {stable_mosaic.version = 11 : i64} {
  func.func @_bn_relu_kernel(%arg0: i32, %arg1: memref<512x128xbf16, #tpu.memory_space<vmem>>, %arg2: memref<1x128xf32, #tpu.memory_space<vmem>>, %arg3: memref<1x128xf32, #tpu.memory_space<vmem>>, %arg4: memref<512x128xbf16, #tpu.memory_space<vmem>>) attributes {dimension_semantics = [#tpu.dimension_semantics<parallel>], iteration_bounds = array<i64: 1>, scalar_prefetch = 0 : i64, scratch_operands = 0 : i64, tpu.core_type = #tpu.core_type<tc>, window_params = [{transform_indices = @transform_0, window_bounds = array<i64: 512, 128>}, {pipeline_mode = #tpu.pipeline_mode<synchronous>, transform_indices = @transform_1, window_bounds = array<i64: 1, 128>}, {pipeline_mode = #tpu.pipeline_mode<synchronous>, transform_indices = @transform_2, window_bounds = array<i64: 1, 128>}, {transform_indices = @transform_3, window_bounds = array<i64: 512, 128>}]} {
    %c0 = arith.constant 0 : index
    %c0_0 = arith.constant 0 : index
    %0 = vector.load %arg1[%c0, %c0_0] : memref<512x128xbf16, #tpu.memory_space<vmem>>, vector<512x128xbf16>
    %1 = arith.extf %0 : vector<512x128xbf16> to vector<512x128xf32>
    %c0_1 = arith.constant 0 : index
    %c0_2 = arith.constant 0 : index
    %2 = vector.load %arg2[%c0_1, %c0_2] : memref<1x128xf32, #tpu.memory_space<vmem>>, vector<1x128xf32>
    %3 = vector.broadcast %2 : vector<1x128xf32> to vector<512x128xf32>
    %4 = arith.mulf %1, %3 : vector<512x128xf32>
    %c0_3 = arith.constant 0 : index
    %c0_4 = arith.constant 0 : index
    %5 = vector.load %arg3[%c0_3, %c0_4] : memref<1x128xf32, #tpu.memory_space<vmem>>, vector<1x128xf32>
    %6 = vector.broadcast %5 : vector<1x128xf32> to vector<512x128xf32>
    %7 = arith.addf %4, %6 : vector<512x128xf32>
    %cst = arith.constant 0.000000e+00 : f32
    %8 = vector.broadcast %cst : f32 to vector<512x128xf32>
    %9 = arith.maximumf %7, %8 : vector<512x128xf32>
    %10 = arith.truncf %9 : vector<512x128xf32> to vector<512x128xbf16>
    %c0_5 = arith.constant 0 : index
    %c0_6 = arith.constant 0 : index
    %11 = vector.load %arg4[%c0_5, %c0_6] : memref<512x128xbf16, #tpu.memory_space<vmem>>, vector<512x128xbf16>
    tpu.vector_store %arg4[%c0_5, %c0_6], %10 {strides = array<i32>} : memref<512x128xbf16, #tpu.memory_space<vmem>>, vector<512x128xbf16>,
    return
  }
  func.func @transform_0(%arg0: i32) -> (i32, i32) {
    %c0_i32 = arith.constant 0 : i32
    %c0_i32_0 = arith.constant 0 : i32
    return %arg0, %c0_i32 : i32, i32
  }
  func.func @transform_1(%arg0: i32) -> (i32, i32) {
    %c0_i32 = arith.constant 0 : i32
    %c0_i32_0 = arith.constant 0 : i32
    %c0_i32_1 = arith.constant 0 : i32
    return %c0_i32, %c0_i32_0 : i32, i32
  }
  func.func @transform_2(%arg0: i32) -> (i32, i32) {
    %c0_i32 = arith.constant 0 : i32
    %c0_i32_0 = arith.constant 0 : i32
    %c0_i32_1 = arith.constant 0 : i32
    return %c0_i32, %c0_i32_0 : i32, i32
  }
  func.func @transform_3(%arg0: i32) -> (i32, i32) {
    %c0_i32 = arith.constant 0 : i32
    %c0_i32_0 = arith.constant 0 : i32
    return %arg0, %c0_i32 : i32, i32
  }
}

module attributes {stable_mosaic.version = 11 : i64} {
  func.func @_gemm_kernel(%arg0: i32, %arg1: i32, %arg2: i32, %arg3: memref<16x72xbf16, #tpu.memory_space<vmem>>, %arg4: memref<72x256xbf16, #tpu.memory_space<vmem>>, %arg5: memref<16x256xf32, #tpu.memory_space<vmem>>, %arg6: memref<16x256xf32, #tpu.memory_space<vmem>>) attributes {dimension_semantics = [#tpu.dimension_semantics<parallel>, #tpu.dimension_semantics<parallel>, #tpu.dimension_semantics<arbitrary>], iteration_bounds = array<i64: 1, 8, 1>, scalar_prefetch = 0 : i64, scratch_operands = 1 : i64, tpu.core_type = #tpu.core_type<tc>, window_params = [{transform_indices = @transform_0, window_bounds = array<i64: 16, 72>}, {transform_indices = @transform_1, window_bounds = array<i64: 72, 256>}, {transform_indices = @transform_2, window_bounds = array<i64: 16, 256>}]} {
    %c0_i32 = arith.constant 0 : i32
    %0 = arith.cmpi eq, %arg2, %c0_i32 : i32
    %1 = arith.extui %0 : i1 to i32
    %c0_i32_0 = arith.constant 0 : i32
    %2 = arith.cmpi ne, %1, %c0_i32_0 : i32
    scf.if %2 {
      %cst_10 = arith.constant 0.000000e+00 : f32
      %12 = vector.broadcast %cst_10 : f32 to vector<16x256xf32>
      %c0_11 = arith.constant 0 : index
      %c0_12 = arith.constant 0 : index
      %13 = vector.load %arg6[%c0_11, %c0_12] : memref<16x256xf32, #tpu.memory_space<vmem>>, vector<16x256xf32>
      tpu.vector_store %arg6[%c0_11, %c0_12], %12 {strides = array<i32>} : memref<16x256xf32, #tpu.memory_space<vmem>>, vector<16x256xf32>,
    } else {
    }
    %c0 = arith.constant 0 : index
    %c0_1 = arith.constant 0 : index
    %3 = vector.load %arg6[%c0, %c0_1] : memref<16x256xf32, #tpu.memory_space<vmem>>, vector<16x256xf32>
    %c0_2 = arith.constant 0 : index
    %c0_3 = arith.constant 0 : index
    %4 = vector.load %arg3[%c0_2, %c0_3] : memref<16x72xbf16, #tpu.memory_space<vmem>>, vector<16x72xbf16>
    %c0_4 = arith.constant 0 : index
    %c0_5 = arith.constant 0 : index
    %5 = vector.load %arg4[%c0_4, %c0_5] : memref<72x256xbf16, #tpu.memory_space<vmem>>, vector<72x256xbf16>
    %cst = arith.constant dense<0.000000e+00> : vector<16x256xf32>
    %6 = tpu.matmul %4, %5, %cst {dimension_numbers = #tpu.dot_dimension_numbers<[1], [0], [0], [1], [0, 0, 1, 1], [], []>} : vector<16x72xbf16>, vector<72x256xbf16>, vector<16x256xf32> -> vector<16x256xf32>
    %7 = arith.addf %3, %6 : vector<16x256xf32>
    %c0_6 = arith.constant 0 : index
    %c0_7 = arith.constant 0 : index
    %8 = vector.load %arg6[%c0_6, %c0_7] : memref<16x256xf32, #tpu.memory_space<vmem>>, vector<16x256xf32>
    tpu.vector_store %arg6[%c0_6, %c0_7], %7 {strides = array<i32>} : memref<16x256xf32, #tpu.memory_space<vmem>>, vector<16x256xf32>,
    %c0_i32_8 = arith.constant 0 : i32
    %9 = arith.cmpi eq, %arg2, %c0_i32_8 : i32
    %10 = arith.extui %9 : i1 to i32
    %c0_i32_9 = arith.constant 0 : i32
    %11 = arith.cmpi ne, %10, %c0_i32_9 : i32
    scf.if %11 {
      %c0_10 = arith.constant 0 : index
      %c0_11 = arith.constant 0 : index
      %12 = vector.load %arg6[%c0_10, %c0_11] : memref<16x256xf32, #tpu.memory_space<vmem>>, vector<16x256xf32>
      %13 = math.tanh %12 : vector<16x256xf32>
      %c0_12 = arith.constant 0 : index
      %c0_13 = arith.constant 0 : index
      %14 = vector.load %arg5[%c0_12, %c0_13] : memref<16x256xf32, #tpu.memory_space<vmem>>, vector<16x256xf32>
      tpu.vector_store %arg5[%c0_12, %c0_13], %13 {strides = array<i32>} : memref<16x256xf32, #tpu.memory_space<vmem>>, vector<16x256xf32>,
    } else {
    }
    return
  }
  func.func @transform_0(%arg0: i32, %arg1: i32, %arg2: i32) -> (i32, i32) {
    %c0_i32 = arith.constant 0 : i32
    return %arg0, %arg2 : i32, i32
  }
  func.func @transform_1(%arg0: i32, %arg1: i32, %arg2: i32) -> (i32, i32) {
    %c0_i32 = arith.constant 0 : i32
    return %arg2, %arg1 : i32, i32
  }
  func.func @transform_2(%arg0: i32, %arg1: i32, %arg2: i32) -> (i32, i32) {
    %c0_i32 = arith.constant 0 : i32
    return %arg0, %arg1 : i32, i32
  }
}

</mosaic_0001>

<bundles_post_ra>
// kernel: tile.47
= control target key start
LH: loop header
LB: loop body
LE: loop exit
PB: predicated region body
PF: predicated region fallthrough
CT: control target
= control target key end

     0   :  { %s28_s0 = inlined_call_operand.vmem [shape: f32[64], index: 0, kind: input, shape index: {}]   ;;  %s29_s1 = inlined_call_operand.vmem [shape: f32[16,64], index: 1, kind: output, shape index: {}]  }
   0x1   :  { %v4_v0 = vld [vmem:[%s28_s0] ss:$0 sm:$0xff] }
   0x2   :  { %5 = vst [vmem:[%s29_s1] sm:$0xff] %v4_v0  ;;  %8 = vst [vmem:[%s29_s1 + $0x8] sm:$0xff] %v4_v0 }

// kernel: tile.49
= control target key start
LH: loop header
LB: loop body
LE: loop exit
PB: predicated region body
PF: predicated region fallthrough
CT: control target
= control target key end

     0   :  { %vm3_vm0 = vcmask 523264   ;;  %vm10_vm1 = vcmask 1048064   ;;  %s125_s0 = inlined_call_operand.vmem [shape: f32[16,64], index: 0, kind: input, shape index: {}]   ;;  %s126_s1 = inlined_call_operand.vmem [shape: f32[1,1024], index: 1, kind: output, shape index: {}]  }
   0x1   :  { %v75_v0 = vld [vmem:[%s125_s0 + $0x1] ss:$2 sm:$0xff]   ;;  %v2_v1 = vld [vmem:[%s125_s0] ss:$2 sm:$0xff]   ;;  %s84_s0 = smov 64  }
   0x2   :  { %8 = vrot.lane.b32.xlu0 %v75_v0, %s84_s0  ;;  %4 = vst.msk [vmem:[#allocation0] ss:$8 sm:$0xf] %vm3_vm0, %v2_v1   ;;  %5 = vst.msk [vmem:[#allocation0] ss:$8 sm:$0xf0] %vm3_vm0, %v2_v1  }
  0x74   :  { %v9_v2 = vpop.permute.xlu0 %8  }
  0x75   :  { %11 = vst.msk [vmem:[#allocation0] ss:$8 sm:$0xf] %vm10_vm1, %v9_v2   ;;  %12 = vst.msk [vmem:[#allocation0] ss:$8 sm:$0xf0] %vm10_vm1, %v9_v2  }
  0x7c   :  { %v17_v3 = vld [vmem:[#allocation0] sm:$0x1]  ;;  %v22_v4 = vld [vmem:[#allocation0 + $0x8] sm:$0x1]  ;;  %v28_v5 = vld [vmem:[#allocation0 + $0x10] sm:$0x1] }
  0x7d   :  { %20 = vst [vmem:[%s126_s1] sm:$0x1] %v17_v3  ;;  %76 = vst [vmem:[%s126_s1 + $0x1] sm:$0x1] %v22_v4  ;;  %v35_v6 = vld [vmem:[#allocation0 + $0x18] sm:$0x1] }
  0x7e   :  { %77 = vst [vmem:[%s126_s1 + $0x2] sm:$0x1] %v28_v5  ;;  %v42_v7 = vld [vmem:[#allocation0 + $0x20] sm:$0x1]  ;;  %v49_v8 = vld [vmem:[#allocation0 + $0x28] sm:$0x1] }
  0x7f   :  { %78 = vst [vmem:[%s126_s1 + $0x3] sm:$0x1] %v35_v6  ;;  %79 = vst [vmem:[%s126_s1 + $0x4] sm:$0x1] %v42_v7  ;;  %v56_v9 = vld [vmem:[#allocation0 + $0x30] sm:$0x1] }
  0x80   :  { %80 = vst [vmem:[%s126_s1 + $0x5] sm:$0x1] %v49_v8  ;;  %v63_v10 = vld [vmem:[#allocation0 + $0x38] sm:$0x1]  ;;  %81 = vst [vmem:[%s126_s1 + $0x6] sm:$0x1] %v56_v9 }
  0x81   :  { %82 = vst [vmem:[%s126_s1 + $0x7] sm:$0x1] %v63_v10 }

// kernel: netG64_forward.10
= control target key start
LH: loop header
LB: loop body
LE: loop exit
PB: predicated region body
PF: predicated region fallthrough
CT: control target
= control target key end

     0   :  { %v28_v0 = vlaneseq  ;;  %s232_s0 = inlined_call_operand.vmem [shape: bf16[8,1024], index: 0, kind: input, shape index: {}]   ;;  %s233_s1 = inlined_call_operand.vmem [shape: f32[1,1024], index: 1, kind: input, shape index: {}]   ;;  %s234_s2 = inlined_call_operand.vmem [shape: f32[1,1024], index: 2, kind: input, shape index: {}]   ;;  %s235_s3 = inlined_call_operand.vmem [shape: bf16[8,1024], index: 3, kind: output, shape index: {}]  }
   0x1   :  { %v14_v1 = vld [vmem:[%s232_s0] sm:$0xff]  ;;  %v15_v5 = vld [vmem:[%s232_s0 + $0x8] sm:$0xff]  ;;  %v16_v6 = vld [vmem:[%s232_s0 + $0x10] sm:$0xff] }
   0x2   :  { %v18_v2 = vunpack.c.l.bf16 %v14_v1  ;;  %v19_v3 = vunpack.c.h.bf16 %v14_v1  ;;  %v29_v4 = vshrl.u32 %v28_v0, 7  ;;  %v17_v7 = vld [vmem:[%s232_s0 + $0x18] sm:$0xff]  ;;  %v26_v8 = vld [vmem:[%s233_s1] sm:$0xff]  ;;  %v20_v10 = vunpack.c.l.bf16 %v15_v5 }
   0x3   :  { %v76_v9 = vld [vmem:[%s234_s2] sm:$0xff]  ;;  %v21_v11 = vunpack.c.h.bf16 %v15_v5  ;;  %v22_v12 = vunpack.c.l.bf16 %v16_v6  ;;  %v23_v13 = vunpack.c.h.bf16 %v16_v6  ;;  %v24_v20 = vunpack.c.l.bf16 %v17_v7 }
   0x4   :  { %v30_v14 = vsub.s32 0, %v29_v4  ;;  %v34_v15 = vsub.s32 1, %v29_v4  ;;  %v38_v16 = vsub.s32 2, %v29_v4  ;;  %v42_v17 = vsub.s32 3, %v29_v4 }
   0x5   :  { %v46_v18 = vsub.s32 4, %v29_v4  ;;  %v50_v19 = vsub.s32 5, %v29_v4  ;;  %v25_v21 = vunpack.c.h.bf16 %v17_v7  ;;  %v54_v44 = vsub.s32 6, %v29_v4 }
   0x6   :  { %v31_v22 = vrot.slane %v26_v8, %v30_v14  ;;  %v35_v23 = vrot.slane %v26_v8, %v34_v15  ;;  %v81_v24 = vrot.slane %v76_v9, %v30_v14  ;;  %v85_v25 = vrot.slane %v76_v9, %v34_v15 }
   0x7   :  { %v39_v26 = vrot.slane %v26_v8, %v38_v16  ;;  %v43_v27 = vrot.slane %v26_v8, %v42_v17  ;;  %v89_v28 = vrot.slane %v76_v9, %v38_v16  ;;  %v93_v29 = vrot.slane %v76_v9, %v42_v17 }
   0x8   :  { %v68_v30 = vmul.f32 %v31_v22, %v18_v2  ;;  %v69_v31 = vmul.f32 %v35_v23, %v19_v3  ;;  %v47_v32 = vrot.slane %v26_v8, %v46_v18  ;;  %v51_v33 = vrot.slane %v26_v8, %v50_v19 }
   0x9   :  { %v70_v34 = vmul.f32 %v39_v26, %v20_v10  ;;  %v71_v35 = vmul.f32 %v43_v27, %v21_v11  ;;  %v97_v36 = vrot.slane %v76_v9, %v46_v18  ;;  %v101_v37 = vrot.slane %v76_v9, %v50_v19 }
   0xa   :  { %v118_v38 = vadd.f32 %v81_v24, %v68_v30  ;;  %v119_v39 = vadd.f32 %v85_v25, %v69_v31  ;;  %v72_v40 = vmul.f32 %v47_v32, %v22_v12  ;;  %v73_v41 = vmul.f32 %v51_v33, %v23_v13 }
   0xb   :  { %v120_v42 = vadd.f32 %v89_v28, %v70_v34  ;;  %v121_v43 = vadd.f32 %v93_v29, %v71_v35  ;;  %v58_v45 = vsub.s32 7, %v29_v4  ;;  %v55_v52 = vrot.slane %v26_v8, %v54_v44 }
   0xc   :  { %v126_v46 = vmax.f32 %v118_v38, 0.0  ;;  %v127_v47 = vmax.f32 %v119_v39, 0.0  ;;  %v122_v48 = vadd.f32 %v97_v36, %v72_v40  ;;  %v123_v49 = vadd.f32 %v101_v37, %v73_v41 }
   0xd   :  { %v128_v50 = vmax.f32 %v120_v42, 0.0  ;;  %v129_v51 = vmax.f32 %v121_v43, 0.0  ;;  %v59_v53 = vrot.slane %v26_v8, %v58_v45  ;;  %v105_v57 = vrot.slane %v76_v9, %v54_v44 }
   0xe   :  { %v178_v54 = vpack.c.bf16 %v127_v47, %v126_v46  ;;  %v130_v55 = vmax.f32 %v122_v48, 0.0  ;;  %v131_v56 = vmax.f32 %v123_v49, 0.0  ;;  %v74_v59 = vmul.f32 %v55_v52, %v24_v20 }
   0xf   :  { %v179_v58 = vpack.c.bf16 %v129_v51, %v128_v50  ;;  %v75_v60 = vmul.f32 %v59_v53, %v25_v21  ;;  %v109_v61 = vrot.slane %v76_v9, %v58_v45 }
  0x10   :  { %166 = vst [vmem:[%s235_s3] sm:$0xff] %v178_v54  ;;  %v180_v62 = vpack.c.bf16 %v131_v56, %v130_v55  ;;  %v124_v63 = vadd.f32 %v105_v57, %v74_v59 }
  0x11   :  { %167 = vst [vmem:[%s235_s3 + $0x8] sm:$0xff] %v179_v58  ;;  %v125_v0 = vadd.f32 %v109_v61, %v75_v60 }
  0x12   :  { %168 = vst [vmem:[%s235_s3 + $0x10] sm:$0xff] %v180_v62  ;;  %v132_v1 = vmax.f32 %v124_v63, 0.0 }
  0x13   :  { %v133_v2 = vmax.f32 %v125_v0, 0.0 }
  0x15   :  { %v181_v3 = vpack.c.bf16 %v133_v2, %v132_v1 }
  0x17   :  { %169 = vst [vmem:[%s235_s3 + $0x18] sm:$0xff] %v181_v3 }

// kernel: netG64_forward.9
= control target key start
LH: loop header
LB: loop body
LE: loop exit
PB: predicated region body
PF: predicated region fallthrough
CT: control target
= control target key end

     0   :  { %s832_s15 = smov 0   ;;  %s834_s16 = smov 0   ;;  %s911_s0 = inlined_call_operand.vmem [shape: bf16[8,16], index: 0, kind: input, shape index: {}]   ;;  %s912_s1 = inlined_call_operand.vmem [shape: bf16[16,1024], index: 1, kind: input, shape index: {}]   ;;  %s913_s2 = inlined_call_operand.vmem [shape: bf16[8,1024], index: 2, kind: output, shape index: {0}]   ;;  %s914_s3 = inlined_call_operand.vmem [shape: f32[1,1,1024], index: 3, kind: output, shape index: {1}]   ;;  %s915_s4 = inlined_call_operand.vmem [shape: f32[1,1,1024], index: 4, kind: output, shape index: {2}]  }
   0x1   :  { %s836_s17 = smov 0   ;;  %s838_s18 = smov 0  }
   0x2   :  { %s840_s19 = smov 0  }
   0x3 LB: > { %s30_s20 = sadd.s32 1, %s799_s18  ;;  %p78_p1 = scmp.ne.s32.totalorder %s791_s16, %s787_s15  ;;  %s803_s19 = sphi %s840_s19, %s15_s19   ;;  %s799_s18 = sphi %s838_s18, %s919_s18   ;;  %s795_s17 = sphi %s836_s17, %s918_s17   ;;  %s791_s16 = sphi %s834_s16, %s917_s16   ;;  %s787_s15 = sphi %s832_s15, %s916_s15  }
   0x4   : > { %p32_p0 = scmp.ge.s32.totalorder %s30_s20, 4  ;;  %p79_p2 = scmp.eq.s32.totalorder %s803_s19, 0 }
   0x5   : > { %s71_s22 = sadd.s32 1, %s791_s16  ;;  %p702_p5 = scmp.ge.s32.totalorder %s803_s19, 4 }
   0x6   : > { %s921_s20 = smov (%p32_p0, %s30_s20), 0  ;;  %p80_p3 = por %p79_p2, %p78_p1 }
   0x7   : > { %s67_s21 = ssub.s32 %s799_s18, %s921_s20  ;;  %198 = sbr.rel (%p702_p5) target bundleno = 18 (0x12), region = 20 }
   0x8   : > { %p69_p4 = scmp.eq.s32.totalorder %s67_s21, 0 }
   0xa   : > { %s867_s23 = scalar_select %p69_p4, %s791_s16, %s71_s22  }
   0xc   : > { %201 = sbr.rel (!%p80_p3) target bundleno = 18 (0x12), region = 24  ;;  %s203_s24 = sand.u32 (%p80_p3), 1, %s791_s16  }
   0xd   : > { %s718_s25 = sshll.u32 (%p80_p3), %s799_s18, 3  ;;  %s703_s26 = sshll.u32 (%p80_p3), %s203_s24, 4 }
   0xe   : > { %s211_s29 = scalar_lea.vmem (%p80_p3), %s912_s1, %s718_s25  ;;  %s205_s30 = scalar_lea.vmem (%p80_p3), [#allocation3], %s703_s26 }
   0xf   : > { %v242_v0 = vld [vmem:[%s211_s29] sm:$0xff] (%p80_p3) }
  0x10   : > { %v244_v1 = vld [vmem:[%s211_s29 + $0x20] sm:$0xff] (%p80_p3)  ;;  %243 = vst [vmem:[%s205_s30] sm:$0xff] (%p80_p3), %v242_v0 }
  0x11   : > { %245 = vst [vmem:[%s205_s30 + $0x8] sm:$0xff] %v244_v1 }
  0x12 PF: > { %p706_p6 = scmp.ge.s32.totalorder %s803_s19, 1  ;;  %p250_p7 = scmp.lt.s32.totalorder %s803_s19, 5 }
  0x14   : > { %p251_p8 = pnand %p706_p6, %p250_p7 }
  0x15   : > { %s257_s5 = sand.u32 (!%p251_p8), 1, %s787_s15   ;;  %s708_s10 = sshll.u32 (!%p251_p8), %s795_s17, 1 }
  0x16   : > { %254 = sbr.rel (%p251_p8) target bundleno = 249 (0xf9), region = 62  ;;  %s707_s6 = sshll.u32 (!%p251_p8), %s257_s5, 4 }
  0x17   : > { %s259_s7 = scalar_lea.vmem (!%p251_p8), [#allocation3], %s707_s6  ;;  %p321_p9 = scmp.lt.s32.totalorder (!%p251_p8), %s708_s10, 7 }
  0x1b   : > { %v805_v2 = vmov 0   ;;  %v762_v3 = vld [vmem:[%s259_s7 + $0x4] ss:$8 sps:$4 sm:$0xff]   ;;  %v764_v4 = vld [vmem:[%s259_s7] ss:$8 sps:$4 sm:$0xff]   ;;  %vm368_vm0 = vcmask 130048   ;;  %v449_v21 = vlaneseq }
  0x1c   : > { %404 = vmatprep.mubr.bf16.mxu0 %v805_v2  ;;  %386 = vmatprep.subr.bf16.mxu0 %v762_v3  ;;  %v355_v5 = vld [vmem:[%s911_s0] sm:$0xf]  ;;  %s923_s10 = smov (!%p321_p9, %s708_s10), 7  ;;  %v806_v14 = vmov 1966171168  }
  0x1d   : > { %387 = vmatpush1.bf16.msra.mxu0 %v764_v4  ;;  %s709_s11 = sshll.u32 %s923_s10, 2  ;;  %v447_v15 = vunpack.c.l.s4 %v806_v14  ;;  %v450_v32 = vshrl.u32 %v449_v21, 7  ;;  %s335_s21 = scalar_lea.vmem %s914_s3, %s923_s10  ;;  %vm463_vm1 = vcmp.lt.s32.totalorder %v449_v21, 256 }
  0x1e   : > { %s326_s14 = scalar_lea.vmem %s913_s2, %s709_s11  ;;  %s344_s25 = scalar_lea.vmem %s915_s4, %s923_s10 }
  0x1f   : > { %v448_v27 = vunpack.c.0.s8 %v447_v15 }
  0x20   : > { %714 = vmatmul.mubr.msk.bf16.vlgmr.msra.gmra.mxu0 %vm368_vm0, %v355_v5 }
  0x21   : > { %v451_v39 = vsub.s32 %v448_v27, %v450_v32 }
  0xe0   : > { %v406_v6 = vpop.f32.mrf.mxu0 }
  0xe1   : > { %v431_v7 = vrot.slane %v406_v6, 4  ;;  %v466_v8 = vmul.f32 %v406_v6, %v406_v6 }
  0xe2   : > { %v408_v9 = vpop.f32.mrf.mxu0 }
  0xe3   : > { %v432_v10 = vadd.f32 %v431_v7, %v406_v6  ;;  %v468_v11 = vrot.slane %v466_v8, 4  ;;  %v719_v12 = vpack.c.bf16 %v408_v9, %v406_v6  ;;  %v437_v13 = vrot.slane %v408_v9, 4 }
  0xe4   : > { %v467_v16 = vmul.f32 %v408_v9, %v408_v9  ;;  %v410_v17 = vpop.f32.mrf.mxu0 }
  0xe5   : > { %v433_v18 = vrot.slane %v432_v10, 2  ;;  %v469_v19 = vadd.f32 %v468_v11, %v466_v8  ;;  %430 = vst [vmem:[%s326_s14] sm:$0xff] %v719_v12  ;;  %v438_v20 = vadd.f32 %v437_v13, %v408_v9 }
  0xe6   : > { %v474_v22 = vrot.slane %v467_v16, 4  ;;  %v411_v23 = vpop.f32.mrf.mxu0 }
  0xe7   : > { %v434_v24 = vadd.f32 %v433_v18, %v432_v10  ;;  %v470_v25 = vrot.slane %v469_v19, 2  ;;  %v439_v26 = vrot.slane %v438_v20, 2 }
  0xe8   : > { %v475_v28 = vadd.f32 %v474_v22, %v467_v16 }
  0xe9   : > { %v435_v29 = vrot.slane %v434_v24, 1  ;;  %v471_v30 = vadd.f32 %v470_v25, %v469_v19  ;;  %v440_v31 = vadd.f32 %v439_v26, %v438_v20 }
  0xea   : > { %v476_v33 = vrot.slane %v475_v28, 2 }
  0xeb   : > { %v441_v34 = vrot.slane %v440_v31, 1  ;;  %v472_v35 = vrot.slane %v471_v30, 1  ;;  %v436_v37 = vadd.f32 %v435_v29, %v434_v24 }
  0xec   : > { %v477_v36 = vadd.f32 %v476_v33, %v475_v28 }
  0xed   : > { %v442_v38 = vadd.f32 %v441_v34, %v440_v31  ;;  %v473_v42 = vadd.f32 %v472_v35, %v471_v30 }
  0xee   : > { %v478_v40 = vrot.slane %v477_v36, 1 }
  0xef   : > { %v445_v41 = vcombine.low %v436_v37, %v442_v38 }
  0xf0   : > { %v479_v43 = vadd.f32 %v478_v40, %v477_v36 }
  0xf1   : > { %v452_v44 = vrot.slane %v445_v41, %v451_v39 }
  0xf2   : > { %v482_v45 = vcombine.low %v473_v42, %v479_v43 }
  0xf3   : > { %v459_v46 = vrot.slane %v452_v44, %v451_v39 }
  0xf4   : > { %v489_v47 = vrot.slane %v482_v45, %v451_v39 }
  0xf5   : > { %465 = vst.msk [vmem:[%s335_s21] sm:$0x3] %vm463_vm1, %v459_v46 }
  0xf6   : > { %v496_v48 = vrot.slane %v489_v47, %v451_v39 }
  0xf8   : > { %498 = vst.msk [vmem:[%s344_s25] sm:$0x3] %vm463_vm1, %v496_v48 }
  0xf9 PF: > { %s15_s19 = sadd.s32 1, %s803_s19   ;;  %s916_s15 = smov %s791_s16 }
  0xfa   : > { %p12_p10 = scmp.ge.s32.totalorder %s15_s19, 6   ;;  %s917_s16 = smov %s867_s23 }
  0xfb   : > { %s918_s17 = smov %s799_s18  ;;  %s919_s18 = smov %s921_s20 }
  0xfc   :  { %14 = sbr.rel (!%p12_p10) target bundleno = 3 (0x3), region = 136 }

// kernel: tile.57
= control target key start
LH: loop header
LB: loop body
LE: loop exit
PB: predicated region body
PF: predicated region fallthrough
CT: control target
= control target key end

     0   :  { %s22_s0 = inlined_call_operand.vmem [shape: f32[32], index: 0, kind: input, shape index: {}]   ;;  %s23_s1 = inlined_call_operand.vmem [shape: f32[4,32], index: 1, kind: output, shape index: {}]  }
   0x1   :  { %v4_v0 = vld [vmem:[%s22_s0] ss:$0 sm:$0xff] }
   0x2   :  { %5 = vst [vmem:[%s23_s1] sm:$0xf] %v4_v0 }

// kernel: tile.59
= control target key start
LH: loop header
LB: loop body
LE: loop exit
PB: predicated region body
PF: predicated region fallthrough
CT: control target
= control target key end

     0   :  { %vm8_vm0 = vcmask 261120   ;;  %s40_s8 = smov 32   ;;  %s41_s9 = smov 64   ;;  %vm14_vm1 = vcmask 1048320   ;;  %vm20_vm2 = vcmask 785920   ;;  %vm26_vm3 = vcmask 523520   ;;  %s58_s0 = inlined_call_operand.vmem [shape: f32[4,32], index: 0, kind: input, shape index: {}]   ;;  %s59_s1 = inlined_call_operand.vmem [shape: f32[1,128], index: 1, kind: output, shape index: {}]  }
   0x1   :  { %v5_v0 = vld [vmem:[%s58_s0] sm:$0xf]  ;;  %s39_s0 = smov 96  }
   0x2   :  { %6 = vst [vmem:[#allocation1] sm:$0xf] %v5_v0 }
   0x9   :  { %v11_v1 = vld [vmem:[#allocation1 + $0x3] sm:$0x1]   ;;  %v23_v2 = vld [vmem:[#allocation1 + $0x1] sm:$0x1]   ;;  %v7_v3 = vld [vmem:[#allocation1] sm:$0x1]  }
   0xa   :  { %12 = vrot.lane.b32.xlu0 %v11_v1, %s39_s0  ;;  %24 = vrot.lane.b32.xlu1 %v23_v2, %s40_s8  ;;  %v17_v4 = vld [vmem:[#allocation1 + $0x2] sm:$0x1]   ;;  %9 = vst.msk [vmem:[#allocation0] sm:$0x1] %vm8_vm0, %v7_v3  }
   0xe   :  { %18 = vrot.lane.b32.xlu0 %v17_v4, %s41_s9 }
  0x7c   :  { %v13_v5 = vpop.permute.xlu0 %12   ;;  %v25_v6 = vpop.permute.xlu1 %24  }
  0x7d   :  { %15 = vst.msk [vmem:[#allocation0] sm:$0x1] %vm14_vm1, %v13_v5  }
  0x80   :  { %v19_v7 = vpop.permute.xlu0 %18  }
  0x81   :  { %21 = vst.msk [vmem:[#allocation0] sm:$0x1] %vm20_vm2, %v19_v7  }
  0x82   :  { %27 = vst.msk [vmem:[#allocation0] sm:$0x1] %vm26_vm3, %v25_v6  }
  0x89   :  { %v32_v8 = vld [vmem:[#allocation0] sm:$0x1] }
  0x8a   :  { %35 = vst [vmem:[%s59_s1] sm:$0x1] %v32_v8 }

// kernel: netG64_forward.12
= control target key start
LH: loop header
LB: loop body
LE: loop exit
PB: predicated region body
PF: predicated region fallthrough
CT: control target
= control target key end

     0   :  { %s140_s0 = inlined_call_operand.vmem [shape: bf16[32,128], index: 0, kind: input, shape index: {}]   ;;  %s141_s1 = inlined_call_operand.vmem [shape: f32[1,128], index: 1, kind: input, shape index: {}]   ;;  %s142_s2 = inlined_call_operand.vmem [shape: f32[1,128], index: 2, kind: input, shape index: {}]   ;;  %s143_s3 = inlined_call_operand.vmem [shape: bf16[32,128], index: 3, kind: output, shape index: {}]  }
   0x1   :  { %v83_v0 = vld [vmem:[%s140_s0] sm:$0xff]   ;;  %v100_v4 = vld [vmem:[%s140_s0 + $0x8] sm:$0xff]  }
   0x2   :  { %v72_v1 = vld [vmem:[%s141_s1] ss:$0 sm:$0xff]  ;;  %v84_v2 = vunpack.c.l.bf16 %v83_v0  ;;  %v85_v3 = vunpack.c.h.bf16 %v83_v0  ;;  %v88_v6 = vunpack.c.l.bf16 %v100_v4  ;;  %v89_v7 = vunpack.c.h.bf16 %v100_v4 }
   0x3   :  { %v73_v5 = vld [vmem:[%s142_s2] ss:$0 sm:$0xff] }
   0x4   :  { %v29_v8 = vmul.f32 %v84_v2, %v72_v1  ;;  %v30_v9 = vmul.f32 %v85_v3, %v72_v1  ;;  %v31_v10 = vmul.f32 %v88_v6, %v72_v1  ;;  %v32_v11 = vmul.f32 %v89_v7, %v72_v1 }
   0x6   :  { %v40_v12 = vadd.f32 %v73_v5, %v29_v8  ;;  %v41_v13 = vadd.f32 %v73_v5, %v30_v9  ;;  %v42_v14 = vadd.f32 %v73_v5, %v31_v10  ;;  %v43_v15 = vadd.f32 %v73_v5, %v32_v11 }
   0x8   :  { %v44_v16 = vmax.f32 %v40_v12, 0.0  ;;  %v45_v17 = vmax.f32 %v41_v13, 0.0  ;;  %v46_v18 = vmax.f32 %v42_v14, 0.0  ;;  %v47_v19 = vmax.f32 %v43_v15, 0.0 }
   0xa   :  { %v93_v20 = vpack.c.bf16 %v45_v17, %v44_v16  ;;  %v98_v21 = vpack.c.bf16 %v47_v19, %v46_v18 }
   0xc   :  { %94 = vst [vmem:[%s143_s3] sm:$0xff] %v93_v20   ;;  %101 = vst [vmem:[%s143_s3 + $0x8] sm:$0xff] %v98_v21  }

// kernel: netG64_forward.11
= control target key start
LH: loop header
LB: loop body
LE: loop exit
PB: predicated region body
PF: predicated region fallthrough
CT: control target
= control target key end

     0   :  { %vm377_vm0 = vcmask 523264   ;;  %s968_s1 = inlined_call_operand.vmem [shape: bf16[576,128], index: 1, kind: input, shape index: {}]   ;;  %s969_s0 = inlined_call_operand.vmem [shape: bf16[32,576], index: 0, kind: input, shape index: {}]   ;;  %s970_s2 = inlined_call_operand.vmem [shape: bf16[32,128], index: 2, kind: output, shape index: {0}]   ;;  %s971_s3 = inlined_call_operand.vmem [shape: f32[1,1,128], index: 3, kind: output, shape index: {1}]   ;;  %s972_s4 = inlined_call_operand.vmem [shape: f32[1,1,128], index: 4, kind: output, shape index: {2}]  }
   0x1   :  { %v743_v0 = vld [vmem:[%s968_s1 + $0x78] sm:$0xff]   ;;  %v747_v4 = vld [vmem:[%s968_s1 + $0x70] sm:$0xff]   ;;  %v751_v8 = vld [vmem:[%s968_s1 + $0x68] sm:$0xff]  }
   0x2   :  { %v744_v1 = vld [vmem:[%s968_s1 + $0xf8] sm:$0xff]   ;;  %669 = vmatprep.subr.bf16.mxu0 %v743_v0  ;;  %v748_v5 = vld [vmem:[%s968_s1 + $0xf0] sm:$0xff]   ;;  %v752_v9 = vld [vmem:[%s968_s1 + $0xe8] sm:$0xff]  }
   0x3   :  { %v745_v2 = vld [vmem:[%s968_s1 + $0x38] sm:$0xff]   ;;  %697 = vmatprep.subr.bf16.mxu1 %v744_v1  ;;  %v749_v6 = vld [vmem:[%s968_s1 + $0x30] sm:$0xff]   ;;  %v753_v10 = vld [vmem:[%s968_s1 + $0x28] sm:$0xff]  }
   0x4   :  { %v746_v3 = vld [vmem:[%s968_s1 + $0xb8] sm:$0xff]   ;;  %670 = vmatpush3.bf16.msra.mxu0 %v745_v2  ;;  %v750_v7 = vld [vmem:[%s968_s1 + $0xb0] sm:$0xff]   ;;  %v754_v11 = vld [vmem:[%s968_s1 + $0xa8] sm:$0xff]  }
   0x5   :  { %698 = vmatpush3.bf16.msra.mxu1 %v746_v3  ;;  %671 = vmatprep.subr.bf16.mxu0 %v747_v4  ;;  %v755_v12 = vld [vmem:[%s968_s1 + $0x60] sm:$0xff]   ;;  %v759_v16 = vld [vmem:[%s968_s1 + $0x58] sm:$0xff]   ;;  %v763_v20 = vld [vmem:[%s968_s1 + $0x50] sm:$0xff]  }
   0x6   :  { %699 = vmatprep.subr.bf16.mxu1 %v748_v5  ;;  %v756_v13 = vld [vmem:[%s968_s1 + $0xe0] sm:$0xff]   ;;  %v760_v17 = vld [vmem:[%s968_s1 + $0xd8] sm:$0xff]   ;;  %v764_v21 = vld [vmem:[%s968_s1 + $0xd0] sm:$0xff]  }
   0x7   :  { %v757_v14 = vld [vmem:[%s968_s1 + $0x20] sm:$0xff]   ;;  %v761_v18 = vld [vmem:[%s968_s1 + $0x18] sm:$0xff]   ;;  %v765_v22 = vld [vmem:[%s968_s1 + $0x10] sm:$0xff]  }
   0x8   :  { %672 = vmatpush3.bf16.msra.mxu0 %v749_v6  ;;  %v758_v15 = vld [vmem:[%s968_s1 + $0xa0] sm:$0xff]   ;;  %v762_v19 = vld [vmem:[%s968_s1 + $0x98] sm:$0xff]   ;;  %v766_v23 = vld [vmem:[%s968_s1 + $0x90] sm:$0xff]  }
   0x9   :  { %700 = vmatpush3.bf16.msra.mxu1 %v750_v7  ;;  %673 = vmatprep.subr.bf16.mxu0 %v751_v8  ;;  %v767_v24 = vld [vmem:[%s968_s1 + $0x48] sm:$0xff]   ;;  %v771_v28 = vld [vmem:[%s968_s1 + $0x40] sm:$0xff]   ;;  %v781_v36 = vld [vmem:[%s968_s1 + $0x118] sm:$0xff]  }
   0xa   :  { %701 = vmatprep.subr.bf16.mxu1 %v752_v9  ;;  %v768_v25 = vld [vmem:[%s968_s1 + $0xc8] sm:$0xff]   ;;  %v772_v29 = vld [vmem:[%s968_s1 + $0xc0] sm:$0xff]   ;;  %v782_v37 = vld [vmem:[%s968_s1 + $0x110] sm:$0xff]  }
   0xb   :  { %v769_v26 = vld [vmem:[%s968_s1 + $0x8] sm:$0xff]   ;;  %v773_v30 = vld [vmem:[%s968_s1] sm:$0xff]  }
   0xc   :  { %674 = vmatpush3.bf16.msra.mxu0 %v753_v10  ;;  %v770_v27 = vld [vmem:[%s968_s1 + $0x88] sm:$0xff]   ;;  %v774_v31 = vld [vmem:[%s968_s1 + $0x80] sm:$0xff]  }
   0xd   :  { %702 = vmatpush3.bf16.msra.mxu1 %v754_v11  ;;  %675 = vmatprep.subr.bf16.mxu0 %v755_v12  ;;  %v775_v32 = vld [vmem:[%s969_s0] ss:$20 sps:$4 sm:$0xff]   ;;  %v777_v33 = vld [vmem:[%s969_s0 + $0x4] ss:$20 sps:$4 sm:$0xff]   ;;  %v778_v34 = vld [vmem:[%s969_s0 + $0x8] ss:$20 sps:$4 sm:$0xff]  }
   0xe   :  { %703 = vmatprep.subr.bf16.mxu1 %v756_v13  ;;  %v780_v35 = vld [vmem:[%s969_s0 + $0xc] ss:$20 sps:$4 sm:$0xff]   ;;  %416 = vmatprep.mubr.bf16.mxu0 %v777_v33  ;;  %v785_v39 = vld [vmem:[%s969_s0 + $0x34] ss:$20 sps:$4 sm:$0xff]   ;;  %v788_v42 = vld [vmem:[%s969_s0 + $0x30] ss:$20 sps:$4 sm:$0xff]  }
   0xf   :  { %465 = vmatprep.mubr.bf16.mxu1 %v780_v35  ;;  %v783_v38 = vld [vmem:[%s969_s0 + $0x2c] ss:$20 sps:$4 sm:$0xff]   ;;  %v787_v40 = vld [vmem:[%s969_s0 + $0x28] ss:$20 sps:$4 sm:$0xff]   ;;  %v791_v43 = vld [vmem:[%s969_s0 + $0x10] ss:$20 sps:$4 sm:$0xff]  }
  0x10   :  { %676 = vmatpush3.bf16.msra.mxu0 %v757_v14  ;;  %v789_v41 = vld [vmem:[%s968_s1 + $0x108] sm:$0xff]   ;;  %v790_v44 = vld [vmem:[%s968_s1 + $0x100] sm:$0xff]  }
  0x11   :  { %704 = vmatpush3.bf16.msra.mxu1 %v758_v15  ;;  %677 = vmatprep.subr.bf16.mxu0 %v759_v16  ;;  %v792_v45 = vld [vmem:[%s969_s0 + $0x38] ss:$20 sps:$4 sm:$0xff]  }
  0x12   :  { %705 = vmatprep.subr.bf16.mxu1 %v760_v17 }
  0x14   :  { %678 = vmatpush3.bf16.msra.mxu0 %v761_v18 }
  0x15   :  { %706 = vmatpush3.bf16.msra.mxu1 %v762_v19  ;;  %679 = vmatprep.subr.bf16.mxu0 %v763_v20 }
  0x16   :  { %707 = vmatprep.subr.bf16.mxu1 %v764_v21 }
  0x18   :  { %680 = vmatpush3.bf16.msra.mxu0 %v765_v22 }
  0x19   :  { %708 = vmatpush3.bf16.msra.mxu1 %v766_v23  ;;  %681 = vmatprep.subr.bf16.mxu0 %v767_v24 }
  0x1a   :  { %709 = vmatprep.subr.bf16.mxu1 %v768_v25 }
  0x1c   :  { %682 = vmatpush3.bf16.msra.mxu0 %v769_v26 }
  0x1d   :  { %710 = vmatpush3.bf16.msra.mxu1 %v770_v27  ;;  %683 = vmatprep.subr.bf16.mxu0 %v771_v28 }
  0x1e   :  { %711 = vmatprep.subr.bf16.mxu1 %v772_v29 }
  0x20   :  { %684 = vmatpush3.bf16.msra.mxu0 %v773_v30 }
  0x21   :  { %712 = vmatpush3.bf16.msra.mxu1 %v774_v31  ;;  %731 = vmatprep.subr.bf16.mxu0 %v781_v36 }
  0x23   :  { %417 = vmatmul.mubr.bf16.vlgmr.msra.gmra.mxu0 %v775_v32 }
  0x24   :  { %466 = vmatmul.mubr.bf16.vlgmr.msra.gmra.mxu1 %v778_v34  ;;  %732 = vmatpush3.bf16.msra.mxu0 %v781_v36 }
  0x25   :  { %733 = vmatprep.subr.bf16.mxu0 %v782_v37  ;;  %424 = vmatprep.mubr.bf16.mxu0 %v783_v38 }
  0x26   :  { %473 = vmatprep.mubr.bf16.mxu1 %v785_v39 }
  0x28   :  { %734 = vmatpush3.bf16.msra.mxu0 %v782_v37 }
  0x29   :  { %735 = vmatprep.subr.bf16.mxu0 %v789_v41 }
  0x2b   :  { %425 = vmatmul.mubr.bf16.gmra.mxu0 %v787_v40 }
  0x2c   :  { %474 = vmatmul.mubr.bf16.gmra.mxu1 %v788_v42  ;;  %739 = vmatprep.mubr.msk.bf16.mxu0 %vm377_vm0, %v791_v43 }
  0x2d   :  { %736 = vmatpush3.bf16.msra.mxu0 %v789_v41 }
  0x2e   :  { %737 = vmatprep.subr.bf16.mxu0 %v790_v44 }
  0x31   :  { %738 = vmatpush3.bf16.msra.mxu0 %v790_v44 }
  0x34   :  { %740 = vmatmul.mubr.msk.bf16.vlgmr.msra.gmra.mxu0 %vm377_vm0, %v792_v45 }
  0xe3   :  { %v685_v46 = vpop.f32.mrf.mxu0 }
  0xe4   :  { %v713_v47 = vpop.f32.mrf.mxu1 }
  0xe5   :  { %v686_v48 = vpop.f32.mrf.mxu0 }
  0xe6   :  { %v714_v49 = vpop.f32.mrf.mxu1  ;;  %v687_v61 = vadd.f32 %v686_v48, %v685_v46 }
  0xe7   :  { %v688_v50 = vpop.f32.mrf.mxu0  ;;  %v715_v62 = vadd.f32 %v714_v49, %v713_v47 }
  0xe8   :  { %v716_v51 = vpop.f32.mrf.mxu1 }
  0xe9   :  { %v689_v52 = vpop.f32.mrf.mxu0  ;;  %v468_v9 = vadd.f32 %v715_v62, %v687_v61 }
  0xea   :  { %v717_v53 = vpop.f32.mrf.mxu1  ;;  %v690_v5 = vadd.f32 %v689_v52, %v688_v50 }
  0xeb   :  { %v691_v54 = vpop.f32.mrf.mxu0  ;;  %v718_v6 = vadd.f32 %v717_v53, %v716_v51 }
  0xec   :  { %v719_v55 = vpop.f32.mrf.mxu1 }
  0xed   :  { %v692_v56 = vpop.f32.mrf.mxu0  ;;  %v471_v15 = vadd.f32 %v718_v6, %v690_v5 }
  0xee   :  { %v720_v57 = vpop.f32.mrf.mxu1  ;;  %v693_v0 = vadd.f32 %v692_v56, %v691_v54 }
  0xef   :  { %v694_v58 = vpop.f32.mrf.mxu0  ;;  %v721_v1 = vadd.f32 %v720_v57, %v719_v55 }
  0xf0   :  { %v722_v59 = vpop.f32.mrf.mxu1 }
  0xf1   :  { %v695_v60 = vpop.f32.mrf.mxu0  ;;  %v476_v8 = vadd.f32 %v721_v1, %v693_v0 }
  0xf2   :  { %v723_v63 = vpop.f32.mrf.mxu1  ;;  %v696_v2 = vadd.f32 %v695_v60, %v694_v58 }
  0xf3   :  { %v724_v3 = vadd.f32 %v723_v63, %v722_v59 }
  0xf4   :  { %v741_v4 = vpop.f32.mrf.mxu0 }
  0xf5   :  { %v479_v10 = vadd.f32 %v724_v3, %v696_v2  ;;  %v525_v12 = vadd.f32 %v741_v4, %v476_v8 }
  0xf6   :  { %v516_v7 = vpop.f32.mrf.mxu0 }
  0xf7   :  { %v517_v13 = vadd.f32 %v516_v7, %v468_v9  ;;  %v578_v23 = vmul.f32 %v525_v12, %v525_v12 }
  0xf8   :  { %v742_v11 = vpop.f32.mrf.mxu0 }
  0xf9   :  { %v528_v14 = vadd.f32 %v742_v11, %v479_v10  ;;  %v576_v19 = vmul.f32 %v517_v13, %v517_v13 }
  0xfa   :  { %v519_v16 = vpop.f32.mrf.mxu0 }
  0xfb   :  { %v666_v17 = vpack.c.bf16 %v528_v14, %v525_v12  ;;  %v520_v18 = vadd.f32 %v519_v16, %v471_v15  ;;  %v579_v26 = vmul.f32 %v528_v14, %v528_v14 }
  0xfd   :  { %668 = vst [vmem:[%s970_s2 + $0x8] sm:$0xff] %v666_v17   ;;  %v661_v20 = vpack.c.bf16 %v520_v18, %v517_v13  ;;  %v566_v21 = vadd.f32 %v520_v18, %v517_v13  ;;  %v577_v22 = vmul.f32 %v520_v18, %v520_v18 }
  0xff   :  { %662 = vst [vmem:[%s970_s2] sm:$0xff] %v661_v20   ;;  %v567_v24 = vadd.f32 %v566_v21, %v525_v12  ;;  %v580_v25 = vadd.f32 %v577_v22, %v576_v19 }
 0x101   :  { %v568_v27 = vadd.f32 %v567_v24, %v528_v14  ;;  %v581_v28 = vadd.f32 %v580_v25, %v578_v23 }
 0x103   :  { %v569_v29 = vrot.slane %v568_v27, 4  ;;  %v582_v30 = vadd.f32 %v581_v28, %v579_v26 }
 0x105   :  { %v570_v31 = vadd.f32 %v569_v29, %v568_v27  ;;  %v583_v32 = vrot.slane %v582_v30, 4 }
 0x107   :  { %v571_v33 = vrot.slane %v570_v31, 2  ;;  %v584_v34 = vadd.f32 %v583_v32, %v582_v30 }
 0x109   :  { %v572_v35 = vadd.f32 %v571_v33, %v570_v31  ;;  %v585_v36 = vrot.slane %v584_v34, 2 }
 0x10b   :  { %v573_v37 = vrot.slane %v572_v35, 1  ;;  %v586_v38 = vadd.f32 %v585_v36, %v584_v34 }
 0x10d   :  { %v574_v39 = vadd.f32 %v573_v37, %v572_v35  ;;  %v587_v40 = vrot.slane %v586_v38, 1 }
 0x10f   :  { %575 = vst [vmem:[%s971_s3] sm:$0x1] %v574_v39  ;;  %v588_v41 = vadd.f32 %v587_v40, %v586_v38 }
 0x111   :  { %589 = vst [vmem:[%s972_s4] sm:$0x1] %v588_v41 }

// kernel: tile.68
= control target key start
LH: loop header
LB: loop body
LE: loop exit
PB: predicated region body
PF: predicated region fallthrough
CT: control target
= control target key end

     0   :  { %s22_s0 = inlined_call_operand.vmem [shape: f32[16], index: 0, kind: input, shape index: {}]   ;;  %s23_s1 = inlined_call_operand.vmem [shape: f32[4,16], index: 1, kind: output, shape index: {}]  }
   0x1   :  { %v4_v0 = vld [vmem:[%s22_s0] ss:$0 sm:$0xff] }
   0x2   :  { %5 = vst [vmem:[%s23_s1] sm:$0xf] %v4_v0 }

// kernel: tile.69
= control target key start
LH: loop header
LB: loop body
LE: loop exit
PB: predicated region body
PF: predicated region fallthrough
CT: control target
= control target key end

     0   :  { %vm8_vm0 = vcmask 130048   ;;  %s40_s8 = smov 16   ;;  %s41_s9 = smov 32   ;;  %vm14_vm1 = vcmask 523648   ;;  %vm20_vm2 = vcmask 392448   ;;  %vm26_vm3 = vcmask 261248   ;;  %s58_s0 = inlined_call_operand.vmem [shape: f32[4,16], index: 0, kind: input, shape index: {}]   ;;  %s59_s1 = inlined_call_operand.vmem [shape: f32[64], index: 1, kind: output, shape index: {}]  }
   0x1   :  { %v5_v0 = vld [vmem:[%s58_s0] sm:$0xf]  ;;  %s39_s0 = smov 48  }
   0x2   :  { %6 = vst [vmem:[#allocation1] sm:$0xf] %v5_v0 }
   0x9   :  { %v11_v1 = vld [vmem:[#allocation1 + $0x3] sm:$0x1]   ;;  %v23_v2 = vld [vmem:[#allocation1 + $0x1] sm:$0x1]   ;;  %v7_v3 = vld [vmem:[#allocation1] sm:$0x1]  }
   0xa   :  { %12 = vrot.lane.b32.xlu0 %v11_v1, %s39_s0  ;;  %24 = vrot.lane.b32.xlu1 %v23_v2, %s40_s8  ;;  %v17_v4 = vld [vmem:[#allocation1 + $0x2] sm:$0x1]   ;;  %9 = vst.msk [vmem:[#allocation0] sm:$0x1] %vm8_vm0, %v7_v3  }
   0xe   :  { %18 = vrot.lane.b32.xlu0 %v17_v4, %s41_s9 }
  0x7c   :  { %v13_v5 = vpop.permute.xlu0 %12   ;;  %v25_v6 = vpop.permute.xlu1 %24  }
  0x7d   :  { %15 = vst.msk [vmem:[#allocation0] sm:$0x1] %vm14_vm1, %v13_v5  }
  0x80   :  { %v19_v7 = vpop.permute.xlu0 %18  }
  0x81   :  { %21 = vst.msk [vmem:[#allocation0] sm:$0x1] %vm20_vm2, %v19_v7  }
  0x82   :  { %27 = vst.msk [vmem:[#allocation0] sm:$0x1] %vm26_vm3, %v25_v6  }
  0x89   :  { %v32_v8 = vld [vmem:[#allocation0] sm:$0x1] }
  0x8a   :  { %35 = vst [vmem:[%s59_s1] sm:$0x1] %v32_v8 }

// kernel: netG64_forward.13
= control target key start
LH: loop header
LB: loop body
LE: loop exit
PB: predicated region body
PF: predicated region fallthrough
CT: control target
= control target key end

     0   :  { %vm347_vm0 = vcmask 261120   ;;  %s1271_s1 = inlined_call_operand.vmem [shape: bf16[288,128], index: 1, kind: input, shape index: {}]   ;;  %s1272_s0 = inlined_call_operand.vmem [shape: bf16[128,288], index: 0, kind: input, shape index: {}]   ;;  %s1273_s2 = inlined_call_operand.vmem [shape: bf16[128,128], index: 2, kind: output, shape index: {0}]   ;;  %s1274_s3 = inlined_call_operand.vmem [shape: f32[1,1,128], index: 3, kind: output, shape index: {1}]   ;;  %s1275_s4 = inlined_call_operand.vmem [shape: f32[1,1,128], index: 4, kind: output, shape index: {2}]  }
   0x1   :  { %v1008_v0 = vld [vmem:[%s1271_s1 + $0x78] sm:$0xff]   ;;  %v1010_v2 = vld [vmem:[%s1271_s1 + $0x70] sm:$0xff]   ;;  %v1012_v4 = vld [vmem:[%s1271_s1 + $0x68] sm:$0xff]  }
   0x2   :  { %v1009_v1 = vld [vmem:[%s1271_s1 + $0x38] sm:$0xff]   ;;  %898 = vmatprep.subr.bf16.mxu0 %v1008_v0  ;;  %992 = vmatprep.subr.bf16.mxu1 %v1008_v0  ;;  %v1011_v3 = vld [vmem:[%s1271_s1 + $0x30] sm:$0xff]   ;;  %v1013_v5 = vld [vmem:[%s1271_s1 + $0x28] sm:$0xff]  }
   0x3   :  { %899 = vmatpush3.bf16.msra.mxu0 %v1009_v1  ;;  %1000 = vmatpush3.bf16.msra.mxu1 %v1009_v1  ;;  %v1014_v6 = vld [vmem:[%s1271_s1 + $0x60] sm:$0xff]   ;;  %v1016_v8 = vld [vmem:[%s1271_s1 + $0x58] sm:$0xff]   ;;  %v1018_v10 = vld [vmem:[%s1271_s1 + $0x50] sm:$0xff]  }
   0x4   :  { %900 = vmatprep.subr.bf16.mxu0 %v1010_v2  ;;  %993 = vmatprep.subr.bf16.mxu1 %v1010_v2  ;;  %v1015_v7 = vld [vmem:[%s1271_s1 + $0x20] sm:$0xff]   ;;  %v1017_v9 = vld [vmem:[%s1271_s1 + $0x18] sm:$0xff]   ;;  %v1019_v13 = vld [vmem:[%s1271_s1 + $0x10] sm:$0xff]  }
   0x5   :  { %v1026_v11 = vld [vmem:[%s1272_s0 + $0x4] ss:$12 sps:$4 sm:$0xff]   ;;  %v1029_v12 = vld [vmem:[%s1272_s0 + $0x94] ss:$12 sps:$4 sm:$0xff]   ;;  %v1020_v14 = vld [vmem:[%s1271_s1 + $0x48] sm:$0xff]  }
   0x6   :  { %404 = vmatprep.mubr.bf16.mxu0 %v1026_v11  ;;  %452 = vmatprep.mubr.bf16.mxu1 %v1029_v12  ;;  %v1021_v15 = vld [vmem:[%s1271_s1 + $0x8] sm:$0xff]   ;;  %v1022_v16 = vld [vmem:[%s1271_s1 + $0x40] sm:$0xff]   ;;  %v1027_v20 = vld [vmem:[%s1272_s0 + $0x90] ss:$12 sps:$4 sm:$0xff]  }
   0x7   :  { %901 = vmatpush3.bf16.msra.mxu0 %v1011_v3  ;;  %1001 = vmatpush3.bf16.msra.mxu1 %v1011_v3  ;;  %v1023_v17 = vld [vmem:[%s1271_s1] sm:$0xff]   ;;  %v1030_v19 = vld [vmem:[%s1271_s1 + $0x88] sm:$0xff]   ;;  %v1041_v28 = vld [vmem:[%s1272_s0 + $0x30] ss:$12 sps:$4 sm:$0xff]  }
   0x8   :  { %902 = vmatprep.subr.bf16.mxu0 %v1012_v4  ;;  %994 = vmatprep.subr.bf16.mxu1 %v1012_v4  ;;  %v1024_v18 = vld [vmem:[%s1272_s0] ss:$12 sps:$4 sm:$0xff]   ;;  %v1031_v21 = vld [vmem:[%s1272_s0 + $0x1c] ss:$12 sps:$4 sm:$0xff]   ;;  %v1035_v24 = vld [vmem:[%s1272_s0 + $0x18] ss:$12 sps:$4 sm:$0xff]  }
   0x9   :  { %v1033_v22 = vld [vmem:[%s1272_s0 + $0xac] ss:$12 sps:$4 sm:$0xff]   ;;  %v1037_v23 = vld [vmem:[%s1271_s1 + $0x80] sm:$0xff]   ;;  %v1036_v25 = vld [vmem:[%s1272_s0 + $0xa8] ss:$12 sps:$4 sm:$0xff]  }
   0xa   :  { %v1038_v26 = vld [vmem:[%s1272_s0 + $0x34] ss:$12 sps:$4 sm:$0xff]   ;;  %v1043_v30 = vld [vmem:[%s1272_s0 + $0x4c] ss:$12 sps:$4 sm:$0xff]   ;;  %v1047_v33 = vld [vmem:[%s1272_s0 + $0x50] ss:$12 sps:$4 sm:$0xff]  }
   0xb   :  { %903 = vmatpush3.bf16.msra.mxu0 %v1013_v5  ;;  %1002 = vmatpush3.bf16.msra.mxu1 %v1013_v5  ;;  %v1040_v27 = vld [vmem:[%s1272_s0 + $0x8] ss:$12 sps:$4 sm:$0xff]   ;;  %v1042_v29 = vld [vmem:[%s1272_s0 + $0x20] ss:$12 sps:$4 sm:$0xff]   ;;  %v1045_v31 = vld [vmem:[%s1272_s0 + $0x38] ss:$12 sps:$4 sm:$0xff]  }
   0xc   :  { %904 = vmatprep.subr.bf16.mxu0 %v1014_v6  ;;  %995 = vmatprep.subr.bf16.mxu1 %v1014_v6  ;;  %v1046_v32 = vld [vmem:[%s1272_s0 + $0x48] ss:$12 sps:$4 sm:$0xff]   ;;  %v1048_v34 = vld [vmem:[%s1272_s0 + $0x64] ss:$12 sps:$4 sm:$0xff]   ;;  %v1051_v36 = vld [vmem:[%s1272_s0 + $0x60] ss:$12 sps:$4 sm:$0xff]  }
   0xd   :  { %v1050_v35 = vld [vmem:[%s1272_s0 + $0x68] ss:$12 sps:$4 sm:$0xff]   ;;  %v1052_v37 = vld [vmem:[%s1272_s0 + $0x80] ss:$12 sps:$4 sm:$0xff]   ;;  %v1055_v39 = vld [vmem:[%s1272_s0 + $0x98] ss:$12 sps:$4 sm:$0xff]  }
   0xe   :  { %v1053_v38 = vld [vmem:[%s1272_s0 + $0x7c] ss:$12 sps:$4 sm:$0xff]   ;;  %v1056_v40 = vld [vmem:[%s1272_s0 + $0x78] ss:$12 sps:$4 sm:$0xff]  }
   0xf   :  { %905 = vmatpush3.bf16.msra.mxu0 %v1015_v7  ;;  %1003 = vmatpush3.bf16.msra.mxu1 %v1015_v7  ;;  %v1057_v41 = vld [vmem:[%s1272_s0 + $0xb0] ss:$12 sps:$4 sm:$0xff]  }
  0x10   :  { %906 = vmatprep.subr.bf16.mxu0 %v1016_v8  ;;  %996 = vmatprep.subr.bf16.mxu1 %v1016_v8 }
  0x13   :  { %907 = vmatpush3.bf16.msra.mxu0 %v1017_v9  ;;  %1004 = vmatpush3.bf16.msra.mxu1 %v1017_v9 }
  0x14   :  { %908 = vmatprep.subr.bf16.mxu0 %v1018_v10  ;;  %997 = vmatprep.subr.bf16.mxu1 %v1018_v10 }
  0x17   :  { %909 = vmatpush3.bf16.msra.mxu0 %v1019_v13  ;;  %1005 = vmatpush3.bf16.msra.mxu1 %v1019_v13 }
  0x18   :  { %910 = vmatprep.subr.bf16.mxu0 %v1020_v14  ;;  %998 = vmatprep.subr.bf16.mxu1 %v1020_v14 }
  0x1b   :  { %911 = vmatpush3.bf16.msra.mxu0 %v1021_v15  ;;  %1006 = vmatpush3.bf16.msra.mxu1 %v1021_v15 }
  0x1c   :  { %912 = vmatprep.subr.bf16.mxu0 %v1022_v16  ;;  %999 = vmatprep.subr.bf16.mxu1 %v1022_v16 }
  0x1f   :  { %913 = vmatpush3.bf16.msra.mxu0 %v1023_v17  ;;  %1007 = vmatpush3.bf16.msra.mxu1 %v1023_v17 }
  0x20   :  { %972 = vmatprep.subr.bf16.mxu1 %v1030_v19 }
  0x22   :  { %405 = vmatmul.mubr.bf16.vlgmr.msra.gmra.mxu0 %v1024_v18  ;;  %453 = vmatmul.mubr.bf16.vlgmr.msra.gmra.mxu1 %v1027_v20 }
  0x23   :  { %973 = vmatpush3.bf16.msra.mxu1 %v1030_v19  ;;  %412 = vmatprep.mubr.bf16.mxu0 %v1031_v21 }
  0x24   :  { %460 = vmatprep.mubr.bf16.mxu1 %v1033_v22  ;;  %974 = vmatprep.subr.bf16.mxu1 %v1037_v23 }
  0x27   :  { %975 = vmatpush3.bf16.msra.mxu1 %v1037_v23 }
  0x2a   :  { %413 = vmatmul.mubr.bf16.gmra.mxu0 %v1035_v24  ;;  %461 = vmatmul.mubr.bf16.gmra.mxu1 %v1036_v25 }
  0x2b   :  { %420 = vmatprep.mubr.bf16.mxu0 %v1038_v26  ;;  %976 = vmatprep.mubr.msk.bf16.mxu1 %vm347_vm0, %v1040_v27 }
  0x32   :  { %421 = vmatmul.mubr.bf16.gmra.mxu0 %v1041_v28  ;;  %977 = vmatmul.mubr.msk.bf16.vlgmr.msra.gmra.mxu1 %vm347_vm0, %v1042_v29 }
  0x33   :  { %428 = vmatprep.mubr.bf16.mxu0 %v1043_v30  ;;  %980 = vmatprep.mubr.msk.bf16.mxu1 %vm347_vm0, %v1045_v31 }
  0x3a   :  { %429 = vmatmul.mubr.bf16.gmra.mxu0 %v1046_v32  ;;  %981 = vmatmul.mubr.msk.bf16.gmra.mxu1 %vm347_vm0, %v1047_v33 }
  0x3b   :  { %436 = vmatprep.mubr.bf16.mxu0 %v1048_v34  ;;  %984 = vmatprep.mubr.msk.bf16.mxu1 %vm347_vm0, %v1050_v35 }
  0x42   :  { %437 = vmatmul.mubr.bf16.gmra.mxu0 %v1051_v36  ;;  %985 = vmatmul.mubr.msk.bf16.gmra.mxu1 %vm347_vm0, %v1052_v37 }
  0x43   :  { %444 = vmatprep.mubr.bf16.mxu0 %v1053_v38  ;;  %988 = vmatprep.mubr.msk.bf16.mxu1 %vm347_vm0, %v1055_v39 }
  0x4a   :  { %445 = vmatmul.mubr.bf16.gmra.mxu0 %v1056_v40  ;;  %989 = vmatmul.mubr.msk.bf16.gmra.mxu1 %vm347_vm0, %v1057_v41 }
  0xe2   :  { %v914_v42 = vpop.f32.mrf.mxu0  ;;  %v1217_v43 = vpop.f32.mrf.mxu1 }
  0xe4   :  { %v915_v44 = vpop.f32.mrf.mxu0  ;;  %v1219_v45 = vpop.f32.mrf.mxu1 }
  0xe5   :  { %v916_v62 = vadd.f32 %v915_v44, %v914_v42 }
  0xe6   :  { %v917_v46 = vpop.f32.mrf.mxu0  ;;  %v1221_v47 = vpop.f32.mrf.mxu1 }
  0xe8   :  { %v918_v48 = vpop.f32.mrf.mxu0  ;;  %v1223_v49 = vpop.f32.mrf.mxu1 }
  0xe9   :  { %v919_v3 = vadd.f32 %v918_v48, %v917_v46 }
  0xea   :  { %v920_v50 = vpop.f32.mrf.mxu0  ;;  %v1225_v51 = vpop.f32.mrf.mxu1 }
  0xec   :  { %v921_v52 = vpop.f32.mrf.mxu0  ;;  %v1227_v53 = vpop.f32.mrf.mxu1 }
  0xed   :  { %v922_v63 = vadd.f32 %v921_v52, %v920_v50 }
  0xee   :  { %v923_v54 = vpop.f32.mrf.mxu0  ;;  %v1229_v55 = vpop.f32.mrf.mxu1 }
  0xf0   :  { %v924_v56 = vpop.f32.mrf.mxu0  ;;  %v1231_v57 = vpop.f32.mrf.mxu1 }
  0xf1   :  { %v925_v0 = vadd.f32 %v924_v56, %v923_v54 }
  0xf2   :  { %v926_v58 = vpop.f32.mrf.mxu0  ;;  %v978_v59 = vpop.f32.mrf.mxu1 }
  0xf3   :  { %v512_v4 = vadd.f32 %v978_v59, %v922_v63 }
  0xf4   :  { %v927_v60 = vpop.f32.mrf.mxu0  ;;  %v503_v61 = vpop.f32.mrf.mxu1 }
  0xf5   :  { %v504_v5 = vadd.f32 %v916_v62, %v503_v61  ;;  %v928_v11 = vadd.f32 %v927_v60, %v926_v58  ;;  %v721_v20 = vmul.f32 %v512_v4, %v512_v4 }
  0xf6   :  { %v929_v1 = vpop.f32.mrf.mxu0  ;;  %v979_v2 = vpop.f32.mrf.mxu1 }
  0xf7   :  { %v515_v6 = vadd.f32 %v979_v2, %v925_v0  ;;  %v719_v14 = vmul.f32 %v504_v5, %v504_v5 }
  0xf8   :  { %v930_v7 = vpop.f32.mrf.mxu0  ;;  %v506_v8 = vpop.f32.mrf.mxu1 }
  0xf9   :  { %v859_v9 = vpack.c.bf16 %v515_v6, %v512_v4  ;;  %v507_v10 = vadd.f32 %v919_v3, %v506_v8  ;;  %v722_v27 = vmul.f32 %v515_v6, %v515_v6  ;;  %v931_v30 = vadd.f32 %v930_v7, %v929_v1 }
  0xfa   :  { %v932_v12 = vpop.f32.mrf.mxu0  ;;  %v982_v13 = vpop.f32.mrf.mxu1 }
  0xfb   :  { %891 = vst [vmem:[%s1273_s2 + $0x8] sm:$0xff] %v859_v9   ;;  %v854_v15 = vpack.c.bf16 %v507_v10, %v504_v5  ;;  %v697_v16 = vadd.f32 %v507_v10, %v504_v5  ;;  %v720_v17 = vmul.f32 %v507_v10, %v507_v10 }
  0xfc   :  { %v933_v18 = vpop.f32.mrf.mxu0  ;;  %v519_v19 = vpop.f32.mrf.mxu1 }
  0xfd   :  { %855 = vst [vmem:[%s1273_s2] sm:$0xff] %v854_v15   ;;  %v698_v21 = vadd.f32 %v697_v16, %v512_v4  ;;  %v735_v22 = vadd.f32 %v720_v17, %v719_v14  ;;  %v520_v23 = vadd.f32 %v928_v11, %v519_v19  ;;  %v934_v24 = vadd.f32 %v933_v18, %v932_v12 }
  0xfe   :  { %v935_v25 = vpop.f32.mrf.mxu0  ;;  %v983_v26 = vpop.f32.mrf.mxu1  ;;  %v961_v14 = vadd.f32 %v1231_v57, %v1229_v55  ;;  %v952_v16 = vadd.f32 %v1219_v45, %v1217_v43 }
  0xff   :  { %v736_v28 = vadd.f32 %v735_v22, %v721_v20  ;;  %v699_v29 = vadd.f32 %v698_v21, %v515_v6  ;;  %v723_v34 = vmul.f32 %v520_v23, %v520_v23  ;;  %v528_v37 = vadd.f32 %v982_v13, %v934_v24 }
 0x100   :  { %v936_v31 = vpop.f32.mrf.mxu0  ;;  %v522_v32 = vpop.f32.mrf.mxu1  ;;  %v958_v13 = vadd.f32 %v1227_v53, %v1225_v51  ;;  %v955_v21 = vadd.f32 %v1223_v49, %v1221_v47 }
 0x101   :  { %v700_v33 = vadd.f32 %v699_v29, %v520_v23  ;;  %v737_v35 = vadd.f32 %v736_v28, %v722_v27  ;;  %v937_v36 = vadd.f32 %v936_v31, %v935_v25  ;;  %v523_v38 = vadd.f32 %v931_v30, %v522_v32 }
 0x102   :  { %v938_v39 = vpop.f32.mrf.mxu0  ;;  %v986_v40 = vpop.f32.mrf.mxu1  ;;  %v725_v58 = vmul.f32 %v528_v37, %v528_v37 }
 0x103   :  { %v738_v41 = vadd.f32 %v737_v35, %v723_v34  ;;  %v531_v42 = vadd.f32 %v983_v26, %v937_v36  ;;  %v864_v44 = vpack.c.bf16 %v523_v38, %v520_v23  ;;  %v701_v46 = vadd.f32 %v700_v33, %v523_v38 }
 0x104   :  { %v724_v48 = vmul.f32 %v523_v38, %v523_v38  ;;  %v939_v50 = vpop.f32.mrf.mxu0  ;;  %v535_v52 = vpop.f32.mrf.mxu1 }
 0x105   :  { %v869_v54 = vpack.c.bf16 %v531_v42, %v528_v37  ;;  %v940_v56 = vadd.f32 %v939_v50, %v938_v39  ;;  %892 = vst [vmem:[%s1273_s2 + $0x10] sm:$0xff] %v864_v44   ;;  %v702_v59 = vadd.f32 %v701_v46, %v528_v37  ;;  %v726_v4 = vmul.f32 %v531_v42, %v531_v42 }
 0x106   :  { %v739_v60 = vadd.f32 %v738_v41, %v724_v48  ;;  %v941_v61 = vpop.f32.mrf.mxu0  ;;  %v987_v62 = vpop.f32.mrf.mxu1 }
 0x107   :  { %893 = vst [vmem:[%s1273_s2 + $0x18] sm:$0xff] %v869_v54   ;;  %v536_v0 = vadd.f32 %v940_v56, %v535_v52  ;;  %v703_v5 = vadd.f32 %v702_v59, %v531_v42 }
 0x108   :  { %v740_v63 = vadd.f32 %v739_v60, %v725_v58  ;;  %v942_v1 = vpop.f32.mrf.mxu0  ;;  %v538_v2 = vpop.f32.mrf.mxu1 }
 0x109   :  { %v943_v3 = vadd.f32 %v942_v1, %v941_v61  ;;  %v727_v9 = vmul.f32 %v536_v0, %v536_v0  ;;  %v704_v17 = vadd.f32 %v703_v5, %v536_v0 }
 0x10a   :  { %v944_v6 = vpop.f32.mrf.mxu0  ;;  %v990_v7 = vpop.f32.mrf.mxu1  ;;  %v741_v10 = vadd.f32 %v740_v63, %v726_v4 }
 0x10b   :  { %v539_v8 = vadd.f32 %v943_v3, %v538_v2  ;;  %v560_v51 = vadd.f32 %v990_v7, %v958_v13 }
 0x10c   :  { %v945_v11 = vpop.f32.mrf.mxu0  ;;  %v551_v12 = vpop.f32.mrf.mxu1  ;;  %v742_v23 = vadd.f32 %v741_v10, %v727_v9 }
 0x10d   :  { %v874_v15 = vpack.c.bf16 %v539_v8, %v536_v0  ;;  %v946_v18 = vadd.f32 %v945_v11, %v944_v6  ;;  %v728_v22 = vmul.f32 %v539_v8, %v539_v8  ;;  %v705_v55 = vadd.f32 %v704_v17, %v539_v8 }
 0x10e   :  { %v947_v19 = vpop.f32.mrf.mxu0  ;;  %v991_v20 = vpop.f32.mrf.mxu1  ;;  %v552_v43 = vadd.f32 %v952_v16, %v551_v12  ;;  %v733_v41 = vmul.f32 %v560_v51, %v560_v51 }
 0x10f   :  { %894 = vst [vmem:[%s1273_s2 + $0x20] sm:$0xff] %v874_v15   ;;  %v563_v53 = vadd.f32 %v991_v20, %v961_v14  ;;  %v544_v57 = vadd.f32 %v986_v40, %v946_v18  ;;  %v743_v29 = vadd.f32 %v742_v23, %v728_v22 }
 0x110   :  { %v948_v24 = vpop.f32.mrf.mxu0  ;;  %v554_v25 = vpop.f32.mrf.mxu1  ;;  %v731_v35 = vmul.f32 %v552_v43, %v552_v43 }
 0x111   :  { %v889_v45 = vpack.c.bf16 %v563_v53, %v560_v51  ;;  %v949_v26 = vadd.f32 %v948_v24, %v947_v19  ;;  %v555_v27 = vadd.f32 %v955_v21, %v554_v25  ;;  %v729_v28 = vmul.f32 %v544_v57, %v544_v57 }
 0x112   :  { %v706_v30 = vadd.f32 %v705_v55, %v544_v57  ;;  %v734_v46 = vmul.f32 %v563_v53, %v563_v53 }
 0x113   :  { %897 = vst [vmem:[%s1273_s2 + $0x38] sm:$0xff] %v889_v45   ;;  %v547_v47 = vadd.f32 %v987_v62, %v949_v26  ;;  %v884_v49 = vpack.c.bf16 %v555_v27, %v552_v43  ;;  %v744_v31 = vadd.f32 %v743_v29, %v729_v28  ;;  %v732_v39 = vmul.f32 %v555_v27, %v555_v27 }
 0x115   :  { %v879_v32 = vpack.c.bf16 %v547_v47, %v544_v57  ;;  %v707_v33 = vadd.f32 %v706_v30, %v547_v47  ;;  %v730_v34 = vmul.f32 %v547_v47, %v547_v47  ;;  %896 = vst [vmem:[%s1273_s2 + $0x30] sm:$0xff] %v884_v49  }
 0x117   :  { %895 = vst [vmem:[%s1273_s2 + $0x28] sm:$0xff] %v879_v32   ;;  %v745_v36 = vadd.f32 %v744_v31, %v730_v34  ;;  %v708_v37 = vadd.f32 %v707_v33, %v552_v43 }
 0x119   :  { %v709_v38 = vadd.f32 %v708_v37, %v555_v27  ;;  %v746_v40 = vadd.f32 %v745_v36, %v731_v35 }
 0x11b   :  { %v710_v42 = vadd.f32 %v709_v38, %v560_v51  ;;  %v747_v44 = vadd.f32 %v746_v40, %v732_v39 }
 0x11d   :  { %v711_v48 = vadd.f32 %v710_v42, %v563_v53  ;;  %v748_v50 = vadd.f32 %v747_v44, %v733_v41 }
 0x11f   :  { %v712_v52 = vrot.slane %v711_v48, 4  ;;  %v749_v54 = vadd.f32 %v748_v50, %v734_v46 }
 0x121   :  { %v713_v56 = vadd.f32 %v712_v52, %v711_v48  ;;  %v750_v58 = vrot.slane %v749_v54, 4 }
 0x123   :  { %v714_v59 = vrot.slane %v713_v56, 2  ;;  %v751_v60 = vadd.f32 %v750_v58, %v749_v54 }
 0x125   :  { %v715_v61 = vadd.f32 %v714_v59, %v713_v56  ;;  %v752_v62 = vrot.slane %v751_v60, 2 }
 0x127   :  { %v716_v63 = vrot.slane %v715_v61, 1  ;;  %v753_v0 = vadd.f32 %v752_v62, %v751_v60 }
 0x129   :  { %v717_v1 = vadd.f32 %v716_v63, %v715_v61  ;;  %v754_v2 = vrot.slane %v753_v0, 1 }
 0x12b   :  { %718 = vst [vmem:[%s1274_s3] sm:$0x1] %v717_v1  ;;  %v755_v3 = vadd.f32 %v754_v2, %v753_v0 }
 0x12d   :  { %756 = vst [vmem:[%s1275_s4] sm:$0x1] %v755_v3 }

// kernel: netG64_forward.14
= control target key start
LH: loop header
LB: loop body
LE: loop exit
PB: predicated region body
PF: predicated region fallthrough
CT: control target
= control target key end

     0   :  { %s422_s0 = inlined_call_operand.vmem [shape: bf16[128,128], index: 0, kind: input, shape index: {}]   ;;  %s423_s1 = inlined_call_operand.vmem [shape: f32[1,128], index: 1, kind: input, shape index: {}]   ;;  %s424_s2 = inlined_call_operand.vmem [shape: f32[1,128], index: 2, kind: input, shape index: {}]   ;;  %s425_s3 = inlined_call_operand.vmem [shape: bf16[128,128], index: 3, kind: output, shape index: {}]  }
   0x1   :  { %v227_v0 = vld [vmem:[%s422_s0] sm:$0xff]   ;;  %v298_v4 = vld [vmem:[%s422_s0 + $0x8] sm:$0xff]   ;;  %v299_v5 = vld [vmem:[%s422_s0 + $0x10] sm:$0xff]  }
   0x2   :  { %v338_v1 = vld [vmem:[%s423_s1] ss:$0 sm:$0xff]  ;;  %v228_v2 = vunpack.c.l.bf16 %v227_v0  ;;  %v229_v3 = vunpack.c.h.bf16 %v227_v0  ;;  %v300_v6 = vld [vmem:[%s422_s0 + $0x18] sm:$0xff]   ;;  %v232_v8 = vunpack.c.l.bf16 %v298_v4  ;;  %v233_v9 = vunpack.c.h.bf16 %v298_v4  ;;  %v302_v33 = vld [vmem:[%s422_s0 + $0x28] sm:$0xff]  }
   0x3   :  { %v352_v7 = vld [vmem:[%s424_s2] ss:$0 sm:$0xff]  ;;  %v236_v10 = vunpack.c.l.bf16 %v299_v5  ;;  %v237_v11 = vunpack.c.h.bf16 %v299_v5  ;;  %v240_v14 = vunpack.c.l.bf16 %v300_v6  ;;  %v241_v15 = vunpack.c.h.bf16 %v300_v6  ;;  %v303_v38 = vld [vmem:[%s422_s0 + $0x30] sm:$0xff]   ;;  %v304_v43 = vld [vmem:[%s422_s0 + $0x38] sm:$0xff]  }
   0x4   :  { %v53_v12 = vmul.f32 %v228_v2, %v338_v1  ;;  %v54_v13 = vmul.f32 %v229_v3, %v338_v1  ;;  %v55_v16 = vmul.f32 %v232_v8, %v338_v1  ;;  %v56_v17 = vmul.f32 %v233_v9, %v338_v1  ;;  %v301_v28 = vld [vmem:[%s422_s0 + $0x20] sm:$0xff]  }
   0x5   :  { %v57_v18 = vmul.f32 %v236_v10, %v338_v1  ;;  %v58_v19 = vmul.f32 %v237_v11, %v338_v1  ;;  %v59_v22 = vmul.f32 %v240_v14, %v338_v1  ;;  %v60_v23 = vmul.f32 %v241_v15, %v338_v1 }
   0x6   :  { %v76_v20 = vadd.f32 %v352_v7, %v53_v12  ;;  %v77_v21 = vadd.f32 %v352_v7, %v54_v13  ;;  %v78_v24 = vadd.f32 %v352_v7, %v55_v16  ;;  %v79_v25 = vadd.f32 %v352_v7, %v56_v17 }
   0x7   :  { %v80_v26 = vadd.f32 %v352_v7, %v57_v18  ;;  %v81_v27 = vadd.f32 %v352_v7, %v58_v19  ;;  %v82_v31 = vadd.f32 %v352_v7, %v59_v22  ;;  %v83_v32 = vadd.f32 %v352_v7, %v60_v23 }
   0x8   :  { %v92_v29 = vmax.f32 %v76_v20, 0.0  ;;  %v93_v30 = vmax.f32 %v77_v21, 0.0  ;;  %v94_v34 = vmax.f32 %v78_v24, 0.0  ;;  %v95_v35 = vmax.f32 %v79_v25, 0.0 }
   0x9   :  { %v96_v36 = vmax.f32 %v80_v26, 0.0  ;;  %v97_v37 = vmax.f32 %v81_v27, 0.0  ;;  %v98_v40 = vmax.f32 %v82_v31, 0.0  ;;  %v99_v41 = vmax.f32 %v83_v32, 0.0 }
   0xa   :  { %v261_v39 = vpack.c.bf16 %v93_v30, %v92_v29  ;;  %v244_v42 = vunpack.c.l.bf16 %v301_v28  ;;  %v266_v44 = vpack.c.bf16 %v95_v35, %v94_v34  ;;  %v245_v46 = vunpack.c.h.bf16 %v301_v28 }
   0xb   :  { %v271_v45 = vpack.c.bf16 %v97_v37, %v96_v36  ;;  %v248_v47 = vunpack.c.l.bf16 %v302_v33  ;;  %v276_v48 = vpack.c.bf16 %v99_v41, %v98_v40  ;;  %v249_v50 = vunpack.c.h.bf16 %v302_v33 }
   0xc   :  { %262 = vst [vmem:[%s425_s3] sm:$0xff] %v261_v39   ;;  %v61_v49 = vmul.f32 %v244_v42, %v338_v1  ;;  %v252_v51 = vunpack.c.l.bf16 %v303_v38  ;;  %305 = vst [vmem:[%s425_s3 + $0x8] sm:$0xff] %v266_v44   ;;  %v62_v52 = vmul.f32 %v245_v46, %v338_v1  ;;  %v253_v54 = vunpack.c.h.bf16 %v303_v38 }
   0xd   :  { %306 = vst [vmem:[%s425_s3 + $0x10] sm:$0xff] %v271_v45   ;;  %v63_v53 = vmul.f32 %v248_v47, %v338_v1  ;;  %v256_v55 = vunpack.c.l.bf16 %v304_v43  ;;  %307 = vst [vmem:[%s425_s3 + $0x18] sm:$0xff] %v276_v48   ;;  %v64_v57 = vmul.f32 %v249_v50, %v338_v1  ;;  %v257_v59 = vunpack.c.h.bf16 %v304_v43 }
   0xe   :  { %v84_v56 = vadd.f32 %v352_v7, %v61_v49  ;;  %v65_v58 = vmul.f32 %v252_v51, %v338_v1  ;;  %v85_v60 = vadd.f32 %v352_v7, %v62_v52  ;;  %v66_v62 = vmul.f32 %v253_v54, %v338_v1 }
   0xf   :  { %v86_v61 = vadd.f32 %v352_v7, %v63_v53  ;;  %v67_v63 = vmul.f32 %v256_v55, %v338_v1  ;;  %v87_v2 = vadd.f32 %v352_v7, %v64_v57  ;;  %v68_v4 = vmul.f32 %v257_v59, %v338_v1 }
  0x10   :  { %v100_v0 = vmax.f32 %v84_v56, 0.0  ;;  %v88_v3 = vadd.f32 %v352_v7, %v65_v58  ;;  %v101_v5 = vmax.f32 %v85_v60, 0.0  ;;  %v89_v8 = vadd.f32 %v352_v7, %v66_v62 }
  0x11   :  { %v102_v6 = vmax.f32 %v86_v61, 0.0  ;;  %v90_v9 = vadd.f32 %v352_v7, %v67_v63  ;;  %v103_v10 = vmax.f32 %v87_v2, 0.0  ;;  %v91_v12 = vadd.f32 %v352_v7, %v68_v4 }
  0x12   :  { %v104_v11 = vmax.f32 %v88_v3, 0.0  ;;  %v281_v13 = vpack.c.bf16 %v101_v5, %v100_v0  ;;  %v105_v14 = vmax.f32 %v89_v8, 0.0 }
  0x13   :  { %v106_v15 = vmax.f32 %v90_v9, 0.0  ;;  %v286_v16 = vpack.c.bf16 %v103_v10, %v102_v6  ;;  %v107_v17 = vmax.f32 %v91_v12, 0.0 }
  0x14   :  { %308 = vst [vmem:[%s425_s3 + $0x20] sm:$0xff] %v281_v13   ;;  %v291_v1 = vpack.c.bf16 %v105_v14, %v104_v11 }
  0x15   :  { %309 = vst [vmem:[%s425_s3 + $0x28] sm:$0xff] %v286_v16   ;;  %v296_v18 = vpack.c.bf16 %v107_v17, %v106_v15 }
  0x16   :  { %310 = vst [vmem:[%s425_s3 + $0x30] sm:$0xff] %v291_v1  }
  0x17   :  { %311 = vst [vmem:[%s425_s3 + $0x38] sm:$0xff] %v296_v18  }

// kernel: tile.78
= control target key start
LH: loop header
LB: loop body
LE: loop exit
PB: predicated region body
PF: predicated region fallthrough
CT: control target
= control target key end

     0   :  { %s22_s0 = inlined_call_operand.vmem [shape: f32[8], index: 0, kind: input, shape index: {}]   ;;  %s23_s1 = inlined_call_operand.vmem [shape: f32[4,8], index: 1, kind: output, shape index: {}]  }
   0x1   :  { %v4_v0 = vld [vmem:[%s22_s0] ss:$0 sm:$0xff] }
   0x2   :  { %5 = vst [vmem:[%s23_s1] sm:$0xf] %v4_v0 }

// kernel: tile.79
= control target key start
LH: loop header
LB: loop body
LE: loop exit
PB: predicated region body
PF: predicated region fallthrough
CT: control target
= control target key end

     0   :  { %vm8_vm0 = vcmask 64512   ;;  %s40_s8 = smov 8   ;;  %s41_s9 = smov 16   ;;  %vm14_vm1 = vcmask 261312   ;;  %vm20_vm2 = vcmask 195712   ;;  %vm26_vm3 = vcmask 130112   ;;  %s58_s0 = inlined_call_operand.vmem [shape: f32[4,8], index: 0, kind: input, shape index: {}]   ;;  %s59_s1 = inlined_call_operand.vmem [shape: f32[32], index: 1, kind: output, shape index: {}]  }
   0x1   :  { %v5_v0 = vld [vmem:[%s58_s0] sm:$0xf]  ;;  %s39_s0 = smov 24  }
   0x2   :  { %6 = vst [vmem:[#allocation1] sm:$0xf] %v5_v0 }
   0x9   :  { %v11_v1 = vld [vmem:[#allocation1 + $0x3] sm:$0x1]   ;;  %v23_v2 = vld [vmem:[#allocation1 + $0x1] sm:$0x1]   ;;  %v7_v3 = vld [vmem:[#allocation1] sm:$0x1]  }
   0xa   :  { %12 = vrot.lane.b32.xlu0 %v11_v1, %s39_s0  ;;  %24 = vrot.lane.b32.xlu1 %v23_v2, %s40_s8  ;;  %v17_v4 = vld [vmem:[#allocation1 + $0x2] sm:$0x1]   ;;  %9 = vst.msk [vmem:[#allocation0] sm:$0x1] %vm8_vm0, %v7_v3  }
   0xe   :  { %18 = vrot.lane.b32.xlu0 %v17_v4, %s41_s9 }
  0x7c   :  { %v13_v5 = vpop.permute.xlu0 %12   ;;  %v25_v6 = vpop.permute.xlu1 %24  }
  0x7d   :  { %15 = vst.msk [vmem:[#allocation0] sm:$0x1] %vm14_vm1, %v13_v5  }
  0x80   :  { %v19_v7 = vpop.permute.xlu0 %18  }
  0x81   :  { %21 = vst.msk [vmem:[#allocation0] sm:$0x1] %vm20_vm2, %v19_v7  }
  0x82   :  { %27 = vst.msk [vmem:[#allocation0] sm:$0x1] %vm26_vm3, %v25_v6  }
  0x89   :  { %v32_v8 = vld [vmem:[#allocation0] sm:$0x1] }
  0x8a   :  { %35 = vst [vmem:[%s59_s1] sm:$0x1] %v32_v8 }

// kernel: netG64_forward.16
= control target key start
LH: loop header
LB: loop body
LE: loop exit
PB: predicated region body
PF: predicated region fallthrough
CT: control target
= control target key end

     0   :  { %s1502_s0 = inlined_call_operand.vmem [shape: bf16[512,128], index: 0, kind: input, shape index: {}]   ;;  %s1503_s1 = inlined_call_operand.vmem [shape: f32[1,128], index: 1, kind: input, shape index: {}]   ;;  %s1504_s2 = inlined_call_operand.vmem [shape: f32[1,128], index: 2, kind: input, shape index: {}]   ;;  %s1505_s3 = inlined_call_operand.vmem [shape: bf16[512,128], index: 3, kind: output, shape index: {}]  }
   0x1   :  { %v803_v0 = vld [vmem:[%s1502_s0] sm:$0xff]   ;;  %v1090_v4 = vld [vmem:[%s1502_s0 + $0x8] sm:$0xff]   ;;  %v1091_v5 = vld [vmem:[%s1502_s0 + $0x10] sm:$0xff]  }
   0x2   :  { %v1178_v1 = vld [vmem:[%s1503_s1] ss:$0 sm:$0xff]  ;;  %v804_v2 = vunpack.c.l.bf16 %v803_v0  ;;  %v805_v3 = vunpack.c.h.bf16 %v803_v0  ;;  %v1092_v6 = vld [vmem:[%s1502_s0 + $0x18] sm:$0xff]   ;;  %v808_v8 = vunpack.c.l.bf16 %v1090_v4  ;;  %v809_v9 = vunpack.c.h.bf16 %v1090_v4  ;;  %v1094_v33 = vld [vmem:[%s1502_s0 + $0x28] sm:$0xff]  }
   0x3   :  { %v1192_v7 = vld [vmem:[%s1504_s2] ss:$0 sm:$0xff]  ;;  %v812_v10 = vunpack.c.l.bf16 %v1091_v5  ;;  %v813_v11 = vunpack.c.h.bf16 %v1091_v5  ;;  %v816_v14 = vunpack.c.l.bf16 %v1092_v6  ;;  %v817_v15 = vunpack.c.h.bf16 %v1092_v6  ;;  %v1095_v38 = vld [vmem:[%s1502_s0 + $0x30] sm:$0xff]   ;;  %v1096_v43 = vld [vmem:[%s1502_s0 + $0x38] sm:$0xff]  }
   0x4   :  { %v149_v12 = vmul.f32 %v804_v2, %v1178_v1  ;;  %v150_v13 = vmul.f32 %v805_v3, %v1178_v1  ;;  %v151_v16 = vmul.f32 %v808_v8, %v1178_v1  ;;  %v152_v17 = vmul.f32 %v809_v9, %v1178_v1  ;;  %v1093_v28 = vld [vmem:[%s1502_s0 + $0x20] sm:$0xff]  }
   0x5   :  { %v153_v18 = vmul.f32 %v812_v10, %v1178_v1  ;;  %v154_v19 = vmul.f32 %v813_v11, %v1178_v1  ;;  %v155_v22 = vmul.f32 %v816_v14, %v1178_v1  ;;  %v156_v23 = vmul.f32 %v817_v15, %v1178_v1  ;;  %v1097_v0 = vld [vmem:[%s1502_s0 + $0x40] sm:$0xff]   ;;  %v1098_v11 = vld [vmem:[%s1502_s0 + $0x48] sm:$0xff]  }
   0x6   :  { %v220_v20 = vadd.f32 %v1192_v7, %v149_v12  ;;  %v221_v21 = vadd.f32 %v1192_v7, %v150_v13  ;;  %v222_v24 = vadd.f32 %v1192_v7, %v151_v16  ;;  %v223_v25 = vadd.f32 %v1192_v7, %v152_v17  ;;  %v1099_v16 = vld [vmem:[%s1502_s0 + $0x50] sm:$0xff]  }
   0x7   :  { %v224_v26 = vadd.f32 %v1192_v7, %v153_v18  ;;  %v225_v27 = vadd.f32 %v1192_v7, %v154_v19  ;;  %v226_v31 = vadd.f32 %v1192_v7, %v155_v22  ;;  %v227_v32 = vadd.f32 %v1192_v7, %v156_v23 }
   0x8   :  { %v284_v29 = vmax.f32 %v220_v20, 0.0  ;;  %v285_v30 = vmax.f32 %v221_v21, 0.0  ;;  %v286_v34 = vmax.f32 %v222_v24, 0.0  ;;  %v287_v35 = vmax.f32 %v223_v25, 0.0  ;;  %v1100_v25 = vld [vmem:[%s1502_s0 + $0x58] sm:$0xff]  }
   0x9   :  { %v288_v36 = vmax.f32 %v224_v26, 0.0  ;;  %v289_v37 = vmax.f32 %v225_v27, 0.0  ;;  %v290_v40 = vmax.f32 %v226_v31, 0.0  ;;  %v291_v41 = vmax.f32 %v227_v32, 0.0 }
   0xa   :  { %v933_v39 = vpack.c.bf16 %v285_v30, %v284_v29  ;;  %v820_v42 = vunpack.c.l.bf16 %v1093_v28  ;;  %v938_v44 = vpack.c.bf16 %v287_v35, %v286_v34  ;;  %v821_v46 = vunpack.c.h.bf16 %v1093_v28 }
   0xb   :  { %v943_v45 = vpack.c.bf16 %v289_v37, %v288_v36  ;;  %v824_v47 = vunpack.c.l.bf16 %v1094_v33  ;;  %v948_v48 = vpack.c.bf16 %v291_v41, %v290_v40  ;;  %v825_v50 = vunpack.c.h.bf16 %v1094_v33 }
   0xc   :  { %934 = vst [vmem:[%s1505_s3] sm:$0xff] %v933_v39   ;;  %v157_v49 = vmul.f32 %v820_v42, %v1178_v1  ;;  %v828_v51 = vunpack.c.l.bf16 %v1095_v38  ;;  %1121 = vst [vmem:[%s1505_s3 + $0x8] sm:$0xff] %v938_v44   ;;  %v158_v52 = vmul.f32 %v821_v46, %v1178_v1  ;;  %v829_v54 = vunpack.c.h.bf16 %v1095_v38  ;;  %v1101_v38 = vld [vmem:[%s1502_s0 + $0x60] sm:$0xff]  }
   0xd   :  { %1122 = vst [vmem:[%s1505_s3 + $0x10] sm:$0xff] %v943_v45   ;;  %v159_v53 = vmul.f32 %v824_v47, %v1178_v1  ;;  %v832_v55 = vunpack.c.l.bf16 %v1096_v43  ;;  %1123 = vst [vmem:[%s1505_s3 + $0x18] sm:$0xff] %v948_v48   ;;  %v160_v57 = vmul.f32 %v825_v50, %v1178_v1  ;;  %v833_v59 = vunpack.c.h.bf16 %v1096_v43 }
   0xe   :  { %v228_v56 = vadd.f32 %v1192_v7, %v157_v49  ;;  %v161_v58 = vmul.f32 %v828_v51, %v1178_v1  ;;  %v229_v60 = vadd.f32 %v1192_v7, %v158_v52  ;;  %v162_v62 = vmul.f32 %v829_v54, %v1178_v1  ;;  %v1102_v51 = vld [vmem:[%s1502_s0 + $0x68] sm:$0xff]  }
   0xf   :  { %v230_v61 = vadd.f32 %v1192_v7, %v159_v53  ;;  %v163_v63 = vmul.f32 %v832_v55, %v1178_v1  ;;  %v231_v3 = vadd.f32 %v1192_v7, %v160_v57  ;;  %v164_v5 = vmul.f32 %v833_v59, %v1178_v1 }
  0x10   :  { %v292_v2 = vmax.f32 %v228_v56, 0.0  ;;  %v232_v4 = vadd.f32 %v1192_v7, %v161_v58  ;;  %v293_v6 = vmax.f32 %v229_v60, 0.0  ;;  %v233_v9 = vadd.f32 %v1192_v7, %v162_v62  ;;  %v1103_v60 = vld [vmem:[%s1502_s0 + $0x70] sm:$0xff]  }
  0x11   :  { %v294_v8 = vmax.f32 %v230_v61, 0.0  ;;  %v234_v10 = vadd.f32 %v1192_v7, %v163_v63  ;;  %v295_v12 = vmax.f32 %v231_v3, 0.0  ;;  %v235_v14 = vadd.f32 %v1192_v7, %v164_v5 }
  0x12   :  { %v296_v13 = vmax.f32 %v232_v4, 0.0  ;;  %v836_v15 = vunpack.c.l.bf16 %v1097_v0  ;;  %v953_v17 = vpack.c.bf16 %v293_v6, %v292_v2  ;;  %v297_v18 = vmax.f32 %v233_v9, 0.0  ;;  %v1104_v2 = vld [vmem:[%s1502_s0 + $0x78] sm:$0xff]  }
  0x13   :  { %v298_v19 = vmax.f32 %v234_v10, 0.0  ;;  %v837_v20 = vunpack.c.h.bf16 %v1097_v0  ;;  %v958_v21 = vpack.c.bf16 %v295_v12, %v294_v8  ;;  %v299_v22 = vmax.f32 %v235_v14, 0.0  ;;  %v1105_v12 = vld [vmem:[%s1502_s0 + $0x80] sm:$0xff]  }
  0x14   :  { %v165_v23 = vmul.f32 %v836_v15, %v1178_v1  ;;  %v840_v24 = vunpack.c.l.bf16 %v1098_v11  ;;  %1124 = vst [vmem:[%s1505_s3 + $0x20] sm:$0xff] %v953_v17   ;;  %v963_v26 = vpack.c.bf16 %v297_v18, %v296_v13  ;;  %v841_v28 = vunpack.c.h.bf16 %v1098_v11 }
  0x15   :  { %v166_v27 = vmul.f32 %v837_v20, %v1178_v1  ;;  %v844_v29 = vunpack.c.l.bf16 %v1099_v16  ;;  %1125 = vst [vmem:[%s1505_s3 + $0x28] sm:$0xff] %v958_v21   ;;  %v968_v30 = vpack.c.bf16 %v299_v22, %v298_v19  ;;  %v845_v33 = vunpack.c.h.bf16 %v1099_v16 }
  0x16   :  { %v236_v31 = vadd.f32 %v1192_v7, %v165_v23  ;;  %v167_v32 = vmul.f32 %v840_v24, %v1178_v1  ;;  %1126 = vst [vmem:[%s1505_s3 + $0x30] sm:$0xff] %v963_v26   ;;  %v168_v35 = vmul.f32 %v841_v28, %v1178_v1  ;;  %v848_v37 = vunpack.c.l.bf16 %v1100_v25 }
  0x17   :  { %v237_v34 = vadd.f32 %v1192_v7, %v166_v27  ;;  %v169_v36 = vmul.f32 %v844_v29, %v1178_v1  ;;  %1127 = vst [vmem:[%s1505_s3 + $0x38] sm:$0xff] %v968_v30   ;;  %v170_v41 = vmul.f32 %v845_v33, %v1178_v1  ;;  %v849_v42 = vunpack.c.h.bf16 %v1100_v25  ;;  %v1106_v29 = vld [vmem:[%s1502_s0 + $0x88] sm:$0xff]  }
  0x18   :  { %v300_v39 = vmax.f32 %v236_v31, 0.0  ;;  %v238_v40 = vadd.f32 %v1192_v7, %v167_v32  ;;  %v239_v44 = vadd.f32 %v1192_v7, %v168_v35  ;;  %v171_v46 = vmul.f32 %v848_v37, %v1178_v1 }
  0x19   :  { %v301_v43 = vmax.f32 %v237_v34, 0.0  ;;  %v240_v45 = vadd.f32 %v1192_v7, %v169_v36  ;;  %v241_v48 = vadd.f32 %v1192_v7, %v170_v41  ;;  %v172_v49 = vmul.f32 %v849_v42, %v1178_v1  ;;  %v1107_v34 = vld [vmem:[%s1502_s0 + $0x90] sm:$0xff]  }
  0x1a   :  { %v302_v47 = vmax.f32 %v238_v40, 0.0  ;;  %v852_v50 = vunpack.c.l.bf16 %v1101_v38  ;;  %v303_v53 = vmax.f32 %v239_v44, 0.0  ;;  %v242_v55 = vadd.f32 %v1192_v7, %v171_v46 }
  0x1b   :  { %v973_v52 = vpack.c.bf16 %v301_v43, %v300_v39  ;;  %v304_v54 = vmax.f32 %v240_v45, 0.0  ;;  %v305_v56 = vmax.f32 %v241_v48, 0.0  ;;  %v243_v57 = vadd.f32 %v1192_v7, %v172_v49  ;;  %v1108_v43 = vld [vmem:[%s1502_s0 + $0x98] sm:$0xff]  }
  0x1c   :  { %v853_v58 = vunpack.c.h.bf16 %v1101_v38  ;;  %v173_v59 = vmul.f32 %v852_v50, %v1178_v1  ;;  %v978_v61 = vpack.c.bf16 %v303_v53, %v302_v47  ;;  %v306_v62 = vmax.f32 %v242_v55, 0.0 }
  0x1d   :  { %1128 = vst [vmem:[%s1505_s3 + $0x40] sm:$0xff] %v973_v52   ;;  %v856_v63 = vunpack.c.l.bf16 %v1102_v51  ;;  %v857_v0 = vunpack.c.h.bf16 %v1102_v51  ;;  %v983_v3 = vpack.c.bf16 %v305_v56, %v304_v54  ;;  %v307_v4 = vmax.f32 %v243_v57, 0.0  ;;  %v1109_v56 = vld [vmem:[%s1502_s0 + $0xa0] sm:$0xff]  }
  0x1e   :  { %v174_v5 = vmul.f32 %v853_v58, %v1178_v1  ;;  %v244_v6 = vadd.f32 %v1192_v7, %v173_v59  ;;  %1129 = vst [vmem:[%s1505_s3 + $0x48] sm:$0xff] %v978_v61   ;;  %v860_v10 = vunpack.c.l.bf16 %v1103_v60  ;;  %v861_v11 = vunpack.c.h.bf16 %v1103_v60 }
  0x1f   :  { %v175_v8 = vmul.f32 %v856_v63, %v1178_v1  ;;  %v176_v9 = vmul.f32 %v857_v0, %v1178_v1  ;;  %1130 = vst [vmem:[%s1505_s3 + $0x50] sm:$0xff] %v983_v3   ;;  %v988_v13 = vpack.c.bf16 %v307_v4, %v306_v62  ;;  %v864_v16 = vunpack.c.l.bf16 %v1104_v2 }
  0x20   :  { %v245_v14 = vadd.f32 %v1192_v7, %v174_v5  ;;  %v308_v15 = vmax.f32 %v244_v6, 0.0  ;;  %v177_v19 = vmul.f32 %v860_v10, %v1178_v1  ;;  %v178_v20 = vmul.f32 %v861_v11, %v1178_v1 }
  0x21   :  { %v246_v17 = vadd.f32 %v1192_v7, %v175_v8  ;;  %v247_v18 = vadd.f32 %v1192_v7, %v176_v9  ;;  %1131 = vst [vmem:[%s1505_s3 + $0x58] sm:$0xff] %v988_v13   ;;  %v865_v22 = vunpack.c.h.bf16 %v1104_v2  ;;  %v179_v23 = vmul.f32 %v864_v16, %v1178_v1  ;;  %v1110_v2 = vld [vmem:[%s1502_s0 + $0xa8] sm:$0xff]   ;;  %v1111_v16 = vld [vmem:[%s1502_s0 + $0xb0] sm:$0xff]  }
  0x22   :  { %v309_v21 = vmax.f32 %v245_v14, 0.0  ;;  %v868_v24 = vunpack.c.l.bf16 %v1105_v12  ;;  %v248_v27 = vadd.f32 %v1192_v7, %v177_v19  ;;  %v249_v28 = vadd.f32 %v1192_v7, %v178_v20 }
  0x23   :  { %v310_v25 = vmax.f32 %v246_v17, 0.0  ;;  %v311_v26 = vmax.f32 %v247_v18, 0.0  ;;  %v180_v31 = vmul.f32 %v865_v22, %v1178_v1  ;;  %v250_v32 = vadd.f32 %v1192_v7, %v179_v23 }
  0x24   :  { %v993_v30 = vpack.c.bf16 %v309_v21, %v308_v15  ;;  %v869_v33 = vunpack.c.h.bf16 %v1105_v12  ;;  %v312_v36 = vmax.f32 %v248_v27, 0.0  ;;  %v313_v37 = vmax.f32 %v249_v28, 0.0  ;;  %v1112_v21 = vld [vmem:[%s1502_s0 + $0xb8] sm:$0xff]  }
  0x25   :  { %v998_v35 = vpack.c.bf16 %v311_v26, %v310_v25  ;;  %v181_v38 = vmul.f32 %v868_v24, %v1178_v1  ;;  %v251_v39 = vadd.f32 %v1192_v7, %v180_v31  ;;  %v314_v40 = vmax.f32 %v250_v32, 0.0 }
  0x26   :  { %1132 = vst [vmem:[%s1505_s3 + $0x60] sm:$0xff] %v993_v30   ;;  %v182_v41 = vmul.f32 %v869_v33, %v1178_v1  ;;  %v872_v42 = vunpack.c.l.bf16 %v1106_v29  ;;  %v1003_v44 = vpack.c.bf16 %v313_v37, %v312_v36  ;;  %v873_v46 = vunpack.c.h.bf16 %v1106_v29 }
  0x27   :  { %1133 = vst [vmem:[%s1505_s3 + $0x68] sm:$0xff] %v998_v35   ;;  %v252_v45 = vadd.f32 %v1192_v7, %v181_v38  ;;  %v876_v47 = vunpack.c.l.bf16 %v1107_v34  ;;  %v315_v48 = vmax.f32 %v251_v39, 0.0  ;;  %v877_v51 = vunpack.c.h.bf16 %v1107_v34  ;;  %v1113_v34 = vld [vmem:[%s1502_s0 + $0xc0] sm:$0xff]  }
  0x28   :  { %v253_v49 = vadd.f32 %v1192_v7, %v182_v41  ;;  %v183_v50 = vmul.f32 %v872_v42, %v1178_v1  ;;  %1134 = vst [vmem:[%s1505_s3 + $0x70] sm:$0xff] %v1003_v44   ;;  %v184_v53 = vmul.f32 %v873_v46, %v1178_v1  ;;  %v880_v55 = vunpack.c.l.bf16 %v1108_v43 }
  0x29   :  { %v316_v52 = vmax.f32 %v252_v45, 0.0  ;;  %v185_v54 = vmul.f32 %v876_v47, %v1178_v1  ;;  %v1008_v57 = vpack.c.bf16 %v315_v48, %v314_v40  ;;  %v186_v60 = vmul.f32 %v877_v51, %v1178_v1  ;;  %v1114_v47 = vld [vmem:[%s1502_s0 + $0xc8] sm:$0xff]  }
  0x2a   :  { %v317_v58 = vmax.f32 %v253_v49, 0.0  ;;  %v254_v59 = vadd.f32 %v1192_v7, %v183_v50  ;;  %v255_v61 = vadd.f32 %v1192_v7, %v184_v53  ;;  %v881_v63 = vunpack.c.h.bf16 %v1108_v43 }
  0x2b   :  { %v256_v62 = vadd.f32 %v1192_v7, %v185_v54  ;;  %v187_v0 = vmul.f32 %v880_v55, %v1178_v1  ;;  %1135 = vst [vmem:[%s1505_s3 + $0x78] sm:$0xff] %v1008_v57   ;;  %v257_v5 = vadd.f32 %v1192_v7, %v186_v60  ;;  %v884_v6 = vunpack.c.l.bf16 %v1109_v56 }
  0x2c   :  { %v1013_v3 = vpack.c.bf16 %v317_v58, %v316_v52  ;;  %v318_v4 = vmax.f32 %v254_v59, 0.0  ;;  %v319_v8 = vmax.f32 %v255_v61, 0.0  ;;  %v188_v10 = vmul.f32 %v881_v63, %v1178_v1  ;;  %v1115_v52 = vld [vmem:[%s1502_s0 + $0xd0] sm:$0xff]   ;;  %v1116_v61 = vld [vmem:[%s1502_s0 + $0xd8] sm:$0xff]  }
  0x2d   :  { %v320_v9 = vmax.f32 %v256_v62, 0.0  ;;  %v258_v11 = vadd.f32 %v1192_v7, %v187_v0  ;;  %v321_v12 = vmax.f32 %v257_v5, 0.0  ;;  %v885_v13 = vunpack.c.h.bf16 %v1109_v56 }
  0x2e   :  { %1136 = vst [vmem:[%s1505_s3 + $0x80] sm:$0xff] %v1013_v3   ;;  %v189_v14 = vmul.f32 %v884_v6, %v1178_v1  ;;  %v888_v15 = vunpack.c.l.bf16 %v1110_v2  ;;  %v1018_v17 = vpack.c.bf16 %v319_v8, %v318_v4  ;;  %v259_v18 = vadd.f32 %v1192_v7, %v188_v10 }
  0x2f   :  { %v322_v19 = vmax.f32 %v258_v11, 0.0  ;;  %v889_v20 = vunpack.c.h.bf16 %v1110_v2  ;;  %v1023_v22 = vpack.c.bf16 %v321_v12, %v320_v9  ;;  %v190_v23 = vmul.f32 %v885_v13, %v1178_v1  ;;  %v1117_v12 = vld [vmem:[%s1502_s0 + $0xe0] sm:$0xff]  }
  0x30   :  { %v260_v24 = vadd.f32 %v1192_v7, %v189_v14  ;;  %v191_v25 = vmul.f32 %v888_v15, %v1178_v1  ;;  %1137 = vst [vmem:[%s1505_s3 + $0x88] sm:$0xff] %v1018_v17   ;;  %v323_v26 = vmax.f32 %v259_v18, 0.0  ;;  %v892_v28 = vunpack.c.l.bf16 %v1111_v16 }
  0x31   :  { %v192_v27 = vmul.f32 %v889_v20, %v1178_v1  ;;  %v893_v29 = vunpack.c.h.bf16 %v1111_v16  ;;  %1138 = vst [vmem:[%s1505_s3 + $0x90] sm:$0xff] %v1023_v22   ;;  %v261_v30 = vadd.f32 %v1192_v7, %v190_v23  ;;  %v896_v33 = vunpack.c.l.bf16 %v1112_v21 }
  0x32   :  { %v324_v31 = vmax.f32 %v260_v24, 0.0  ;;  %v262_v32 = vadd.f32 %v1192_v7, %v191_v25  ;;  %v1028_v35 = vpack.c.bf16 %v323_v26, %v322_v19  ;;  %v193_v37 = vmul.f32 %v892_v28, %v1178_v1 }
  0x33   :  { %v263_v36 = vadd.f32 %v1192_v7, %v192_v27  ;;  %v194_v38 = vmul.f32 %v893_v29, %v1178_v1  ;;  %v325_v39 = vmax.f32 %v261_v30, 0.0  ;;  %v897_v41 = vunpack.c.h.bf16 %v1112_v21  ;;  %v1118_v21 = vld [vmem:[%s1502_s0 + $0xe8] sm:$0xff]  }
  0x34   :  { %v326_v40 = vmax.f32 %v262_v32, 0.0  ;;  %v195_v42 = vmul.f32 %v896_v33, %v1178_v1  ;;  %1139 = vst [vmem:[%s1505_s3 + $0x98] sm:$0xff] %v1028_v35   ;;  %v264_v44 = vadd.f32 %v1192_v7, %v193_v37  ;;  %v900_v46 = vunpack.c.l.bf16 %v1113_v34 }
  0x35   :  { %v327_v43 = vmax.f32 %v263_v36, 0.0  ;;  %v265_v45 = vadd.f32 %v1192_v7, %v194_v38  ;;  %v1033_v48 = vpack.c.bf16 %v325_v39, %v324_v31  ;;  %v196_v49 = vmul.f32 %v897_v41, %v1178_v1  ;;  %v1120_v39 = vld [vmem:[%s1502_s0 + $0xf8] sm:$0xff]  }
  0x36   :  { %v266_v50 = vadd.f32 %v1192_v7, %v195_v42  ;;  %v901_v51 = vunpack.c.h.bf16 %v1113_v34  ;;  %v328_v54 = vmax.f32 %v264_v44, 0.0  ;;  %v197_v56 = vmul.f32 %v900_v46, %v1178_v1  ;;  %v1119_v34 = vld [vmem:[%s1502_s0 + $0xf0] sm:$0xff]  }
  0x37   :  { %v1038_v53 = vpack.c.bf16 %v327_v43, %v326_v40  ;;  %v329_v55 = vmax.f32 %v265_v45, 0.0  ;;  %1140 = vst [vmem:[%s1505_s3 + $0xa0] sm:$0xff] %v1033_v48   ;;  %v267_v57 = vadd.f32 %v1192_v7, %v196_v49  ;;  %v904_v60 = vunpack.c.l.bf16 %v1114_v47 }
  0x38   :  { %v330_v58 = vmax.f32 %v266_v50, 0.0  ;;  %v198_v59 = vmul.f32 %v901_v51, %v1178_v1  ;;  %v268_v63 = vadd.f32 %v1192_v7, %v197_v56  ;;  %v905_v0 = vunpack.c.h.bf16 %v1114_v47 }
  0x39   :  { %1141 = vst [vmem:[%s1505_s3 + $0xa8] sm:$0xff] %v1038_v53   ;;  %v1043_v62 = vpack.c.bf16 %v329_v55, %v328_v54  ;;  %v908_v2 = vunpack.c.l.bf16 %v1115_v52  ;;  %v331_v3 = vmax.f32 %v267_v57, 0.0  ;;  %v199_v5 = vmul.f32 %v904_v60, %v1178_v1 }
  0x3a   :  { %v269_v4 = vadd.f32 %v1192_v7, %v198_v59  ;;  %v909_v6 = vunpack.c.h.bf16 %v1115_v52  ;;  %v332_v8 = vmax.f32 %v268_v63, 0.0  ;;  %v200_v9 = vmul.f32 %v905_v0, %v1178_v1 }
  0x3b   :  { %1142 = vst [vmem:[%s1505_s3 + $0xb0] sm:$0xff] %v1043_v62   ;;  %v201_v10 = vmul.f32 %v908_v2, %v1178_v1  ;;  %v912_v11 = vunpack.c.l.bf16 %v1116_v61  ;;  %v1048_v13 = vpack.c.bf16 %v331_v3, %v330_v58  ;;  %v270_v15 = vadd.f32 %v1192_v7, %v199_v5 }
  0x3c   :  { %v333_v14 = vmax.f32 %v269_v4, 0.0  ;;  %v202_v16 = vmul.f32 %v909_v6, %v1178_v1  ;;  %v271_v17 = vadd.f32 %v1192_v7, %v200_v9  ;;  %v913_v19 = vunpack.c.h.bf16 %v1116_v61 }
  0x3d   :  { %v272_v18 = vadd.f32 %v1192_v7, %v201_v10  ;;  %v203_v20 = vmul.f32 %v912_v11, %v1178_v1  ;;  %1143 = vst [vmem:[%s1505_s3 + $0xb8] sm:$0xff] %v1048_v13   ;;  %v334_v23 = vmax.f32 %v270_v15, 0.0  ;;  %v916_v25 = vunpack.c.l.bf16 %v1117_v12 }
  0x3e   :  { %v1053_v22 = vpack.c.bf16 %v333_v14, %v332_v8  ;;  %v273_v24 = vadd.f32 %v1192_v7, %v202_v16  ;;  %v335_v26 = vmax.f32 %v271_v17, 0.0  ;;  %v204_v28 = vmul.f32 %v913_v19, %v1178_v1 }
  0x3f   :  { %v336_v27 = vmax.f32 %v272_v18, 0.0  ;;  %v274_v29 = vadd.f32 %v1192_v7, %v203_v20  ;;  %v917_v31 = vunpack.c.h.bf16 %v1117_v12  ;;  %v205_v32 = vmul.f32 %v916_v25, %v1178_v1 }
  0x40   :  { %1144 = vst [vmem:[%s1505_s3 + $0xc0] sm:$0xff] %v1053_v22   ;;  %v337_v30 = vmax.f32 %v273_v24, 0.0  ;;  %v920_v33 = vunpack.c.l.bf16 %v1118_v21  ;;  %v1058_v35 = vpack.c.bf16 %v335_v26, %v334_v23  ;;  %v275_v36 = vadd.f32 %v1192_v7, %v204_v28 }
  0x41   :  { %v338_v37 = vmax.f32 %v274_v29, 0.0  ;;  %v921_v38 = vunpack.c.h.bf16 %v1118_v21  ;;  %v206_v41 = vmul.f32 %v917_v31, %v1178_v1  ;;  %v276_v42 = vadd.f32 %v1192_v7, %v205_v32 }
  0x42   :  { %v1063_v40 = vpack.c.bf16 %v337_v30, %v336_v27  ;;  %v207_v43 = vmul.f32 %v920_v33, %v1178_v1  ;;  %1145 = vst [vmem:[%s1505_s3 + $0xc8] sm:$0xff] %v1058_v35   ;;  %v339_v44 = vmax.f32 %v275_v36, 0.0  ;;  %v924_v46 = vunpack.c.l.bf16 %v1119_v34 }
  0x43   :  { %v208_v45 = vmul.f32 %v921_v38, %v1178_v1  ;;  %v925_v47 = vunpack.c.h.bf16 %v1119_v34  ;;  %v277_v48 = vadd.f32 %v1192_v7, %v206_v41  ;;  %v340_v49 = vmax.f32 %v276_v42, 0.0 }
  0x44   :  { %1146 = vst [vmem:[%s1505_s3 + $0xd0] sm:$0xff] %v1063_v40   ;;  %v278_v50 = vadd.f32 %v1192_v7, %v207_v43  ;;  %v928_v51 = vunpack.c.l.bf16 %v1120_v39  ;;  %v1068_v52 = vpack.c.bf16 %v339_v44, %v338_v37  ;;  %v209_v54 = vmul.f32 %v924_v46, %v1178_v1 }
  0x45   :  { %v279_v53 = vadd.f32 %v1192_v7, %v208_v45  ;;  %v210_v55 = vmul.f32 %v925_v47, %v1178_v1  ;;  %v341_v56 = vmax.f32 %v277_v48, 0.0  ;;  %v929_v58 = vunpack.c.h.bf16 %v1120_v39 }
  0x46   :  { %v342_v57 = vmax.f32 %v278_v50, 0.0  ;;  %v211_v59 = vmul.f32 %v928_v51, %v1178_v1  ;;  %1147 = vst [vmem:[%s1505_s3 + $0xd8] sm:$0xff] %v1068_v52   ;;  %v280_v61 = vadd.f32 %v1192_v7, %v209_v54 }
  0x47   :  { %v343_v60 = vmax.f32 %v279_v53, 0.0  ;;  %v281_v62 = vadd.f32 %v1192_v7, %v210_v55  ;;  %v1073_v63 = vpack.c.bf16 %v341_v56, %v340_v49  ;;  %v212_v0 = vmul.f32 %v929_v58, %v1178_v1 }
  0x48   :  { %v282_v2 = vadd.f32 %v1192_v7, %v211_v59  ;;  %v344_v4 = vmax.f32 %v280_v61, 0.0 }
  0x49   :  { %v1078_v3 = vpack.c.bf16 %v343_v60, %v342_v57  ;;  %v345_v5 = vmax.f32 %v281_v62, 0.0  ;;  %1148 = vst [vmem:[%s1505_s3 + $0xe0] sm:$0xff] %v1073_v63   ;;  %v283_v6 = vadd.f32 %v1192_v7, %v212_v0 }
  0x4a   :  { %v346_v8 = vmax.f32 %v282_v2, 0.0 }
  0x4b   :  { %1149 = vst [vmem:[%s1505_s3 + $0xe8] sm:$0xff] %v1078_v3   ;;  %v1083_v9 = vpack.c.bf16 %v345_v5, %v344_v4  ;;  %v347_v10 = vmax.f32 %v283_v6, 0.0 }
  0x4d   :  { %1150 = vst [vmem:[%s1505_s3 + $0xf0] sm:$0xff] %v1083_v9   ;;  %v1088_v1 = vpack.c.bf16 %v347_v10, %v346_v8 }
  0x4f   :  { %1151 = vst [vmem:[%s1505_s3 + $0xf8] sm:$0xff] %v1088_v1  }

// kernel: netG64_forward.15
= control target key start
LH: loop header
LB: loop body
LE: loop exit
PB: predicated region body
PF: predicated region fallthrough
CT: control target
= control target key end

     0   :  { %v2236_v0 = vmov 0   ;;  %vm571_vm0 = vcmask 130048   ;;  %s2939_s1 = inlined_call_operand.vmem [shape: bf16[144,128], index: 1, kind: input, shape index: {}]   ;;  %s2940_s0 = inlined_call_operand.vmem [shape: bf16[512,144], index: 0, kind: input, shape index: {}]   ;;  %s2941_s2 = inlined_call_operand.vmem [shape: bf16[512,128], index: 2, kind: output, shape index: {0}]   ;;  %s2942_s3 = inlined_call_operand.vmem [shape: f32[1,1,128], index: 3, kind: output, shape index: {1}]   ;;  %s2943_s4 = inlined_call_operand.vmem [shape: f32[1,1,128], index: 4, kind: output, shape index: {2}]  }
   0x1   :  { %668 = vmatprep.subr.bf16.mxu0 %v2236_v0  ;;  %v2131_v1 = vld [vmem:[%s2939_s1 + $0x38] sm:$0xff]   ;;  %2112 = vmatprep.subr.bf16.mxu1 %v2236_v0  ;;  %v2132_v2 = vld [vmem:[%s2939_s1 + $0x30] sm:$0xff]   ;;  %v2133_v3 = vld [vmem:[%s2939_s1 + $0x28] sm:$0xff]  }
   0x2   :  { %669 = vmatpush1.bf16.msra.mxu0 %v2131_v1  ;;  %2121 = vmatpush1.bf16.msra.mxu1 %v2131_v1  ;;  %v2134_v4 = vld [vmem:[%s2939_s1 + $0x20] sm:$0xff]   ;;  %v2135_v6 = vld [vmem:[%s2939_s1 + $0x18] sm:$0xff]   ;;  %v2136_v7 = vld [vmem:[%s2939_s1 + $0x10] sm:$0xff]  }
   0x3   :  { %670 = vmatprep.subr.bf16.mxu0 %v2236_v0  ;;  %2113 = vmatprep.subr.bf16.mxu1 %v2236_v0  ;;  %v2142_v5 = vld [vmem:[%s2940_s0 + $0x4] ss:$8 sps:$4 sm:$0xff]   ;;  %v2140_v12 = vld [vmem:[%s2940_s0] ss:$8 sps:$4 sm:$0xff]   ;;  %v2143_v13 = vld [vmem:[%s2940_s0 + $0x14] ss:$8 sps:$4 sm:$0xff]  }
   0x4   :  { %1761 = vmatprep.mubr.msk.bf16.mxu0 %vm571_vm0, %v2142_v5  ;;  %v2166_v8 = vld [vmem:[%s2940_s0 + $0x104] ss:$8 sps:$4 sm:$0xff]   ;;  %v2164_v14 = vld [vmem:[%s2940_s0 + $0x100] ss:$8 sps:$4 sm:$0xff]   ;;  %v2170_v15 = vld [vmem:[%s2940_s0 + $0x114] ss:$8 sps:$4 sm:$0xff]  }
   0x5   :  { %v2137_v9 = vld [vmem:[%s2939_s1 + $0x8] sm:$0xff]   ;;  %1777 = vmatprep.mubr.msk.bf16.mxu1 %vm571_vm0, %v2166_v8  ;;  %v2138_v10 = vld [vmem:[%s2939_s1] sm:$0xff]   ;;  %v2145_v16 = vld [vmem:[%s2940_s0 + $0x10] ss:$8 sps:$4 sm:$0xff]  }
   0x6   :  { %671 = vmatpush1.bf16.msra.mxu0 %v2132_v2  ;;  %2122 = vmatpush1.bf16.msra.mxu1 %v2132_v2  ;;  %v2139_v11 = vld [vmem:[%s2939_s1 + $0x40] sm:$0xff]   ;;  %v2172_v18 = vld [vmem:[%s2940_s0 + $0x110] ss:$8 sps:$4 sm:$0xff]   ;;  %v2149_v21 = vld [vmem:[%s2940_s0 + $0x34] ss:$8 sps:$4 sm:$0xff]  }
   0x7   :  { %672 = vmatprep.subr.bf16.mxu0 %v2236_v0  ;;  %2114 = vmatprep.subr.bf16.mxu1 %v2236_v0  ;;  %v2146_v17 = vld [vmem:[%s2940_s0 + $0x24] ss:$8 sps:$4 sm:$0xff]   ;;  %v2148_v20 = vld [vmem:[%s2940_s0 + $0x20] ss:$8 sps:$4 sm:$0xff]   ;;  %v2182_v23 = vld [vmem:[%s2940_s0 + $0x134] ss:$8 sps:$4 sm:$0xff]  }
   0x8   :  { %v2176_v19 = vld [vmem:[%s2940_s0 + $0x124] ss:$8 sps:$4 sm:$0xff]   ;;  %v2178_v22 = vld [vmem:[%s2940_s0 + $0x120] ss:$8 sps:$4 sm:$0xff]   ;;  %v2151_v24 = vld [vmem:[%s2940_s0 + $0x30] ss:$8 sps:$4 sm:$0xff]  }
   0x9   :  { %v2184_v25 = vld [vmem:[%s2940_s0 + $0x130] ss:$8 sps:$4 sm:$0xff]   ;;  %v2152_v26 = vld [vmem:[%s2940_s0 + $0x44] ss:$8 sps:$4 sm:$0xff]   ;;  %v2154_v28 = vld [vmem:[%s2940_s0 + $0x40] ss:$8 sps:$4 sm:$0xff]  }
   0xa   :  { %673 = vmatpush1.bf16.msra.mxu0 %v2133_v3  ;;  %2123 = vmatpush1.bf16.msra.mxu1 %v2133_v3  ;;  %v2188_v27 = vld [vmem:[%s2940_s0 + $0x144] ss:$8 sps:$4 sm:$0xff]   ;;  %v2190_v29 = vld [vmem:[%s2940_s0 + $0x140] ss:$8 sps:$4 sm:$0xff]   ;;  %v2155_v30 = vld [vmem:[%s2940_s0 + $0x54] ss:$8 sps:$4 sm:$0xff]  }
   0xb   :  { %674 = vmatprep.subr.bf16.mxu0 %v2236_v0  ;;  %2115 = vmatprep.subr.bf16.mxu1 %v2236_v0  ;;  %v2194_v31 = vld [vmem:[%s2940_s0 + $0x154] ss:$8 sps:$4 sm:$0xff]   ;;  %v2157_v32 = vld [vmem:[%s2940_s0 + $0x50] ss:$8 sps:$4 sm:$0xff]   ;;  %v2158_v34 = vld [vmem:[%s2940_s0 + $0x64] ss:$8 sps:$4 sm:$0xff]  }
   0xc   :  { %v2196_v33 = vld [vmem:[%s2940_s0 + $0x150] ss:$8 sps:$4 sm:$0xff]   ;;  %v2200_v35 = vld [vmem:[%s2940_s0 + $0x164] ss:$8 sps:$4 sm:$0xff]   ;;  %v2160_v36 = vld [vmem:[%s2940_s0 + $0x60] ss:$8 sps:$4 sm:$0xff]  }
   0xd   :  { %v2202_v37 = vld [vmem:[%s2940_s0 + $0x160] ss:$8 sps:$4 sm:$0xff]   ;;  %v2161_v38 = vld [vmem:[%s2940_s0 + $0x74] ss:$8 sps:$4 sm:$0xff]   ;;  %v2163_v40 = vld [vmem:[%s2940_s0 + $0x70] ss:$8 sps:$4 sm:$0xff]  }
   0xe   :  { %675 = vmatpush1.bf16.msra.mxu0 %v2134_v4  ;;  %2124 = vmatpush1.bf16.msra.mxu1 %v2134_v4  ;;  %v2206_v39 = vld [vmem:[%s2940_s0 + $0x174] ss:$8 sps:$4 sm:$0xff]   ;;  %v2208_v41 = vld [vmem:[%s2940_s0 + $0x170] ss:$8 sps:$4 sm:$0xff]   ;;  %v2167_v42 = vld [vmem:[%s2940_s0 + $0x84] ss:$8 sps:$4 sm:$0xff]  }
   0xf   :  { %676 = vmatprep.subr.bf16.mxu0 %v2236_v0  ;;  %2116 = vmatprep.subr.bf16.mxu1 %v2236_v0  ;;  %v2212_v43 = vld [vmem:[%s2940_s0 + $0x184] ss:$8 sps:$4 sm:$0xff]   ;;  %v2169_v44 = vld [vmem:[%s2940_s0 + $0x80] ss:$8 sps:$4 sm:$0xff]   ;;  %v2173_v46 = vld [vmem:[%s2940_s0 + $0x94] ss:$8 sps:$4 sm:$0xff]  }
  0x10   :  { %v2214_v45 = vld [vmem:[%s2940_s0 + $0x180] ss:$8 sps:$4 sm:$0xff]   ;;  %v2215_v47 = vld [vmem:[%s2940_s0 + $0x194] ss:$8 sps:$4 sm:$0xff]   ;;  %v2175_v48 = vld [vmem:[%s2940_s0 + $0x90] ss:$8 sps:$4 sm:$0xff]  }
  0x11   :  { %v2217_v49 = vld [vmem:[%s2940_s0 + $0x190] ss:$8 sps:$4 sm:$0xff]   ;;  %v2179_v50 = vld [vmem:[%s2940_s0 + $0xa4] ss:$8 sps:$4 sm:$0xff]   ;;  %v2181_v52 = vld [vmem:[%s2940_s0 + $0xa0] ss:$8 sps:$4 sm:$0xff]  }
  0x12   :  { %677 = vmatpush1.bf16.msra.mxu0 %v2135_v6  ;;  %2125 = vmatpush1.bf16.msra.mxu1 %v2135_v6  ;;  %v2218_v51 = vld [vmem:[%s2940_s0 + $0x1a4] ss:$8 sps:$4 sm:$0xff]   ;;  %v2220_v53 = vld [vmem:[%s2940_s0 + $0x1a0] ss:$8 sps:$4 sm:$0xff]   ;;  %v2185_v54 = vld [vmem:[%s2940_s0 + $0xb4] ss:$8 sps:$4 sm:$0xff]  }
  0x13   :  { %678 = vmatprep.subr.bf16.mxu0 %v2236_v0  ;;  %2117 = vmatprep.subr.bf16.mxu1 %v2236_v0  ;;  %v2221_v55 = vld [vmem:[%s2940_s0 + $0x1b4] ss:$8 sps:$4 sm:$0xff]   ;;  %v2187_v56 = vld [vmem:[%s2940_s0 + $0xb0] ss:$8 sps:$4 sm:$0xff]   ;;  %v2191_v58 = vld [vmem:[%s2940_s0 + $0xc4] ss:$8 sps:$4 sm:$0xff]  }
  0x14   :  { %v2223_v57 = vld [vmem:[%s2940_s0 + $0x1b0] ss:$8 sps:$4 sm:$0xff]   ;;  %v2224_v59 = vld [vmem:[%s2940_s0 + $0x1c4] ss:$8 sps:$4 sm:$0xff]   ;;  %v2193_v60 = vld [vmem:[%s2940_s0 + $0xc0] ss:$8 sps:$4 sm:$0xff]  }
  0x15   :  { %v2226_v61 = vld [vmem:[%s2940_s0 + $0x1c0] ss:$8 sps:$4 sm:$0xff]   ;;  %v2197_v62 = vld [vmem:[%s2940_s0 + $0xd4] ss:$8 sps:$4 sm:$0xff]   ;;  %v2229_v1 = vld [vmem:[%s2940_s0 + $0x1d0] ss:$8 sps:$4 sm:$0xff]  }
  0x16   :  { %679 = vmatpush1.bf16.msra.mxu0 %v2136_v7  ;;  %2126 = vmatpush1.bf16.msra.mxu1 %v2136_v7  ;;  %v2227_v63 = vld [vmem:[%s2940_s0 + $0x1d4] ss:$8 sps:$4 sm:$0xff]   ;;  %v2203_v2 = vld [vmem:[%s2940_s0 + $0xe4] ss:$8 sps:$4 sm:$0xff]   ;;  %v2205_v4 = vld [vmem:[%s2940_s0 + $0xe0] ss:$8 sps:$4 sm:$0xff]  }
  0x17   :  { %680 = vmatprep.subr.bf16.mxu0 %v2236_v0  ;;  %2118 = vmatprep.subr.bf16.mxu1 %v2236_v0  ;;  %v2230_v3 = vld [vmem:[%s2940_s0 + $0x1e4] ss:$8 sps:$4 sm:$0xff]   ;;  %v2232_v5 = vld [vmem:[%s2940_s0 + $0x1e0] ss:$8 sps:$4 sm:$0xff]   ;;  %v2209_v6 = vld [vmem:[%s2940_s0 + $0xf4] ss:$8 sps:$4 sm:$0xff]  }
  0x18   :  { %v2233_v7 = vld [vmem:[%s2940_s0 + $0x1f4] ss:$8 sps:$4 sm:$0xff]   ;;  %v2211_v8 = vld [vmem:[%s2940_s0 + $0xf0] ss:$8 sps:$4 sm:$0xff]  }
  0x1a   :  { %681 = vmatpush1.bf16.msra.mxu0 %v2137_v9  ;;  %2127 = vmatpush1.bf16.msra.mxu1 %v2137_v9  ;;  %v2235_v9 = vld [vmem:[%s2940_s0 + $0x1f0] ss:$8 sps:$4 sm:$0xff]  }
  0x1b   :  { %682 = vmatprep.subr.bf16.mxu0 %v2236_v0  ;;  %2119 = vmatprep.subr.bf16.mxu1 %v2236_v0 }
  0x1e   :  { %683 = vmatpush1.bf16.msra.mxu0 %v2138_v10  ;;  %2128 = vmatpush1.bf16.msra.mxu1 %v2138_v10 }
  0x1f   :  { %698 = vmatprep.subr.bf16.mxu0 %v2236_v0  ;;  %2120 = vmatprep.subr.bf16.mxu1 %v2236_v0  ;;  %v2199_v0 = vld [vmem:[%s2940_s0 + $0xd0] ss:$8 sps:$4 sm:$0xff]  }
  0x22   :  { %699 = vmatpush2.bf16.msra.mxu0 %v2139_v11  ;;  %2129 = vmatpush2.bf16.msra.mxu1 %v2139_v11 }
  0x25   :  { %701 = vmatmul.mubr.bf16.vlgmr.msra.gmra.mxu0 %v2140_v12  ;;  %829 = vmatmul.mubr.bf16.vlgmr.msra.gmra.mxu1 %v2164_v14 }
  0x26   :  { %1762 = vmatprep.mubr.msk.bf16.mxu0 %vm571_vm0, %v2143_v13  ;;  %1778 = vmatprep.mubr.msk.bf16.mxu1 %vm571_vm0, %v2170_v15 }
  0x2d   :  { %709 = vmatmul.mubr.bf16.gmra.mxu0 %v2145_v16  ;;  %837 = vmatmul.mubr.bf16.gmra.mxu1 %v2172_v18 }
  0x2e   :  { %1763 = vmatprep.mubr.msk.bf16.mxu0 %vm571_vm0, %v2146_v17  ;;  %1779 = vmatprep.mubr.msk.bf16.mxu1 %vm571_vm0, %v2176_v19 }
  0x35   :  { %717 = vmatmul.mubr.bf16.gmra.mxu0 %v2148_v20  ;;  %845 = vmatmul.mubr.bf16.gmra.mxu1 %v2178_v22 }
  0x36   :  { %1764 = vmatprep.mubr.msk.bf16.mxu0 %vm571_vm0, %v2149_v21  ;;  %1780 = vmatprep.mubr.msk.bf16.mxu1 %vm571_vm0, %v2182_v23 }
  0x3d   :  { %725 = vmatmul.mubr.bf16.gmra.mxu0 %v2151_v24  ;;  %853 = vmatmul.mubr.bf16.gmra.mxu1 %v2184_v25 }
  0x3e   :  { %1765 = vmatprep.mubr.msk.bf16.mxu0 %vm571_vm0, %v2152_v26  ;;  %1781 = vmatprep.mubr.msk.bf16.mxu1 %vm571_vm0, %v2188_v27 }
  0x45   :  { %733 = vmatmul.mubr.bf16.gmra.mxu0 %v2154_v28  ;;  %861 = vmatmul.mubr.bf16.gmra.mxu1 %v2190_v29 }
  0x46   :  { %1766 = vmatprep.mubr.msk.bf16.mxu0 %vm571_vm0, %v2155_v30  ;;  %1782 = vmatprep.mubr.msk.bf16.mxu1 %vm571_vm0, %v2194_v31 }
  0x4d   :  { %741 = vmatmul.mubr.bf16.gmra.mxu0 %v2157_v32  ;;  %869 = vmatmul.mubr.bf16.gmra.mxu1 %v2196_v33 }
  0x4e   :  { %1767 = vmatprep.mubr.msk.bf16.mxu0 %vm571_vm0, %v2158_v34  ;;  %1783 = vmatprep.mubr.msk.bf16.mxu1 %vm571_vm0, %v2200_v35 }
  0x55   :  { %749 = vmatmul.mubr.bf16.gmra.mxu0 %v2160_v36  ;;  %877 = vmatmul.mubr.bf16.gmra.mxu1 %v2202_v37 }
  0x56   :  { %1768 = vmatprep.mubr.msk.bf16.mxu0 %vm571_vm0, %v2161_v38  ;;  %1784 = vmatprep.mubr.msk.bf16.mxu1 %vm571_vm0, %v2206_v39 }
  0x5d   :  { %757 = vmatmul.mubr.bf16.gmra.mxu0 %v2163_v40  ;;  %885 = vmatmul.mubr.bf16.gmra.mxu1 %v2208_v41 }
  0x5e   :  { %1769 = vmatprep.mubr.msk.bf16.mxu0 %vm571_vm0, %v2167_v42  ;;  %1785 = vmatprep.mubr.msk.bf16.mxu1 %vm571_vm0, %v2212_v43 }
  0x65   :  { %765 = vmatmul.mubr.bf16.gmra.mxu0 %v2169_v44  ;;  %893 = vmatmul.mubr.bf16.gmra.mxu1 %v2214_v45 }
  0x66   :  { %1770 = vmatprep.mubr.msk.bf16.mxu0 %vm571_vm0, %v2173_v46  ;;  %1786 = vmatprep.mubr.msk.bf16.mxu1 %vm571_vm0, %v2215_v47 }
  0x6d   :  { %773 = vmatmul.mubr.bf16.gmra.mxu0 %v2175_v48  ;;  %901 = vmatmul.mubr.bf16.gmra.mxu1 %v2217_v49 }
  0x6e   :  { %1771 = vmatprep.mubr.msk.bf16.mxu0 %vm571_vm0, %v2179_v50  ;;  %1787 = vmatprep.mubr.msk.bf16.mxu1 %vm571_vm0, %v2218_v51 }
  0x75   :  { %781 = vmatmul.mubr.bf16.gmra.mxu0 %v2181_v52  ;;  %909 = vmatmul.mubr.bf16.gmra.mxu1 %v2220_v53 }
  0x76   :  { %1772 = vmatprep.mubr.msk.bf16.mxu0 %vm571_vm0, %v2185_v54  ;;  %1788 = vmatprep.mubr.msk.bf16.mxu1 %vm571_vm0, %v2221_v55 }
  0x7d   :  { %789 = vmatmul.mubr.bf16.gmra.mxu0 %v2187_v56  ;;  %917 = vmatmul.mubr.bf16.gmra.mxu1 %v2223_v57 }
  0x7e   :  { %1773 = vmatprep.mubr.msk.bf16.mxu0 %vm571_vm0, %v2191_v58  ;;  %1789 = vmatprep.mubr.msk.bf16.mxu1 %vm571_vm0, %v2224_v59 }
  0x85   :  { %797 = vmatmul.mubr.bf16.gmra.mxu0 %v2193_v60  ;;  %925 = vmatmul.mubr.bf16.gmra.mxu1 %v2226_v61 }
  0x86   :  { %1774 = vmatprep.mubr.msk.bf16.mxu0 %vm571_vm0, %v2197_v62  ;;  %1790 = vmatprep.mubr.msk.bf16.mxu1 %vm571_vm0, %v2227_v63 }
  0x8d   :  { %805 = vmatmul.mubr.bf16.gmra.mxu0 %v2199_v0  ;;  %933 = vmatmul.mubr.bf16.gmra.mxu1 %v2229_v1 }
  0x8e   :  { %1775 = vmatprep.mubr.msk.bf16.mxu0 %vm571_vm0, %v2203_v2  ;;  %1791 = vmatprep.mubr.msk.bf16.mxu1 %vm571_vm0, %v2230_v3 }
  0x95   :  { %813 = vmatmul.mubr.bf16.gmra.mxu0 %v2205_v4  ;;  %941 = vmatmul.mubr.bf16.gmra.mxu1 %v2232_v5 }
  0x96   :  { %1776 = vmatprep.mubr.msk.bf16.mxu0 %vm571_vm0, %v2209_v6  ;;  %1792 = vmatprep.mubr.msk.bf16.mxu1 %vm571_vm0, %v2233_v7 }
  0x9d   :  { %821 = vmatmul.mubr.bf16.gmra.mxu0 %v2211_v8  ;;  %949 = vmatmul.mubr.bf16.gmra.mxu1 %v2235_v9 }
  0xe5   :  { %v2513_v10 = vpop.f32.mrf.mxu0  ;;  %v2515_v11 = vpop.f32.mrf.mxu1 }
  0xe7   :  { %v704_v12 = vpop.f32.mrf.mxu0  ;;  %v832_v13 = vpop.f32.mrf.mxu1 }
  0xe9   :  { %v2517_v14 = vpop.f32.mrf.mxu0  ;;  %v2519_v15 = vpop.f32.mrf.mxu1 }
  0xea   :  { %v1924_v16 = vpack.c.bf16 %v2517_v14, %v2513_v10  ;;  %v2004_v17 = vpack.c.bf16 %v2519_v15, %v2515_v11 }
  0xeb   :  { %v707_v18 = vpop.f32.mrf.mxu0  ;;  %v835_v19 = vpop.f32.mrf.mxu1 }
  0xec   :  { %1925 = vst [vmem:[%s2941_s2] sm:$0xff] %v1924_v16   ;;  %2096 = vst [vmem:[%s2941_s2 + $0x80] sm:$0xff] %v2004_v17  }
  0xed   :  { %v2531_v20 = vpop.f32.mrf.mxu0  ;;  %v2533_v21 = vpop.f32.mrf.mxu1 }
  0xef   :  { %v712_v22 = vpop.f32.mrf.mxu0  ;;  %v840_v23 = vpop.f32.mrf.mxu1 }
  0xf1   :  { %v2535_v24 = vpop.f32.mrf.mxu0  ;;  %v2537_v25 = vpop.f32.mrf.mxu1 }
  0xf2   :  { %v1929_v26 = vpack.c.bf16 %v2535_v24, %v2531_v20  ;;  %v2009_v27 = vpack.c.bf16 %v2537_v25, %v2533_v21 }
  0xf3   :  { %v715_v28 = vpop.f32.mrf.mxu0  ;;  %v843_v29 = vpop.f32.mrf.mxu1 }
  0xf4   :  { %2081 = vst [vmem:[%s2941_s2 + $0x8] sm:$0xff] %v1929_v26   ;;  %2097 = vst [vmem:[%s2941_s2 + $0x88] sm:$0xff] %v2009_v27  }
  0xf5   :  { %v2549_v30 = vpop.f32.mrf.mxu0  ;;  %v2551_v31 = vpop.f32.mrf.mxu1 }
  0xf7   :  { %v720_v32 = vpop.f32.mrf.mxu0  ;;  %v848_v33 = vpop.f32.mrf.mxu1 }
  0xf9   :  { %v2553_v34 = vpop.f32.mrf.mxu0  ;;  %v2555_v35 = vpop.f32.mrf.mxu1 }
  0xfa   :  { %v1934_v36 = vpack.c.bf16 %v2553_v34, %v2549_v30  ;;  %v2014_v37 = vpack.c.bf16 %v2555_v35, %v2551_v31 }
  0xfb   :  { %v723_v38 = vpop.f32.mrf.mxu0  ;;  %v851_v39 = vpop.f32.mrf.mxu1 }
  0xfc   :  { %2082 = vst [vmem:[%s2941_s2 + $0x10] sm:$0xff] %v1934_v36   ;;  %2098 = vst [vmem:[%s2941_s2 + $0x90] sm:$0xff] %v2014_v37   ;;  %v1543_v36 = vmul.f32 %v2517_v14, %v2517_v14  ;;  %v1542_v39 = vmul.f32 %v2513_v10, %v2513_v10 }
  0xfd   :  { %v2567_v40 = vpop.f32.mrf.mxu0  ;;  %v2569_v41 = vpop.f32.mrf.mxu1 }
  0xff   :  { %v728_v42 = vpop.f32.mrf.mxu0  ;;  %v856_v43 = vpop.f32.mrf.mxu1 }
 0x100   :  { %v1544_v42 = vmul.f32 %v2531_v20, %v2531_v20 }
 0x101   :  { %v2571_v44 = vpop.f32.mrf.mxu0  ;;  %v2573_v45 = vpop.f32.mrf.mxu1 }
 0x102   :  { %v1939_v46 = vpack.c.bf16 %v2571_v44, %v2567_v40  ;;  %v2019_v47 = vpack.c.bf16 %v2573_v45, %v2569_v41 }
 0x103   :  { %v731_v48 = vpop.f32.mrf.mxu0  ;;  %v859_v49 = vpop.f32.mrf.mxu1 }
 0x104   :  { %2083 = vst [vmem:[%s2941_s2 + $0x18] sm:$0xff] %v1939_v46   ;;  %2099 = vst [vmem:[%s2941_s2 + $0x98] sm:$0xff] %v2019_v47   ;;  %v1472_v47 = vadd.f32 %v2517_v14, %v2513_v10  ;;  %v1606_v48 = vadd.f32 %v1543_v36, %v1542_v39  ;;  %v1545_v49 = vmul.f32 %v2535_v24, %v2535_v24 }
 0x105   :  { %v2585_v50 = vpop.f32.mrf.mxu0  ;;  %v2587_v51 = vpop.f32.mrf.mxu1 }
 0x107   :  { %v736_v52 = vpop.f32.mrf.mxu0  ;;  %v864_v53 = vpop.f32.mrf.mxu1 }
 0x109   :  { %v2589_v54 = vpop.f32.mrf.mxu0  ;;  %v2591_v55 = vpop.f32.mrf.mxu1 }
 0x10a   :  { %v1944_v56 = vpack.c.bf16 %v2589_v54, %v2585_v50  ;;  %v2024_v57 = vpack.c.bf16 %v2591_v55, %v2587_v51 }
 0x10b   :  { %v739_v58 = vpop.f32.mrf.mxu0  ;;  %v867_v59 = vpop.f32.mrf.mxu1 }
 0x10c   :  { %2084 = vst [vmem:[%s2941_s2 + $0x20] sm:$0xff] %v1944_v56   ;;  %2100 = vst [vmem:[%s2941_s2 + $0xa0] sm:$0xff] %v2024_v57   ;;  %v1473_v56 = vadd.f32 %v1472_v47, %v2531_v20  ;;  %v1607_v57 = vadd.f32 %v1606_v48, %v1544_v42  ;;  %v1546_v58 = vmul.f32 %v2549_v30, %v2549_v30 }
 0x10d   :  { %v2603_v60 = vpop.f32.mrf.mxu0  ;;  %v2605_v61 = vpop.f32.mrf.mxu1  ;;  %v1547_v20 = vmul.f32 %v2553_v34, %v2553_v34 }
 0x10f   :  { %v744_v62 = vpop.f32.mrf.mxu0  ;;  %v872_v63 = vpop.f32.mrf.mxu1 }
 0x110   :  { %v1474_v63 = vadd.f32 %v1473_v56, %v2535_v24 }
 0x111   :  { %v2607_v0 = vpop.f32.mrf.mxu0  ;;  %v2609_v1 = vpop.f32.mrf.mxu1 }
 0x112   :  { %v1949_v2 = vpack.c.bf16 %v2607_v0, %v2603_v60  ;;  %v2029_v3 = vpack.c.bf16 %v2609_v1, %v2605_v61 }
 0x113   :  { %v747_v4 = vpop.f32.mrf.mxu0  ;;  %v875_v5 = vpop.f32.mrf.mxu1 }
 0x114   :  { %2085 = vst [vmem:[%s2941_s2 + $0x28] sm:$0xff] %v1949_v2   ;;  %2101 = vst [vmem:[%s2941_s2 + $0xa8] sm:$0xff] %v2029_v3   ;;  %v1608_v2 = vadd.f32 %v1607_v57, %v1545_v49  ;;  %v1475_v5 = vadd.f32 %v1474_v63, %v2549_v30  ;;  %v1549_v30 = vmul.f32 %v2571_v44, %v2571_v44 }
 0x115   :  { %v2621_v6 = vpop.f32.mrf.mxu0  ;;  %v2623_v7 = vpop.f32.mrf.mxu1 }
 0x116   :  { %v1609_v24 = vadd.f32 %v1608_v2, %v1546_v58 }
 0x117   :  { %v752_v8 = vpop.f32.mrf.mxu0  ;;  %v880_v9 = vpop.f32.mrf.mxu1 }
 0x118   :  { %v1548_v8 = vmul.f32 %v2567_v40, %v2567_v40 }
 0x119   :  { %v2625_v12 = vpop.f32.mrf.mxu0  ;;  %v2627_v13 = vpop.f32.mrf.mxu1 }
 0x11a   :  { %v1954_v16 = vpack.c.bf16 %v2625_v12, %v2621_v6  ;;  %v2034_v17 = vpack.c.bf16 %v2627_v13, %v2623_v7 }
 0x11b   :  { %v755_v18 = vpop.f32.mrf.mxu0  ;;  %v883_v19 = vpop.f32.mrf.mxu1 }
 0x11c   :  { %2086 = vst [vmem:[%s2941_s2 + $0x30] sm:$0xff] %v1954_v16   ;;  %2102 = vst [vmem:[%s2941_s2 + $0xb0] sm:$0xff] %v2034_v17   ;;  %v1476_v17 = vadd.f32 %v1475_v5, %v2553_v34  ;;  %v1610_v18 = vadd.f32 %v1609_v24, %v1547_v20  ;;  %v1554_v20 = vmul.f32 %v2621_v6, %v2621_v6 }
 0x11d   :  { %v2639_v22 = vpop.f32.mrf.mxu0  ;;  %v2641_v23 = vpop.f32.mrf.mxu1 }
 0x11f   :  { %v760_v26 = vpop.f32.mrf.mxu0  ;;  %v888_v27 = vpop.f32.mrf.mxu1 }
 0x120   :  { %v1477_v27 = vadd.f32 %v1476_v17, %v2567_v40  ;;  %v1551_v40 = vmul.f32 %v2589_v54, %v2589_v54 }
 0x121   :  { %v2643_v28 = vpop.f32.mrf.mxu0  ;;  %v2645_v29 = vpop.f32.mrf.mxu1 }
 0x122   :  { %v1959_v32 = vpack.c.bf16 %v2643_v28, %v2639_v22  ;;  %v2039_v33 = vpack.c.bf16 %v2645_v29, %v2641_v23 }
 0x123   :  { %v763_v37 = vpop.f32.mrf.mxu0  ;;  %v891_v38 = vpop.f32.mrf.mxu1 }
 0x124   :  { %2087 = vst [vmem:[%s2941_s2 + $0x38] sm:$0xff] %v1959_v32   ;;  %2103 = vst [vmem:[%s2941_s2 + $0xb8] sm:$0xff] %v2039_v33   ;;  %v1611_v32 = vadd.f32 %v1610_v18, %v1548_v8  ;;  %v1550_v33 = vmul.f32 %v2585_v50, %v2585_v50  ;;  %v1478_v38 = vadd.f32 %v1477_v27, %v2571_v44 }
 0x125   :  { %v2663_v43 = vpop.f32.mrf.mxu0  ;;  %v2665_v46 = vpop.f32.mrf.mxu1 }
 0x126   :  { %v1612_v42 = vadd.f32 %v1611_v32, %v1549_v30  ;;  %v1479_v49 = vadd.f32 %v1478_v38, %v2585_v50  ;;  %v1553_v50 = vmul.f32 %v2607_v0, %v2607_v0 }
 0x127   :  { %v768_v52 = vpop.f32.mrf.mxu0  ;;  %v896_v53 = vpop.f32.mrf.mxu1 }
 0x128   :  { %v1613_v44 = vadd.f32 %v1612_v42, %v1550_v33  ;;  %v1552_v52 = vmul.f32 %v2603_v60, %v2603_v60  ;;  %v1480_v57 = vadd.f32 %v1479_v49, %v2589_v54 }
 0x129   :  { %v2674_v59 = vpop.f32.mrf.mxu0  ;;  %v2676_v62 = vpop.f32.mrf.mxu1 }
 0x12a   :  { %v1964_v10 = vpack.c.bf16 %v2674_v59, %v2663_v43  ;;  %v2044_v14 = vpack.c.bf16 %v2676_v62, %v2665_v46  ;;  %v1614_v58 = vadd.f32 %v1613_v44, %v1551_v40  ;;  %v1558_v40 = vmul.f32 %v2663_v43, %v2663_v43 }
 0x12b   :  { %v771_v3 = vpop.f32.mrf.mxu0  ;;  %v899_v4 = vpop.f32.mrf.mxu1 }
 0x12c   :  { %2088 = vst [vmem:[%s2941_s2 + $0x40] sm:$0xff] %v1964_v10   ;;  %2104 = vst [vmem:[%s2941_s2 + $0xc0] sm:$0xff] %v2044_v14   ;;  %v1481_v14 = vadd.f32 %v1480_v57, %v2603_v60  ;;  %v1615_v2 = vadd.f32 %v1614_v58, %v1552_v52  ;;  %v1555_v60 = vmul.f32 %v2625_v12, %v2625_v12 }
 0x12d   :  { %v2694_v9 = vpop.f32.mrf.mxu0  ;;  %v2696_v16 = vpop.f32.mrf.mxu1  ;;  %v1559_v57 = vmul.f32 %v2674_v59, %v2674_v59 }
 0x12e   :  { %v1482_v5 = vadd.f32 %v1481_v14, %v2607_v0  ;;  %v1616_v8 = vadd.f32 %v1615_v2, %v1553_v50 }
 0x12f   :  { %v776_v19 = vpop.f32.mrf.mxu0  ;;  %v904_v26 = vpop.f32.mrf.mxu1 }
 0x130   :  { %v1483_v30 = vadd.f32 %v1482_v5, %v2621_v6  ;;  %v1617_v0 = vadd.f32 %v1616_v8, %v1554_v20  ;;  %v1556_v19 = vmul.f32 %v2639_v22, %v2639_v22  ;;  %v1557_v6 = vmul.f32 %v2643_v28, %v2643_v28 }
 0x131   :  { %v2704_v36 = vpop.f32.mrf.mxu0  ;;  %v2706_v37 = vpop.f32.mrf.mxu1 }
 0x132   :  { %v1969_v34 = vpack.c.bf16 %v2704_v36, %v2694_v9  ;;  %v2049_v39 = vpack.c.bf16 %v2706_v37, %v2696_v16  ;;  %v1484_v32 = vadd.f32 %v1483_v30, %v2625_v12  ;;  %v1618_v33 = vadd.f32 %v1617_v0, %v1555_v60 }
 0x133   :  { %v779_v47 = vpop.f32.mrf.mxu0  ;;  %v907_v48 = vpop.f32.mrf.mxu1 }
 0x134   :  { %2089 = vst [vmem:[%s2941_s2 + $0x48] sm:$0xff] %v1969_v34   ;;  %2105 = vst [vmem:[%s2941_s2 + $0xc8] sm:$0xff] %v2049_v39   ;;  %v1485_v39 = vadd.f32 %v1484_v32, %v2639_v22  ;;  %v1619_v42 = vadd.f32 %v1618_v33, %v1556_v19 }
 0x135   :  { %v2724_v53 = vpop.f32.mrf.mxu0  ;;  %v2726_v56 = vpop.f32.mrf.mxu1 }
 0x136   :  { %v1486_v49 = vadd.f32 %v1485_v39, %v2643_v28  ;;  %v1620_v52 = vadd.f32 %v1619_v42, %v1557_v6  ;;  %v1562_v60 = vmul.f32 %v2724_v53, %v2724_v53 }
 0x137   :  { %v784_v63 = vpop.f32.mrf.mxu0  ;;  %v912_v10 = vpop.f32.mrf.mxu1 }
 0x138   :  { %v1487_v22 = vadd.f32 %v1486_v49, %v2663_v43  ;;  %v1621_v28 = vadd.f32 %v1620_v52, %v1558_v40  ;;  %v1560_v63 = vmul.f32 %v2694_v9, %v2694_v9  ;;  %v1561_v43 = vmul.f32 %v2704_v36, %v2704_v36 }
 0x139   :  { %v2734_v3 = vpop.f32.mrf.mxu0  ;;  %v2736_v4 = vpop.f32.mrf.mxu1 }
 0x13a   :  { %v1974_v54 = vpack.c.bf16 %v2734_v3, %v2724_v53  ;;  %v2054_v24 = vpack.c.bf16 %v2736_v4, %v2726_v56  ;;  %v1488_v2 = vadd.f32 %v1487_v22, %v2674_v59  ;;  %v1622_v20 = vadd.f32 %v1621_v28, %v1559_v57 }
 0x13b   :  { %v787_v17 = vpop.f32.mrf.mxu0  ;;  %v915_v18 = vpop.f32.mrf.mxu1  ;;  %v1563_v32 = vmul.f32 %v2734_v3, %v2734_v3 }
 0x13c   :  { %2090 = vst [vmem:[%s2941_s2 + $0x50] sm:$0xff] %v1974_v54   ;;  %2106 = vst [vmem:[%s2941_s2 + $0xd0] sm:$0xff] %v2054_v24   ;;  %v1489_v24 = vadd.f32 %v1488_v2, %v2694_v9  ;;  %v1623_v8 = vadd.f32 %v1622_v20, %v1560_v63 }
 0x13d   :  { %v790_v26 = vpop.f32.mrf.mxu0  ;;  %v2754_v27 = vpop.f32.mrf.mxu1 }
 0x13e   :  { %v1490_v30 = vadd.f32 %v1489_v24, %v2704_v36  ;;  %v1624_v19 = vadd.f32 %v1623_v8, %v1561_v43 }
 0x13f   :  { %v792_v38 = vpop.f32.mrf.mxu0  ;;  %v920_v34 = vpop.f32.mrf.mxu1 }
 0x140   :  { %v1491_v9 = vadd.f32 %v1490_v30, %v2724_v53  ;;  %v1625_v36 = vadd.f32 %v1624_v19, %v1562_v60  ;;  %v1564_v38 = vmul.f32 %v790_v26, %v790_v26 }
 0x141   :  { %v793_v47 = vpop.f32.mrf.mxu0  ;;  %v2762_v48 = vpop.f32.mrf.mxu1 }
 0x142   :  { %v1979_v44 = vpack.c.bf16 %v793_v47, %v790_v26  ;;  %v2059_v12 = vpack.c.bf16 %v2762_v48, %v2754_v27  ;;  %v1492_v42 = vadd.f32 %v1491_v9, %v2734_v3  ;;  %v1626_v40 = vadd.f32 %v1625_v36, %v1563_v32 }
 0x143   :  { %v795_v58 = vpop.f32.mrf.mxu0  ;;  %v923_v50 = vpop.f32.mrf.mxu1  ;;  %v1565_v49 = vmul.f32 %v793_v47, %v793_v47 }
 0x144   :  { %2091 = vst [vmem:[%s2941_s2 + $0x58] sm:$0xff] %v1979_v44   ;;  %2107 = vst [vmem:[%s2941_s2 + $0xd8] sm:$0xff] %v2059_v12   ;;  %v1493_v53 = vadd.f32 %v1492_v42, %v790_v26  ;;  %v1627_v52 = vadd.f32 %v1626_v40, %v1564_v38 }
 0x145   :  { %v798_v10 = vpop.f32.mrf.mxu0  ;;  %v2778_v14 = vpop.f32.mrf.mxu1 }
 0x146   :  { %v1566_v57 = vmul.f32 %v798_v10, %v798_v10  ;;  %v1494_v22 = vadd.f32 %v1493_v53, %v793_v47  ;;  %v1628_v2 = vadd.f32 %v1627_v52, %v1565_v49 }
 0x147   :  { %v800_v5 = vpop.f32.mrf.mxu0  ;;  %v928_v54 = vpop.f32.mrf.mxu1 }
 0x148   :  { %v1495_v3 = vadd.f32 %v1494_v22, %v798_v10  ;;  %v1629_v26 = vadd.f32 %v1628_v2, %v1566_v57 }
 0x149   :  { %v801_v17 = vpop.f32.mrf.mxu0  ;;  %v2786_v18 = vpop.f32.mrf.mxu1 }
 0x14a   :  { %v1984_v0 = vpack.c.bf16 %v801_v17, %v798_v10  ;;  %v2064_v59 = vpack.c.bf16 %v2786_v18, %v2778_v14  ;;  %v1567_v20 = vmul.f32 %v801_v17, %v801_v17  ;;  %v1496_v8 = vadd.f32 %v1495_v3, %v801_v17 }
 0x14b   :  { %v803_v33 = vpop.f32.mrf.mxu0  ;;  %v931_v6 = vpop.f32.mrf.mxu1 }
 0x14c   :  { %2092 = vst [vmem:[%s2941_s2 + $0x60] sm:$0xff] %v1984_v0   ;;  %2108 = vst [vmem:[%s2941_s2 + $0xe0] sm:$0xff] %v2064_v59   ;;  %v1630_v60 = vadd.f32 %v1629_v26, %v1567_v20 }
 0x14d   :  { %v806_v34 = vpop.f32.mrf.mxu0  ;;  %v2800_v39 = vpop.f32.mrf.mxu1 }
 0x14e   :  { %v1568_v54 = vmul.f32 %v806_v34, %v806_v34  ;;  %v1497_v19 = vadd.f32 %v1496_v8, %v806_v34 }
 0x14f   :  { %v808_v44 = vpop.f32.mrf.mxu0  ;;  %v936_v12 = vpop.f32.mrf.mxu1 }
 0x150   :  { %v1631_v10 = vadd.f32 %v1630_v60, %v1568_v54  ;;  %v1574_v60 = vmul.f32 %v2515_v11, %v2515_v11 }
 0x151   :  { %v809_v58 = vpop.f32.mrf.mxu0  ;;  %v2803_v50 = vpop.f32.mrf.mxu1 }
 0x152   :  { %v1989_v28 = vpack.c.bf16 %v809_v58, %v806_v34  ;;  %v2069_v63 = vpack.c.bf16 %v2803_v50, %v2800_v39  ;;  %v1569_v30 = vmul.f32 %v809_v58, %v809_v58  ;;  %v1498_v9 = vadd.f32 %v1497_v19, %v809_v58 }
 0x153   :  { %v811_v43 = vpop.f32.mrf.mxu0  ;;  %v939_v5 = vpop.f32.mrf.mxu1 }
 0x154   :  { %2093 = vst [vmem:[%s2941_s2 + $0x68] sm:$0xff] %v1989_v28   ;;  %2109 = vst [vmem:[%s2941_s2 + $0xe8] sm:$0xff] %v2069_v63   ;;  %v1632_v42 = vadd.f32 %v1631_v10, %v1569_v30 }
 0x155   :  { %v814_v47 = vpop.f32.mrf.mxu0  ;;  %v2813_v24 = vpop.f32.mrf.mxu1 }
 0x156   :  { %v1570_v32 = vmul.f32 %v814_v47, %v814_v47  ;;  %v1499_v17 = vadd.f32 %v1498_v9, %v814_v47 }
 0x157   :  { %v816_v0 = vpop.f32.mrf.mxu0  ;;  %v944_v59 = vpop.f32.mrf.mxu1 }
 0x158   :  { %v1633_v34 = vadd.f32 %v1632_v42, %v1570_v32  ;;  %v1575_v59 = vmul.f32 %v2519_v15, %v2519_v15  ;;  %v1576_v32 = vmul.f32 %v2533_v21, %v2533_v21  ;;  %v1578_v42 = vmul.f32 %v2551_v31, %v2551_v31 }
 0x159   :  { %v817_v33 = vpop.f32.mrf.mxu0  ;;  %v2815_v6 = vpop.f32.mrf.mxu1 }
 0x15a   :  { %v1994_v36 = vpack.c.bf16 %v817_v33, %v814_v47  ;;  %v2074_v38 = vpack.c.bf16 %v2815_v6, %v2813_v24  ;;  %v1571_v40 = vmul.f32 %v817_v33, %v817_v33  ;;  %v1500_v52 = vadd.f32 %v1499_v17, %v817_v33 }
 0x15b   :  { %v819_v49 = vpop.f32.mrf.mxu0  ;;  %v947_v44 = vpop.f32.mrf.mxu1 }
 0x15c   :  { %2094 = vst [vmem:[%s2941_s2 + $0x70] sm:$0xff] %v1994_v36   ;;  %2110 = vst [vmem:[%s2941_s2 + $0xf0] sm:$0xff] %v2074_v38   ;;  %v1634_v58 = vadd.f32 %v1633_v34, %v1571_v40 }
 0x15d   :  { %v822_v12 = vpop.f32.mrf.mxu0  ;;  %v2825_v53 = vpop.f32.mrf.mxu1 }
 0x15e   :  { %v1572_v57 = vmul.f32 %v822_v12, %v822_v12  ;;  %v1501_v63 = vadd.f32 %v1500_v52, %v822_v12 }
 0x15f   :  { %v824_v22 = vpop.f32.mrf.mxu0  ;;  %v952_v28 = vpop.f32.mrf.mxu1 }
 0x160   :  { %v1635_v2 = vadd.f32 %v1634_v58, %v1572_v57 }
 0x161   :  { %v825_v20 = vpop.f32.mrf.mxu0  ;;  %v2827_v43 = vpop.f32.mrf.mxu1 }
 0x162   :  { %v1999_v5 = vpack.c.bf16 %v825_v20, %v822_v12  ;;  %v1502_v3 = vadd.f32 %v1501_v63, %v825_v20  ;;  %v1573_v26 = vmul.f32 %v825_v20, %v825_v20  ;;  %v2079_v54 = vpack.c.bf16 %v2827_v43, %v2825_v53 }
 0x163   :  { %v827_v47 = vpop.f32.mrf.mxu0  ;;  %v955_v8 = vpop.f32.mrf.mxu1 }
 0x164   :  { %2095 = vst [vmem:[%s2941_s2 + $0x78] sm:$0xff] %v1999_v5   ;;  %v1503_v30 = vadd.f32 %v1502_v3, %v2515_v11  ;;  %v1636_v0 = vadd.f32 %v1635_v2, %v1573_v26  ;;  %2111 = vst [vmem:[%s2941_s2 + $0xf8] sm:$0xff] %v2079_v54   ;;  %v1577_v11 = vmul.f32 %v2537_v25, %v2537_v25 }
 0x166   :  { %v1504_v19 = vadd.f32 %v1503_v30, %v2519_v15  ;;  %v1637_v10 = vadd.f32 %v1636_v0, %v1574_v60  ;;  %v1579_v15 = vmul.f32 %v2555_v35, %v2555_v35 }
 0x168   :  { %v1505_v33 = vadd.f32 %v1504_v19, %v2533_v21  ;;  %v1638_v9 = vadd.f32 %v1637_v10, %v1575_v59  ;;  %v1580_v21 = vmul.f32 %v2569_v41, %v2569_v41 }
 0x16a   :  { %v1506_v36 = vadd.f32 %v1505_v33, %v2537_v25  ;;  %v1639_v38 = vadd.f32 %v1638_v9, %v1576_v32  ;;  %v1581_v25 = vmul.f32 %v2573_v45, %v2573_v45  ;;  %v1591_v32 = vmul.f32 %v2676_v62, %v2676_v62 }
 0x16c   :  { %v1507_v40 = vadd.f32 %v1506_v36, %v2551_v31  ;;  %v1640_v49 = vadd.f32 %v1639_v38, %v1577_v11  ;;  %v1582_v31 = vmul.f32 %v2587_v51, %v2587_v51  ;;  %v1592_v11 = vmul.f32 %v2696_v16, %v2696_v16 }
 0x16d   :  { %v1593_v38 = vmul.f32 %v2706_v37, %v2706_v37 }
 0x16e   :  { %v1508_v44 = vadd.f32 %v1507_v40, %v2555_v35  ;;  %v1641_v17 = vadd.f32 %v1640_v49, %v1578_v42  ;;  %v1583_v35 = vmul.f32 %v2591_v55, %v2591_v55  ;;  %v1594_v40 = vmul.f32 %v2726_v56, %v2726_v56 }
 0x170   :  { %v1509_v34 = vadd.f32 %v1508_v44, %v2569_v41  ;;  %v1642_v12 = vadd.f32 %v1641_v17, %v1579_v15  ;;  %v1584_v41 = vmul.f32 %v2605_v61, %v2605_v61  ;;  %v1595_v15 = vmul.f32 %v2736_v4, %v2736_v4 }
 0x171   :  { %v1596_v17 = vmul.f32 %v2754_v27, %v2754_v27 }
 0x172   :  { %v1510_v52 = vadd.f32 %v1509_v34, %v2573_v45  ;;  %v1643_v57 = vadd.f32 %v1642_v12, %v1580_v21  ;;  %v1585_v45 = vmul.f32 %v2609_v1, %v2609_v1  ;;  %v1597_v34 = vmul.f32 %v2762_v48, %v2762_v48 }
 0x174   :  { %v1644_v58 = vadd.f32 %v1643_v57, %v1581_v25  ;;  %v1511_v22 = vadd.f32 %v1510_v52, %v2587_v51  ;;  %v1586_v51 = vmul.f32 %v2623_v7, %v2623_v7  ;;  %v1598_v25 = vmul.f32 %v2778_v14, %v2778_v14 }
 0x175   :  { %v1599_v57 = vmul.f32 %v2786_v18, %v2786_v18 }
 0x176   :  { %v1512_v28 = vadd.f32 %v1511_v22, %v2591_v55  ;;  %v1645_v63 = vadd.f32 %v1644_v58, %v1582_v31  ;;  %v1587_v55 = vmul.f32 %v2627_v13, %v2627_v13  ;;  %v1600_v58 = vmul.f32 %v2800_v39, %v2800_v39 }
 0x178   :  { %v1513_v2 = vadd.f32 %v1512_v28, %v2605_v61  ;;  %v1646_v20 = vadd.f32 %v1645_v63, %v1583_v35  ;;  %v1588_v61 = vmul.f32 %v2641_v23, %v2641_v23  ;;  %v1601_v35 = vmul.f32 %v2803_v50, %v2803_v50 }
 0x179   :  { %v1602_v63 = vmul.f32 %v2813_v24, %v2813_v24 }
 0x17a   :  { %v1514_v5 = vadd.f32 %v1513_v2, %v2609_v1  ;;  %v1647_v3 = vadd.f32 %v1646_v20, %v1584_v41  ;;  %v1589_v1 = vmul.f32 %v2645_v29, %v2645_v29  ;;  %v1603_v2 = vmul.f32 %v2815_v6, %v2815_v6 }
 0x17c   :  { %v1515_v26 = vadd.f32 %v1514_v5, %v2623_v7  ;;  %v1648_v54 = vadd.f32 %v1647_v3, %v1585_v45  ;;  %v1590_v7 = vmul.f32 %v2665_v46, %v2665_v46  ;;  %v1604_v45 = vmul.f32 %v2825_v53, %v2825_v53 }
 0x17d   :  { %v1605_v3 = vmul.f32 %v2827_v43, %v2827_v43 }
 0x17e   :  { %v1516_v47 = vadd.f32 %v1515_v26, %v2627_v13  ;;  %v1649_v8 = vadd.f32 %v1648_v54, %v1586_v51 }
 0x180   :  { %v1517_v60 = vadd.f32 %v1516_v47, %v2641_v23  ;;  %v1650_v30 = vadd.f32 %v1649_v8, %v1587_v55 }
 0x182   :  { %v1518_v0 = vadd.f32 %v1517_v60, %v2645_v29  ;;  %v1651_v59 = vadd.f32 %v1650_v30, %v1588_v61 }
 0x184   :  { %v1519_v19 = vadd.f32 %v1518_v0, %v2665_v46  ;;  %v1652_v10 = vadd.f32 %v1651_v59, %v1589_v1 }
 0x186   :  { %v1520_v13 = vadd.f32 %v1519_v19, %v2676_v62  ;;  %v1653_v33 = vadd.f32 %v1652_v10, %v1590_v7 }
 0x188   :  { %v1654_v23 = vadd.f32 %v1653_v33, %v1591_v32  ;;  %v1521_v9 = vadd.f32 %v1520_v13, %v2696_v16 }
 0x18a   :  { %v1655_v29 = vadd.f32 %v1654_v23, %v1592_v11  ;;  %v1522_v36 = vadd.f32 %v1521_v9, %v2706_v37 }
 0x18c   :  { %v1656_v46 = vadd.f32 %v1655_v29, %v1593_v38  ;;  %v1523_v42 = vadd.f32 %v1522_v36, %v2726_v56 }
 0x18e   :  { %v1657_v62 = vadd.f32 %v1656_v46, %v1594_v40  ;;  %v1524_v49 = vadd.f32 %v1523_v42, %v2736_v4 }
 0x190   :  { %v1658_v44 = vadd.f32 %v1657_v62, %v1595_v15  ;;  %v1525_v16 = vadd.f32 %v1524_v49, %v2754_v27 }
 0x192   :  { %v1659_v21 = vadd.f32 %v1658_v44, %v1596_v17  ;;  %v1526_v37 = vadd.f32 %v1525_v16, %v2762_v48 }
 0x194   :  { %v1660_v12 = vadd.f32 %v1659_v21, %v1597_v34  ;;  %v1527_v56 = vadd.f32 %v1526_v37, %v2778_v14 }
 0x196   :  { %v1661_v52 = vadd.f32 %v1660_v12, %v1598_v25  ;;  %v1528_v4 = vadd.f32 %v1527_v56, %v2786_v18 }
 0x198   :  { %v1662_v31 = vadd.f32 %v1661_v52, %v1599_v57  ;;  %v1529_v27 = vadd.f32 %v1528_v4, %v2800_v39 }
 0x19a   :  { %v1663_v22 = vadd.f32 %v1662_v31, %v1600_v58  ;;  %v1530_v48 = vadd.f32 %v1529_v27, %v2803_v50 }
 0x19c   :  { %v1664_v28 = vadd.f32 %v1663_v22, %v1601_v35  ;;  %v1531_v14 = vadd.f32 %v1530_v48, %v2813_v24 }
 0x19e   :  { %v1665_v41 = vadd.f32 %v1664_v28, %v1602_v63  ;;  %v1532_v18 = vadd.f32 %v1531_v14, %v2815_v6 }
 0x1a0   :  { %v1666_v20 = vadd.f32 %v1665_v41, %v1603_v2  ;;  %v1533_v39 = vadd.f32 %v1532_v18, %v2825_v53 }
 0x1a2   :  { %v1667_v5 = vadd.f32 %v1666_v20, %v1604_v45  ;;  %v1534_v50 = vadd.f32 %v1533_v39, %v2827_v43 }
 0x1a4   :  { %v1535_v51 = vrot.slane %v1534_v50, 4  ;;  %v1668_v24 = vadd.f32 %v1667_v5, %v1605_v3 }
 0x1a6   :  { %v1536_v26 = vadd.f32 %v1535_v51, %v1534_v50  ;;  %v1669_v54 = vrot.slane %v1668_v24, 4 }
 0x1a8   :  { %v1537_v55 = vrot.slane %v1536_v26, 2  ;;  %v1670_v47 = vadd.f32 %v1669_v54, %v1668_v24 }
 0x1aa   :  { %v1538_v8 = vadd.f32 %v1537_v55, %v1536_v26  ;;  %v1671_v6 = vrot.slane %v1670_v47, 2 }
 0x1ac   :  { %v1539_v61 = vrot.slane %v1538_v8, 1  ;;  %v1672_v60 = vadd.f32 %v1671_v6, %v1670_v47 }
 0x1ae   :  { %v1540_v30 = vadd.f32 %v1539_v61, %v1538_v8  ;;  %v1673_v1 = vrot.slane %v1672_v60, 1 }
 0x1b0   :  { %1541 = vst [vmem:[%s2942_s3] sm:$0x1] %v1540_v30  ;;  %v1674_v53 = vadd.f32 %v1673_v1, %v1672_v60 }
 0x1b2   :  { %1675 = vst [vmem:[%s2943_s4] sm:$0x1] %v1674_v53 }

// kernel: netG64_forward.17
= control target key start
LH: loop header
LB: loop body
LE: loop exit
PB: predicated region body
PF: predicated region fallthrough
CT: control target
= control target key end

     0   :  { %s699_s9 = smov 0   ;;  %s701_s10 = smov 0   ;;  %s778_s0 = inlined_call_operand.vmem [shape: bf16[16,72], index: 0, kind: input, shape index: {}]   ;;  %s779_s1 = inlined_call_operand.vmem [shape: bf16[72,2048], index: 1, kind: input, shape index: {}]   ;;  %s780_s2 = inlined_call_operand.vmem [shape: f32[16,2048], index: 2, kind: output, shape index: {}]  }
   0x1   :  { %s703_s11 = smov 0   ;;  %s705_s12 = smov 0  }
   0x2   :  { %s707_s13 = smov 0  }
   0x3 LB: > { %s27_s14 = sadd.s32 1, %s677_s12  ;;  %s548_s15 = sadd.s32 4294967295, %s681_s13   ;;  %s681_s13 = sphi %s707_s13, %s12_s13   ;;  %s677_s12 = sphi %s705_s12, %s785_s12   ;;  %s673_s11 = sphi %s703_s11, %s784_s11   ;;  %s669_s10 = sphi %s701_s10, %s783_s10   ;;  %s665_s9 = sphi %s699_s9, %s782_s9  }
   0x4   : > { %p29_p0 = scmp.ge.s32.totalorder %s27_s14, 8  ;;  %p75_p1 = scmp.ne.s32.totalorder %s669_s10, %s665_s9 }
   0x5   : > { %p76_p2 = scmp.eq.s32.totalorder %s681_s13, 0  ;;  %p107_p4 = scmp.eq.s32.totalorder %s548_s15, 7 }
   0x6   : > { %s787_s14 = smov (%p29_p0, %s27_s14), 0  ;;  %s68_s17 = sadd.s32 1, %s669_s10 }
   0x7   : > { %p77_p3 = por %p76_p2, %p75_p1  ;;  %s64_s16 = ssub.s32 %s677_s12, %s787_s14 }
   0x8   : > { %p66_p5 = scmp.eq.s32.totalorder %s64_s16, 0  ;;  %p734_p6 = por %p107_p4, %p75_p1 }
   0x9   : > { %p552_p7 = scmp.ge.s32.totalorder %s681_s13, 8 }
   0xa   : > { %s739_s19 = scalar_select %p66_p5, %s669_s10, %s68_s17  }
   0xb   : > { %141 = sbr.rel (%p552_p7) target bundleno = 29 (0x1d), region = 20 }
  0x10   : > { %144 = sbr.rel (!%p77_p3) target bundleno = 29 (0x1d), region = 24  ;;  %s146_s20 = sand.u32 (%p77_p3), 1, %s669_s10  }
  0x11   : > { %s575_s21 = sshll.u32 (%p77_p3), %s677_s12, 3  ;;  %s577_s22 = smul.u32 (%p77_p3), 72, %s146_s20 }
  0x12   : > { %s154_s25 = scalar_lea.vmem (%p77_p3), %s779_s1, %s575_s21 }
  0x13   : > { %v199_v0 = vld [vmem:[%s154_s25] sm:$0xff] (%p77_p3)  ;;  %s148_s26 = scalar_lea.vmem (%p77_p3), [#allocation3], %s577_s22 }
  0x14   : > { %v201_v1 = vld [vmem:[%s154_s25 + $0x40] sm:$0xff] (%p77_p3)  ;;  %200 = vst [vmem:[%s148_s26] sm:$0xff] (%p77_p3), %v199_v0 }
  0x15   : > { %v203_v2 = vld [vmem:[%s154_s25 + $0x80] sm:$0xff]  ;;  %202 = vst [vmem:[%s148_s26 + $0x8] sm:$0xff] %v201_v1 }
  0x16   : > { %v205_v3 = vld [vmem:[%s154_s25 + $0xc0] sm:$0xff]  ;;  %204 = vst [vmem:[%s148_s26 + $0x10] sm:$0xff] %v203_v2 }
  0x17   : > { %v207_v4 = vld [vmem:[%s154_s25 + $0x100] sm:$0xff]  ;;  %206 = vst [vmem:[%s148_s26 + $0x18] sm:$0xff] %v205_v3 }
  0x18   : > { %v209_v5 = vld [vmem:[%s154_s25 + $0x140] sm:$0xff]  ;;  %208 = vst [vmem:[%s148_s26 + $0x20] sm:$0xff] %v207_v4 }
  0x19   : > { %210 = vst [vmem:[%s148_s26 + $0x28] sm:$0xff] %v209_v5  ;;  %v211_v6 = vld [vmem:[%s154_s25 + $0x180] sm:$0xff] }
  0x1a   : > { %v213_v7 = vld [vmem:[%s154_s25 + $0x1c0] sm:$0xff]  ;;  %212 = vst [vmem:[%s148_s26 + $0x30] sm:$0xff] %v211_v6 }
  0x1b   : > { %v215_v8 = vld [vmem:[%s154_s25 + $0x200] sm:$0xff]  ;;  %214 = vst [vmem:[%s148_s26 + $0x38] sm:$0xff] %v213_v7 }
  0x1c   : > { %216 = vst [vmem:[%s148_s26 + $0x40] sm:$0xff] %v215_v8 }
  0x1d PF: > { %p555_p8 = scmp.ge.s32.totalorder %s681_s13, 1  ;;  %p221_p9 = scmp.lt.s32.totalorder %s681_s13, 9 }
  0x1f   : > { %p222_p10 = pnand %p555_p8, %p221_p9 }
  0x20   : > { %s228_s27 = sand.u32 (!%p222_p10), 1, %s665_s9  }
  0x21   : > { %225 = sbr.rel (%p222_p10) target bundleno = 283 (0x11b), region = 62  ;;  %s556_s4 = sshll.u32 (!%p222_p10), %s228_s27, 5 }
  0x22   : > { %s578_s28 = smul.u32 (!%p222_p10), 72, %s228_s27  ;;  %s255_s5 = scalar_lea.vmem (!%p222_p10), [#allocation4], %s556_s4 }
  0x24   : > { %s230_s29 = scalar_lea.vmem (!%p222_p10), [#allocation3], %s578_s28 }
  0x26   : > { %v683_v9 = vmov 0   ;;  %v292_v10 = vld [vmem:[%s230_s29 + $0x40] sm:$0xff]  ;;  %vm347_vm0 = vcmask 1043456   ;;  %v622_v13 = vld [vmem:[%s230_s29 + $0x34] ss:$8 sps:$4 sm:$0xff]   ;;  %vm343_vm1 = vcmask 588800  }
  0x27   : > { %386 = vmatprep.mubr.bf16.mxu0 %v683_v9  ;;  %v567_v11 = vcombine.high %v292_v10, %v292_v10  ;;  %v566_v12 = vcombine.low %v292_v10, %v292_v10  ;;  %v624_v15 = vld [vmem:[%s230_s29 + $0x30] ss:$8 sps:$4 sm:$0xff]   ;;  %v625_v16 = vld [vmem:[%s230_s29 + $0x24] ss:$8 sps:$4 sm:$0xff]   ;;  %v627_v17 = vld [vmem:[%s230_s29 + $0x20] ss:$8 sps:$4 sm:$0xff]  }
  0x28   : > { %v628_v18 = vld [vmem:[%s230_s29 + $0x14] ss:$8 sps:$4 sm:$0xff]   ;;  %v630_v19 = vld [vmem:[%s230_s29 + $0x10] ss:$8 sps:$4 sm:$0xff]   ;;  %v631_v20 = vld [vmem:[%s230_s29 + $0x4] ss:$8 sps:$4 sm:$0xff]  }
  0x29   : > { %568 = vmatprep.subr.msk.bf16.mxu0 %vm347_vm0, %v567_v11  ;;  %v349_v14 = vsel %vm347_vm0, %v566_v12, 0  ;;  %v633_v21 = vld [vmem:[%s230_s29] ss:$8 sps:$4 sm:$0xff]   ;;  %s576_s6 = sshll.u32 (%p734_p6), %s673_s11, 4 }
  0x2a   : > { %361 = vmatpush1.bf16.msra.mxu0 %v349_v14  ;;  %v634_v22 = vld [vmem:[%s778_s0] sm:$0xff]   ;;  %s432_s9 = scalar_lea.vmem (%p734_p6), %s780_s2, %s576_s6 }
  0x2b   : > { %362 = vmatprep.subr.bf16.mxu0 %v622_v13 }
  0x2e   : > { %363 = vmatpush1.bf16.msra.mxu0 %v624_v15 }
  0x2f   : > { %364 = vmatprep.subr.bf16.mxu0 %v625_v16 }
  0x32   : > { %365 = vmatpush1.bf16.msra.mxu0 %v627_v17 }
  0x33   : > { %366 = vmatprep.subr.bf16.mxu0 %v628_v18 }
  0x36   : > { %367 = vmatpush1.bf16.msra.mxu0 %v630_v19 }
  0x37   : > { %368 = vmatprep.subr.bf16.mxu0 %v631_v20 }
  0x3a   : > { %369 = vmatpush1.bf16.msra.mxu0 %v633_v21 }
  0x3d   : > { %569 = vmatmul.mubr.msk.bf16.vlgmr.msra.gmra.mxu0 %vm343_vm1, %v634_v22 }
  0xfd   : > { %v388_v23 = vpop.f32.mrf.mxu0 }
  0xfe   : > { %635 = vtanh.f32 %v388_v23 }
  0xff   : > { %v390_v24 = vpop.f32.mrf.mxu0 }
 0x100   : > { %637 = vtanh.f32 %v390_v24 }
 0x101   : > { %v392_v25 = vpop.f32.mrf.mxu0 }
 0x102   : > { %639 = vtanh.f32 %v392_v25 }
 0x103   : > { %v394_v26 = vpop.f32.mrf.mxu0 }
 0x104   : > { %641 = vtanh.f32 %v394_v26 }
 0x10b   : > { %v636_v27 = vpop.eup %635 }
 0x10c   : > { %416 = vst [vmem:[%s255_s5] sm:$0xff] %v636_v27 }
 0x10d   : > { %v638_v28 = vpop.eup %637 }
 0x10e   : > { %417 = vst [vmem:[%s255_s5 + $0x8] sm:$0xff] %v638_v28  ;;  %426 = sbr.rel (!%p734_p6) target bundleno = 283 (0x11b), region = 78 }
 0x10f   : > { %v640_v29 = vpop.eup %639 }
 0x110   : > { %418 = vst [vmem:[%s255_s5 + $0x10] sm:$0xff] %v640_v29 }
 0x111   : > { %v642_v30 = vpop.eup %641 }
 0x112   : > { %419 = vst [vmem:[%s255_s5 + $0x18] sm:$0xff] %v642_v30 }
 0x113   : > { %v445_v31 = vld [vmem:[%s255_s5] sm:$0xff] }
 0x114   : > { %446 = vst [vmem:[%s432_s9] sm:$0xff] %v445_v31 }
 0x115   : > { %v447_v32 = vld [vmem:[%s255_s5 + $0x8] sm:$0xff] }
 0x116   : > { %448 = vst [vmem:[%s432_s9 + $0x8] sm:$0xff] %v447_v32 }
 0x117   : > { %v449_v33 = vld [vmem:[%s255_s5 + $0x10] sm:$0xff] }
 0x118   : > { %450 = vst [vmem:[%s432_s9 + $0x80] sm:$0xff] %v449_v33 }
 0x119   : > { %v451_v34 = vld [vmem:[%s255_s5 + $0x18] sm:$0xff] }
 0x11a   : > { %452 = vst [vmem:[%s432_s9 + $0x88] sm:$0xff] %v451_v34 }
 0x11b PF: > { %s12_s13 = sadd.s32 1, %s681_s13   ;;  %s782_s9 = smov %s669_s10 }
 0x11c   : > { %p9_p11 = scmp.ge.s32.totalorder %s12_s13, 10   ;;  %s783_s10 = smov %s739_s19 }
 0x11d   : > { %s784_s11 = smov %s677_s12  ;;  %s785_s12 = smov %s787_s14 }
 0x11e   :  { %11 = sbr.rel (!%p9_p11) target bundleno = 3 (0x3), region = 135 }

</bundles_post_ra>
